<compile_context>
chip_gen: v7x
topology: tpu7x:2x2x1
jax: 0.10.0
libtpu: 0.0.40
codegen_flags: <defaults>
</compile_context>

<pallas_src>
import functools
import math

import jax
import jax.numpy as jnp
from jax.experimental import pallas as pl
from jax.experimental.pallas import tpu as pltpu


# ------------------------------ fused kernel ------------------------------- #

def _nel_fused_kernel(vis_ref, aux_ref,
                      wc1, bc1, bc2, w0sm, b0, b1, b2, bh0, bq,
                      wc2_hbm, w0c_hbm, w1_hbm, w2_hbm, wh0_hbm, wq_hbm,
                      o_ref,
                      wc2_v, w0c_v, w1_v, w2_v, wh0_v, wq_v, sem):
    f32 = jnp.float32
    bf16 = jnp.bfloat16

    # Kick off all later-layer weight DMAs immediately; each .wait() is placed
    # right before the matmul that consumes it, so the weight stream overlaps
    # with the serial matmul chain.
    copies = [
        pltpu.make_async_copy(wc2_hbm, wc2_v, sem.at[0]),
        pltpu.make_async_copy(w0c_hbm, w0c_v, sem.at[1]),
        pltpu.make_async_copy(w1_hbm, w1_v, sem.at[2]),
        pltpu.make_async_copy(w2_hbm, w2_v, sem.at[3]),
        pltpu.make_async_copy(wh0_hbm, wh0_v, sem.at[4]),
        pltpu.make_async_copy(wq_hbm, wq_v, sem.at[5]),
    ]
    for cp in copies:
        cp.start()

    def dense(x, w, b, relu=True):
        y = jnp.dot(x.astype(bf16), w, preferred_element_type=f32) + b
        return jnp.maximum(y, 0.0) if relu else y

    # conv1/conv2 as dense matmuls on flattened-NCHW activations (im2col baked
    # into wc1/wc2); activations stay resident, never written back to HBM.
    h = dense(vis_ref[...], wc1[...], bc1[...])        # (B, 8*7*7)  = (B, 392)

    copies[0].wait()
    h = dense(h, wc2_v[...], bc2[...])                 # (B, 16*5*5) = (B, 400)

    # l0 over [conv_feat | scent | moved]: concat folded into split weights;
    # the 4 scent/moved rows are cheap VPU rank-1 updates on the side.
    copies[1].wait()
    aux = aux_ref[...]                                 # (B, 4) f32 = [scent | moved]
    x0 = jnp.dot(h.astype(bf16), w0c_v[...], preferred_element_type=f32)
    x0 = x0 + aux[:, 0:1] * w0sm[0:1, :]
    x0 = x0 + aux[:, 1:2] * w0sm[1:2, :]
    x0 = x0 + aux[:, 2:3] * w0sm[2:3, :]
    x0 = x0 + aux[:, 3:4] * w0sm[3:4, :]
    h = jnp.maximum(x0 + b0[...], 0.0)                 # (B, 512)

    copies[2].wait()
    h = dense(h, w1_v[...], b1[...])                   # (B, 256)
    copies[3].wait()
    h = dense(h, w2_v[...], b2[...])                   # (B, 128)

    # Merged dueling head: one (128,512) matmul for both branch hiddens; the
    # dueling combine (adv - mean(adv) + value) is pre-folded into wq/bq, so
    # the last (512,128) matmul emits lane-dense Q-values (cols >= A are 0).
    copies[4].wait()
    av = dense(h, wh0_v[...], bh0[...])                # (B, 512) = [a-hid | v-hid]
    copies[5].wait()
    o_ref[...] = dense(av, wq_v[...], bq[...], relu=False)   # (B, 128)


@functools.partial(jax.jit, static_argnames=("action_size",))
def nel_forward(kp, scent, vision, moved, *, action_size):
    B = vision.shape[0]
    vis_flat = vision.reshape(B, 3 * 11 * 11)          # contiguous NCHW flatten
    aux = jnp.concatenate([scent, moved], axis=1)      # (B, 4)

    auto_args = [vis_flat, aux,
                 kp['wc1'], kp['bc1'], kp['bc2'], kp['w0sm'],
                 kp['b0'], kp['b1'], kp['b2'], kp['bh0'], kp['bq']]
    hbm_args = [kp['wc2'], kp['w0c'], kp['w1'], kp['w2'], kp['wh0'], kp['wq']]

    in_specs = ([pl.BlockSpec(a.shape, lambda i: (0, 0)) for a in auto_args]
                + [pl.BlockSpec(memory_space=pl.ANY) for _ in hbm_args])
    scratch_shapes = ([pltpu.VMEM(a.shape, a.dtype) for a in hbm_args]
                      + [pltpu.SemaphoreType.DMA((len(hbm_args),))])

    flops = 2 * B * (363 * 392 + 392 * 400 + 400 * 512 + 512 * 256
                     + 256 * 128 + 128 * 512 + 512 * 128)
    bytes_accessed = int(sum(a.size * a.dtype.itemsize
                             for a in auto_args + hbm_args) + B * 128 * 4)

    q_padded = pl.pallas_call(
        _nel_fused_kernel,
        grid=(1,),
        out_shape=jax.ShapeDtypeStruct((B, 128), jnp.float32),
        in_specs=in_specs,
        out_specs=pl.BlockSpec((B, 128), lambda i: (0, 0)),
        scratch_shapes=scratch_shapes,
        compiler_params=pltpu.CompilerParams(
            dimension_semantics=("arbitrary",)),
        cost_estimate=pl.CostEstimate(flops=flops, transcendentals=0,
                                      bytes_accessed=bytes_accessed),
    )(*auto_args, *hbm_args)

    # Lane-dense 128-wide store inside the kernel; slice to action_size here.
    return q_padded[:, :action_size]


# ----------------------- parameter init / preparation ---------------------- #

def _uniform(key, shape, fan_in):
    bound = 1.0 / math.sqrt(fan_in)
    return jax.random.uniform(key, shape, jnp.float32, -bound, bound)


def init_params(key, action_size):
    """PyTorch-layout module parameters (conv OIHW, linear (in,out))."""
    ks = jax.random.split(key, 18)
    p = {}
    p['conv1_w'] = _uniform(ks[0], (8, 3, 5, 5), 3 * 5 * 5)
    p['conv1_b'] = _uniform(ks[1], (8,), 3 * 5 * 5)
    p['conv2_w'] = _uniform(ks[2], (16, 8, 3, 3), 8 * 3 * 3)
    p['conv2_b'] = _uniform(ks[3], (16,), 8 * 3 * 3)

    def lin(kw, kb, fin, fout):
        return _uniform(kw, (fin, fout), fin), _uniform(kb, (1, fout), fin)

    p['l0_w'],  p['l0_b']  = lin(ks[4],  ks[5],  16 * 5 * 5 + 3 + 1, 512)
    p['l1_w'],  p['l1_b']  = lin(ks[6],  ks[7],  512, 256)
    p['l2_w'],  p['l2_b']  = lin(ks[8],  ks[9],  256, 128)
    p['la0_w'], p['la0_b'] = lin(ks[10], ks[11], 128, 256)
    p['la1_w'], p['la1_b'] = lin(ks[12], ks[13], 256, action_size)
    p['lv0_w'], p['lv0_b'] = lin(ks[14], ks[15], 128, 256)
    p['lv1_w'], p['lv1_b'] = lin(ks[16], ks[17], 256, 1)
    return p


def conv_as_dense_matrix(w_oihw, ih, iw):
    """VALID conv as a dense (IC*IH*IW, OC*OH*OW) matrix over flattened NCHW."""
    oc, ic, kh, kw = w_oihw.shape
    oh, ow = ih - kh + 1, iw - kw + 1
    eye = jnp.eye(ic * ih * iw, dtype=jnp.float32).reshape(ic * ih * iw, ic, ih, iw)
    out = jax.lax.conv_general_dilated(
        eye, w_oihw, (1, 1), 'VALID',
        dimension_numbers=('NCHW', 'OIHW', 'NCHW'))
    return out.reshape(ic * ih * iw, oc * oh * ow)


def prepare_kernel_params(p, action_size):
    """One-time transform into the fused, bf16, MXU-friendly layout."""
    bf16 = jnp.bfloat16
    A = action_size
    kp = {}
    kp['wc1'] = conv_as_dense_matrix(p['conv1_w'], 11, 11).astype(bf16)   # (363, 392)
    kp['bc1'] = jnp.repeat(p['conv1_b'], 7 * 7).reshape(1, 392)
    kp['wc2'] = conv_as_dense_matrix(p['conv2_w'], 7, 7).astype(bf16)     # (392, 400)
    kp['bc2'] = jnp.repeat(p['conv2_b'], 5 * 5).reshape(1, 400)

    kp['w0c'] = p['l0_w'][:400].astype(bf16)      # conv-feature rows   (400, 512)
    kp['w0sm'] = p['l0_w'][400:404]               # [scent|moved] rows  (4, 512), f32
    kp['b0'] = p['l0_b']
    kp['w1'] = p['l1_w'].astype(bf16); kp['b1'] = p['l1_b']
    kp['w2'] = p['l2_w'].astype(bf16); kp['b2'] = p['l2_b']

    # merged head 0: [advantage-hidden | value-hidden] in one matmul
    kp['wh0'] = jnp.concatenate([p['la0_w'], p['lv0_w']], axis=1).astype(bf16)  # (128, 512)
    kp['bh0'] = jnp.concatenate([p['la0_b'], p['lv0_b']], axis=1)               # (1, 512)

    # merged head 1 with the dueling combine folded in:
    #   Q[:, j] = a_hid @ (la1_w[:, j] - mean_k la1_w[:, k]) + v_hid @ lv1_w
    #           + (la1_b[j] - mean(la1_b) + lv1_b)
    # padded to 128 output lanes (cols >= A are zero, sliced off in wrapper).
    adv_w = p['la1_w'] - jnp.mean(p['la1_w'], axis=1, keepdims=True)   # (256, A)
    val_w = jnp.broadcast_to(p['lv1_w'], (256, A))                     # (256, A)
    wq = jnp.zeros((512, 128), jnp.float32)
    wq = wq.at[:256, :A].set(adv_w)
    wq = wq.at[256:, :A].set(val_w)
    bq = jnp.zeros((1, 128), jnp.float32)
    bq = bq.at[:, :A].set(p['la1_b'] - jnp.mean(p['la1_b']) + p['lv1_b'])
    kp['wq'] = wq.astype(bf16)
    kp['bq'] = bq
    return kp


# --------------------------- pure-JAX references ---------------------------- #

def reference_forward(p, scent, vision, moved):
    """f32 reference with the exact PyTorch-module semantics."""
    B = vision.shape[0]
    dn = ('NCHW', 'OIHW', 'NCHW')
    c = jax.lax.conv_general_dilated(vision, p['conv1_w'], (1, 1), 'VALID',
                                     dimension_numbers=dn)
    c = jnp.maximum(c + p['conv1_b'].reshape(1, 8, 1, 1), 0.0)
    c = jax.lax.conv_general_dilated(c, p['conv2_w'], (1, 1), 'VALID',
                                     dimension_numbers=dn)
    c = jnp.maximum(c + p['conv2_b'].reshape(1, 16, 1, 1), 0.0).reshape(B, 400)
    x = jnp.concatenate([c, scent, moved], axis=1)
    h = jnp.maximum(x @ p['l0_w'] + p['l0_b'], 0.0)
    h = jnp.maximum(h @ p['l1_w'] + p['l1_b'], 0.0)
    h = jnp.maximum(h @ p['l2_w'] + p['l2_b'], 0.0)
    a = jnp.maximum(h @ p['la0_w'] + p['la0_b'], 0.0)
    adv = a @ p['la1_w'] + p['la1_b']
    v = jnp.maximum(h @ p['lv0_w'] + p['lv0_b'], 0.0)
    val = v @ p['lv1_w'] + p['lv1_b']
    return adv - jnp.mean(adv, axis=1, keepdims=True) + val


def matched_reference(kp, vis_flat, aux, A):
    """Same fused layout / bf16 rounding as the kernel, in plain JAX (tight check)."""
    bf, f32 = jnp.bfloat16, jnp.float32

    def dense(x, w, b, relu=True):
        y = jnp.dot(x.astype(bf).astype(f32), w.astype(f32)) + b
        return jnp.maximum(y, 0.0) if relu else y

    h = dense(vis_flat, kp['wc1'], kp['bc1'])
    h = dense(h, kp['wc2'], kp['bc2'])
    x0 = jnp.dot(h.astype(bf).astype(f32), kp['w0c'].astype(f32))
    for k in range(4):
        x0 = x0 + aux[:, k:k + 1] * kp['w0sm'][k:k + 1, :]
    h = jnp.maximum(x0 + kp['b0'], 0.0)
    h = dense(h, kp['w1'], kp['b1'])
    h = dense(h, kp['w2'], kp['b2'])
    av = dense(h, kp['wh0'], kp['bh0'])
    q = dense(av, kp['wq'], kp['bq'], relu=False)
    return q[:, :A]


# --------------------------------- main ------------------------------------ #

if __name__ == "__main__":
    key = jax.random.PRNGKey(0)
    pkey, skey, vkey, mkey = jax.random.split(key, 4)

    ACTION_SIZE = 4
    B = 2

    params = init_params(pkey, ACTION_SIZE)
    kparams = prepare_kernel_params(params, ACTION_SIZE)   # one-time, off hot path

    scent = jax.random.normal(skey, (B, 3), jnp.float32)
    vision = jax.random.normal(vkey, (B, 3, 11, 11), jnp.float32)
    moved = jax.random.bernoulli(mkey, 0.5, (B, 1)).astype(jnp.float32)

    out = nel_forward(kparams, scent, vision, moved, action_size=ACTION_SIZE)
    out = jax.block_until_ready(out)
    assert out.shape == (B, ACTION_SIZE), out.shape

    # 1) PyTorch-semantics f32 reference (tolerance accounts for bf16 weights).
    ref = jax.block_until_ready(reference_forward(params, scent, vision, moved))
    assert jnp.allclose(out, ref, atol=3e-2, rtol=3e-2), (out, ref)

    # 2) bf16-matched reference with identical fused layout (tight tolerance).
    aux_host = jnp.concatenate([scent, moved], axis=1)
    mref = jax.block_until_ready(
        matched_reference(kparams, vision.reshape(B, -1), aux_host, ACTION_SIZE))
    assert jnp.allclose(out, mref, atol=5e-3, rtol=5e-3), (out, mref)

    print("KERNEL_OK")
</pallas_src>

<mosaic_0001>
module attributes {stable_mosaic.version = 11 : i64} {
  func.func @_nel_fused_kernel(%arg0: i32, %arg1: memref<2x363xf32, #tpu.memory_space<vmem>>, %arg2: memref<2x4xf32, #tpu.memory_space<vmem>>, %arg3: memref<363x392xbf16, #tpu.memory_space<vmem>>, %arg4: memref<1x392xf32, #tpu.memory_space<vmem>>, %arg5: memref<1x400xf32, #tpu.memory_space<vmem>>, %arg6: memref<4x512xf32, #tpu.memory_space<vmem>>, %arg7: memref<1x512xf32, #tpu.memory_space<vmem>>, %arg8: memref<1x256xf32, #tpu.memory_space<vmem>>, %arg9: memref<1x128xf32, #tpu.memory_space<vmem>>, %arg10: memref<1x512xf32, #tpu.memory_space<vmem>>, %arg11: memref<1x128xf32, #tpu.memory_space<vmem>>, %arg12: memref<392x400xbf16, #tpu.memory_space<any>>, %arg13: memref<400x512xbf16, #tpu.memory_space<any>>, %arg14: memref<512x256xbf16, #tpu.memory_space<any>>, %arg15: memref<256x128xbf16, #tpu.memory_space<any>>, %arg16: memref<128x512xbf16, #tpu.memory_space<any>>, %arg17: memref<512x128xbf16, #tpu.memory_space<any>>, %arg18: memref<2x128xf32, #tpu.memory_space<vmem>>, %arg19: memref<392x400xbf16, #tpu.memory_space<vmem>>, %arg20: memref<400x512xbf16, #tpu.memory_space<vmem>>, %arg21: memref<512x256xbf16, #tpu.memory_space<vmem>>, %arg22: memref<256x128xbf16, #tpu.memory_space<vmem>>, %arg23: memref<128x512xbf16, #tpu.memory_space<vmem>>, %arg24: memref<512x128xbf16, #tpu.memory_space<vmem>>, %arg25: memref<6x!tpu.dma_semaphore, #tpu.memory_space<semaphore_mem>>) attributes {dimension_semantics = [#tpu.dimension_semantics<arbitrary>], iteration_bounds = array<i64: 1>, scalar_prefetch = 0 : i64, scratch_operands = 7 : i64, tpu.core_type = #tpu.core_type<tc>, window_params = [{pipeline_mode = #tpu.pipeline_mode<synchronous>, transform_indices = @transform_0, window_bounds = array<i64: 2, 363>}, {pipeline_mode = #tpu.pipeline_mode<synchronous>, transform_indices = @transform_1, window_bounds = array<i64: 2, 4>}, {pipeline_mode = #tpu.pipeline_mode<synchronous>, transform_indices = @transform_2, window_bounds = array<i64: 363, 392>}, {pipeline_mode = #tpu.pipeline_mode<synchronous>, transform_indices = @transform_3, window_bounds = array<i64: 1, 392>}, {pipeline_mode = #tpu.pipeline_mode<synchronous>, transform_indices = @transform_4, window_bounds = array<i64: 1, 400>}, {pipeline_mode = #tpu.pipeline_mode<synchronous>, transform_indices = @transform_5, window_bounds = array<i64: 4, 512>}, {pipeline_mode = #tpu.pipeline_mode<synchronous>, transform_indices = @transform_6, window_bounds = array<i64: 1, 512>}, {pipeline_mode = #tpu.pipeline_mode<synchronous>, transform_indices = @transform_7, window_bounds = array<i64: 1, 256>}, {pipeline_mode = #tpu.pipeline_mode<synchronous>, transform_indices = @transform_8, window_bounds = array<i64: 1, 128>}, {pipeline_mode = #tpu.pipeline_mode<synchronous>, transform_indices = @transform_9, window_bounds = array<i64: 1, 512>}, {pipeline_mode = #tpu.pipeline_mode<synchronous>, transform_indices = @transform_10, window_bounds = array<i64: 1, 128>}, {}, {}, {}, {}, {}, {}, {pipeline_mode = #tpu.pipeline_mode<synchronous>, transform_indices = @transform_17, window_bounds = array<i64: 2, 128>}]} {
    %c0_i32 = arith.constant 0 : i32
    %0 = tpu.memref_slice %arg25[%c0_i32] : memref<6x!tpu.dma_semaphore, #tpu.memory_space<semaphore_mem>> -> memref<1x!tpu.dma_semaphore, #tpu.memory_space<semaphore_mem>>
    %1 = tpu.memref_squeeze %0 : memref<1x!tpu.dma_semaphore, #tpu.memory_space<semaphore_mem>> -> memref<!tpu.dma_semaphore, #tpu.memory_space<semaphore_mem>>
    tpu.enqueue_dma source(%arg12 : memref<392x400xbf16, #tpu.memory_space<any>>) target(%arg19 : memref<392x400xbf16, #tpu.memory_space<vmem>>) target_semaphore(%1 : memref<!tpu.dma_semaphore, #tpu.memory_space<semaphore_mem>>)
    %c1_i32 = arith.constant 1 : i32
    %2 = tpu.memref_slice %arg25[%c1_i32] : memref<6x!tpu.dma_semaphore, #tpu.memory_space<semaphore_mem>> -> memref<1x!tpu.dma_semaphore, #tpu.memory_space<semaphore_mem>>
    %3 = tpu.memref_squeeze %2 : memref<1x!tpu.dma_semaphore, #tpu.memory_space<semaphore_mem>> -> memref<!tpu.dma_semaphore, #tpu.memory_space<semaphore_mem>>
    tpu.enqueue_dma source(%arg13 : memref<400x512xbf16, #tpu.memory_space<any>>) target(%arg20 : memref<400x512xbf16, #tpu.memory_space<vmem>>) target_semaphore(%3 : memref<!tpu.dma_semaphore, #tpu.memory_space<semaphore_mem>>)
    %c2_i32 = arith.constant 2 : i32
    %4 = tpu.memref_slice %arg25[%c2_i32] : memref<6x!tpu.dma_semaphore, #tpu.memory_space<semaphore_mem>> -> memref<1x!tpu.dma_semaphore, #tpu.memory_space<semaphore_mem>>
    %5 = tpu.memref_squeeze %4 : memref<1x!tpu.dma_semaphore, #tpu.memory_space<semaphore_mem>> -> memref<!tpu.dma_semaphore, #tpu.memory_space<semaphore_mem>>
    tpu.enqueue_dma source(%arg14 : memref<512x256xbf16, #tpu.memory_space<any>>) target(%arg21 : memref<512x256xbf16, #tpu.memory_space<vmem>>) target_semaphore(%5 : memref<!tpu.dma_semaphore, #tpu.memory_space<semaphore_mem>>)
    %c3_i32 = arith.constant 3 : i32
    %6 = tpu.memref_slice %arg25[%c3_i32] : memref<6x!tpu.dma_semaphore, #tpu.memory_space<semaphore_mem>> -> memref<1x!tpu.dma_semaphore, #tpu.memory_space<semaphore_mem>>
    %7 = tpu.memref_squeeze %6 : memref<1x!tpu.dma_semaphore, #tpu.memory_space<semaphore_mem>> -> memref<!tpu.dma_semaphore, #tpu.memory_space<semaphore_mem>>
    tpu.enqueue_dma source(%arg15 : memref<256x128xbf16, #tpu.memory_space<any>>) target(%arg22 : memref<256x128xbf16, #tpu.memory_space<vmem>>) target_semaphore(%7 : memref<!tpu.dma_semaphore, #tpu.memory_space<semaphore_mem>>)
    %c4_i32 = arith.constant 4 : i32
    %8 = tpu.memref_slice %arg25[%c4_i32] : memref<6x!tpu.dma_semaphore, #tpu.memory_space<semaphore_mem>> -> memref<1x!tpu.dma_semaphore, #tpu.memory_space<semaphore_mem>>
    %9 = tpu.memref_squeeze %8 : memref<1x!tpu.dma_semaphore, #tpu.memory_space<semaphore_mem>> -> memref<!tpu.dma_semaphore, #tpu.memory_space<semaphore_mem>>
    tpu.enqueue_dma source(%arg16 : memref<128x512xbf16, #tpu.memory_space<any>>) target(%arg23 : memref<128x512xbf16, #tpu.memory_space<vmem>>) target_semaphore(%9 : memref<!tpu.dma_semaphore, #tpu.memory_space<semaphore_mem>>)
    %c5_i32 = arith.constant 5 : i32
    %10 = tpu.memref_slice %arg25[%c5_i32] : memref<6x!tpu.dma_semaphore, #tpu.memory_space<semaphore_mem>> -> memref<1x!tpu.dma_semaphore, #tpu.memory_space<semaphore_mem>>
    %11 = tpu.memref_squeeze %10 : memref<1x!tpu.dma_semaphore, #tpu.memory_space<semaphore_mem>> -> memref<!tpu.dma_semaphore, #tpu.memory_space<semaphore_mem>>
    tpu.enqueue_dma source(%arg17 : memref<512x128xbf16, #tpu.memory_space<any>>) target(%arg24 : memref<512x128xbf16, #tpu.memory_space<vmem>>) target_semaphore(%11 : memref<!tpu.dma_semaphore, #tpu.memory_space<semaphore_mem>>)
    %c0 = arith.constant 0 : index
    %c0_0 = arith.constant 0 : index
    %12 = vector.load %arg1[%c0, %c0_0] : memref<2x363xf32, #tpu.memory_space<vmem>>, vector<2x363xf32>
    %c0_1 = arith.constant 0 : index
    %c0_2 = arith.constant 0 : index
    %13 = vector.load %arg3[%c0_1, %c0_2] : memref<363x392xbf16, #tpu.memory_space<vmem>>, vector<363x392xbf16>
    %c0_3 = arith.constant 0 : index
    %c0_4 = arith.constant 0 : index
    %14 = vector.load %arg4[%c0_3, %c0_4] : memref<1x392xf32, #tpu.memory_space<vmem>>, vector<1x392xf32>
    %15 = arith.truncf %12 : vector<2x363xf32> to vector<2x363xbf16>
    %cst = arith.constant dense<0.000000e+00> : vector<2x392xf32>
    %16 = tpu.matmul %15, %13, %cst {dimension_numbers = #tpu.dot_dimension_numbers<[1], [0], [0], [1], [0, 0, 1, 1], [], []>} : vector<2x363xbf16>, vector<363x392xbf16>, vector<2x392xf32> -> vector<2x392xf32>
    %17 = vector.broadcast %14 : vector<1x392xf32> to vector<2x392xf32>
    %18 = arith.addf %16, %17 : vector<2x392xf32>
    %cst_5 = arith.constant 0.000000e+00 : f32
    %19 = vector.broadcast %cst_5 : f32 to vector<2x392xf32>
    %20 = arith.maximumf %18, %19 : vector<2x392xf32>
    %c0_i32_6 = arith.constant 0 : i32
    %21 = tpu.memref_slice %arg25[%c0_i32_6] : memref<6x!tpu.dma_semaphore, #tpu.memory_space<semaphore_mem>> -> memref<1x!tpu.dma_semaphore, #tpu.memory_space<semaphore_mem>>
    %22 = tpu.memref_squeeze %21 : memref<1x!tpu.dma_semaphore, #tpu.memory_space<semaphore_mem>> -> memref<!tpu.dma_semaphore, #tpu.memory_space<semaphore_mem>>
    tpu.wait_dma2 semaphore(%22 : memref<!tpu.dma_semaphore, #tpu.memory_space<semaphore_mem>>) src(%arg12 : memref<392x400xbf16, #tpu.memory_space<any>>) dst(%arg19 : memref<392x400xbf16, #tpu.memory_space<vmem>>)
    %c0_7 = arith.constant 0 : index
    %c0_8 = arith.constant 0 : index
    %23 = vector.load %arg19[%c0_7, %c0_8] : memref<392x400xbf16, #tpu.memory_space<vmem>>, vector<392x400xbf16>
    %c0_9 = arith.constant 0 : index
    %c0_10 = arith.constant 0 : index
    %24 = vector.load %arg5[%c0_9, %c0_10] : memref<1x400xf32, #tpu.memory_space<vmem>>, vector<1x400xf32>
    %25 = arith.truncf %20 : vector<2x392xf32> to vector<2x392xbf16>
    %cst_11 = arith.constant dense<0.000000e+00> : vector<2x400xf32>
    %26 = tpu.matmul %25, %23, %cst_11 {dimension_numbers = #tpu.dot_dimension_numbers<[1], [0], [0], [1], [0, 0, 1, 1], [], []>} : vector<2x392xbf16>, vector<392x400xbf16>, vector<2x400xf32> -> vector<2x400xf32>
    %27 = vector.broadcast %24 : vector<1x400xf32> to vector<2x400xf32>
    %28 = arith.addf %26, %27 : vector<2x400xf32>
    %cst_12 = arith.constant 0.000000e+00 : f32
    %29 = vector.broadcast %cst_12 : f32 to vector<2x400xf32>
    %30 = arith.maximumf %28, %29 : vector<2x400xf32>
    %c1_i32_13 = arith.constant 1 : i32
    %31 = tpu.memref_slice %arg25[%c1_i32_13] : memref<6x!tpu.dma_semaphore, #tpu.memory_space<semaphore_mem>> -> memref<1x!tpu.dma_semaphore, #tpu.memory_space<semaphore_mem>>
    %32 = tpu.memref_squeeze %31 : memref<1x!tpu.dma_semaphore, #tpu.memory_space<semaphore_mem>> -> memref<!tpu.dma_semaphore, #tpu.memory_space<semaphore_mem>>
    tpu.wait_dma2 semaphore(%32 : memref<!tpu.dma_semaphore, #tpu.memory_space<semaphore_mem>>) src(%arg13 : memref<400x512xbf16, #tpu.memory_space<any>>) dst(%arg20 : memref<400x512xbf16, #tpu.memory_space<vmem>>)
    %c0_14 = arith.constant 0 : index
    %c0_15 = arith.constant 0 : index
    %33 = vector.load %arg2[%c0_14, %c0_15] : memref<2x4xf32, #tpu.memory_space<vmem>>, vector<2x4xf32>
    %34 = arith.truncf %30 : vector<2x400xf32> to vector<2x400xbf16>
    %c0_16 = arith.constant 0 : index
    %c0_17 = arith.constant 0 : index
    %35 = vector.load %arg20[%c0_16, %c0_17] : memref<400x512xbf16, #tpu.memory_space<vmem>>, vector<400x512xbf16>
    %cst_18 = arith.constant dense<0.000000e+00> : vector<2x512xf32>
    %36 = tpu.matmul %34, %35, %cst_18 {dimension_numbers = #tpu.dot_dimension_numbers<[1], [0], [0], [1], [0, 0, 1, 1], [], []>} : vector<2x400xbf16>, vector<400x512xbf16>, vector<2x512xf32> -> vector<2x512xf32>
    %37 = vector.extract_strided_slice %33 {offsets = [0, 0], sizes = [2, 1], strides = [1, 1]} : vector<2x4xf32> to vector<2x1xf32>
    %c0_19 = arith.constant 0 : index
    %c0_20 = arith.constant 0 : index
    %38 = vector.load %arg6[%c0_19, %c0_20] : memref<4x512xf32, #tpu.memory_space<vmem>>, vector<1x512xf32>
    %39 = vector.broadcast %37 : vector<2x1xf32> to vector<2x512xf32>
    %40 = vector.broadcast %38 : vector<1x512xf32> to vector<2x512xf32>
    %41 = arith.mulf %39, %40 : vector<2x512xf32>
    %42 = arith.addf %36, %41 : vector<2x512xf32>
    %43 = vector.extract_strided_slice %33 {offsets = [0, 1], sizes = [2, 1], strides = [1, 1]} : vector<2x4xf32> to vector<2x1xf32>
    %c1 = arith.constant 1 : index
    %c0_21 = arith.constant 0 : index
    %44 = vector.load %arg6[%c1, %c0_21] : memref<4x512xf32, #tpu.memory_space<vmem>>, vector<1x512xf32>
    %45 = vector.broadcast %43 : vector<2x1xf32> to vector<2x512xf32>
    %46 = vector.broadcast %44 : vector<1x512xf32> to vector<2x512xf32>
    %47 = arith.mulf %45, %46 : vector<2x512xf32>
    %48 = arith.addf %42, %47 : vector<2x512xf32>
    %49 = vector.extract_strided_slice %33 {offsets = [0, 2], sizes = [2, 1], strides = [1, 1]} : vector<2x4xf32> to vector<2x1xf32>
    %c2 = arith.constant 2 : index
    %c0_22 = arith.constant 0 : index
    %50 = vector.load %arg6[%c2, %c0_22] : memref<4x512xf32, #tpu.memory_space<vmem>>, vector<1x512xf32>
    %51 = vector.broadcast %49 : vector<2x1xf32> to vector<2x512xf32>
    %52 = vector.broadcast %50 : vector<1x512xf32> to vector<2x512xf32>
    %53 = arith.mulf %51, %52 : vector<2x512xf32>
    %54 = arith.addf %48, %53 : vector<2x512xf32>
    %55 = vector.extract_strided_slice %33 {offsets = [0, 3], sizes = [2, 1], strides = [1, 1]} : vector<2x4xf32> to vector<2x1xf32>
    %c3 = arith.constant 3 : index
    %c0_23 = arith.constant 0 : index
    %56 = vector.load %arg6[%c3, %c0_23] : memref<4x512xf32, #tpu.memory_space<vmem>>, vector<1x512xf32>
    %57 = vector.broadcast %55 : vector<2x1xf32> to vector<2x512xf32>
    %58 = vector.broadcast %56 : vector<1x512xf32> to vector<2x512xf32>
    %59 = arith.mulf %57, %58 : vector<2x512xf32>
    %60 = arith.addf %54, %59 : vector<2x512xf32>
    %c0_24 = arith.constant 0 : index
    %c0_25 = arith.constant 0 : index
    %61 = vector.load %arg7[%c0_24, %c0_25] : memref<1x512xf32, #tpu.memory_space<vmem>>, vector<1x512xf32>
    %62 = vector.broadcast %61 : vector<1x512xf32> to vector<2x512xf32>
    %63 = arith.addf %60, %62 : vector<2x512xf32>
    %cst_26 = arith.constant 0.000000e+00 : f32
    %64 = vector.broadcast %cst_26 : f32 to vector<2x512xf32>
    %65 = arith.maximumf %63, %64 : vector<2x512xf32>
    %c2_i32_27 = arith.constant 2 : i32
    %66 = tpu.memref_slice %arg25[%c2_i32_27] : memref<6x!tpu.dma_semaphore, #tpu.memory_space<semaphore_mem>> -> memref<1x!tpu.dma_semaphore, #tpu.memory_space<semaphore_mem>>
    %67 = tpu.memref_squeeze %66 : memref<1x!tpu.dma_semaphore, #tpu.memory_space<semaphore_mem>> -> memref<!tpu.dma_semaphore, #tpu.memory_space<semaphore_mem>>
    tpu.wait_dma2 semaphore(%67 : memref<!tpu.dma_semaphore, #tpu.memory_space<semaphore_mem>>) src(%arg14 : memref<512x256xbf16, #tpu.memory_space<any>>) dst(%arg21 : memref<512x256xbf16, #tpu.memory_space<vmem>>)
    %c0_28 = arith.constant 0 : index
    %c0_29 = arith.constant 0 : index
    %68 = vector.load %arg21[%c0_28, %c0_29] : memref<512x256xbf16, #tpu.memory_space<vmem>>, vector<512x256xbf16>
    %c0_30 = arith.constant 0 : index
    %c0_31 = arith.constant 0 : index
    %69 = vector.load %arg8[%c0_30, %c0_31] : memref<1x256xf32, #tpu.memory_space<vmem>>, vector<1x256xf32>
    %70 = arith.truncf %65 : vector<2x512xf32> to vector<2x512xbf16>
    %cst_32 = arith.constant dense<0.000000e+00> : vector<2x256xf32>
    %71 = tpu.matmul %70, %68, %cst_32 {dimension_numbers = #tpu.dot_dimension_numbers<[1], [0], [0], [1], [0, 0, 1, 1], [], []>} : vector<2x512xbf16>, vector<512x256xbf16>, vector<2x256xf32> -> vector<2x256xf32>
    %72 = vector.broadcast %69 : vector<1x256xf32> to vector<2x256xf32>
    %73 = arith.addf %71, %72 : vector<2x256xf32>
    %cst_33 = arith.constant 0.000000e+00 : f32
    %74 = vector.broadcast %cst_33 : f32 to vector<2x256xf32>
    %75 = arith.maximumf %73, %74 : vector<2x256xf32>
    %c3_i32_34 = arith.constant 3 : i32
    %76 = tpu.memref_slice %arg25[%c3_i32_34] : memref<6x!tpu.dma_semaphore, #tpu.memory_space<semaphore_mem>> -> memref<1x!tpu.dma_semaphore, #tpu.memory_space<semaphore_mem>>
    %77 = tpu.memref_squeeze %76 : memref<1x!tpu.dma_semaphore, #tpu.memory_space<semaphore_mem>> -> memref<!tpu.dma_semaphore, #tpu.memory_space<semaphore_mem>>
    tpu.wait_dma2 semaphore(%77 : memref<!tpu.dma_semaphore, #tpu.memory_space<semaphore_mem>>) src(%arg15 : memref<256x128xbf16, #tpu.memory_space<any>>) dst(%arg22 : memref<256x128xbf16, #tpu.memory_space<vmem>>)
    %c0_35 = arith.constant 0 : index
    %c0_36 = arith.constant 0 : index
    %78 = vector.load %arg22[%c0_35, %c0_36] : memref<256x128xbf16, #tpu.memory_space<vmem>>, vector<256x128xbf16>
    %c0_37 = arith.constant 0 : index
    %c0_38 = arith.constant 0 : index
    %79 = vector.load %arg9[%c0_37, %c0_38] : memref<1x128xf32, #tpu.memory_space<vmem>>, vector<1x128xf32>
    %80 = arith.truncf %75 : vector<2x256xf32> to vector<2x256xbf16>
    %cst_39 = arith.constant dense<0.000000e+00> : vector<2x128xf32>
    %81 = tpu.matmul %80, %78, %cst_39 {dimension_numbers = #tpu.dot_dimension_numbers<[1], [0], [0], [1], [0, 0, 1, 1], [], []>} : vector<2x256xbf16>, vector<256x128xbf16>, vector<2x128xf32> -> vector<2x128xf32>
    %82 = vector.broadcast %79 : vector<1x128xf32> to vector<2x128xf32>
    %83 = arith.addf %81, %82 : vector<2x128xf32>
    %cst_40 = arith.constant 0.000000e+00 : f32
    %84 = vector.broadcast %cst_40 : f32 to vector<2x128xf32>
    %85 = arith.maximumf %83, %84 : vector<2x128xf32>
    %c4_i32_41 = arith.constant 4 : i32
    %86 = tpu.memref_slice %arg25[%c4_i32_41] : memref<6x!tpu.dma_semaphore, #tpu.memory_space<semaphore_mem>> -> memref<1x!tpu.dma_semaphore, #tpu.memory_space<semaphore_mem>>
    %87 = tpu.memref_squeeze %86 : memref<1x!tpu.dma_semaphore, #tpu.memory_space<semaphore_mem>> -> memref<!tpu.dma_semaphore, #tpu.memory_space<semaphore_mem>>
    tpu.wait_dma2 semaphore(%87 : memref<!tpu.dma_semaphore, #tpu.memory_space<semaphore_mem>>) src(%arg16 : memref<128x512xbf16, #tpu.memory_space<any>>) dst(%arg23 : memref<128x512xbf16, #tpu.memory_space<vmem>>)
    %c0_42 = arith.constant 0 : index
    %c0_43 = arith.constant 0 : index
    %88 = vector.load %arg23[%c0_42, %c0_43] : memref<128x512xbf16, #tpu.memory_space<vmem>>, vector<128x512xbf16>
    %c0_44 = arith.constant 0 : index
    %c0_45 = arith.constant 0 : index
    %89 = vector.load %arg10[%c0_44, %c0_45] : memref<1x512xf32, #tpu.memory_space<vmem>>, vector<1x512xf32>
    %90 = arith.truncf %85 : vector<2x128xf32> to vector<2x128xbf16>
    %cst_46 = arith.constant dense<0.000000e+00> : vector<2x512xf32>
    %91 = tpu.matmul %90, %88, %cst_46 {dimension_numbers = #tpu.dot_dimension_numbers<[1], [0], [0], [1], [0, 0, 1, 1], [], []>} : vector<2x128xbf16>, vector<128x512xbf16>, vector<2x512xf32> -> vector<2x512xf32>
    %92 = vector.broadcast %89 : vector<1x512xf32> to vector<2x512xf32>
    %93 = arith.addf %91, %92 : vector<2x512xf32>
    %cst_47 = arith.constant 0.000000e+00 : f32
    %94 = vector.broadcast %cst_47 : f32 to vector<2x512xf32>
    %95 = arith.maximumf %93, %94 : vector<2x512xf32>
    %c5_i32_48 = arith.constant 5 : i32
    %96 = tpu.memref_slice %arg25[%c5_i32_48] : memref<6x!tpu.dma_semaphore, #tpu.memory_space<semaphore_mem>> -> memref<1x!tpu.dma_semaphore, #tpu.memory_space<semaphore_mem>>
    %97 = tpu.memref_squeeze %96 : memref<1x!tpu.dma_semaphore, #tpu.memory_space<semaphore_mem>> -> memref<!tpu.dma_semaphore, #tpu.memory_space<semaphore_mem>>
    tpu.wait_dma2 semaphore(%97 : memref<!tpu.dma_semaphore, #tpu.memory_space<semaphore_mem>>) src(%arg17 : memref<512x128xbf16, #tpu.memory_space<any>>) dst(%arg24 : memref<512x128xbf16, #tpu.memory_space<vmem>>)
    %c0_49 = arith.constant 0 : index
    %c0_50 = arith.constant 0 : index
    %98 = vector.load %arg24[%c0_49, %c0_50] : memref<512x128xbf16, #tpu.memory_space<vmem>>, vector<512x128xbf16>
    %c0_51 = arith.constant 0 : index
    %c0_52 = arith.constant 0 : index
    %99 = vector.load %arg11[%c0_51, %c0_52] : memref<1x128xf32, #tpu.memory_space<vmem>>, vector<1x128xf32>
    %100 = arith.truncf %95 : vector<2x512xf32> to vector<2x512xbf16>
    %cst_53 = arith.constant dense<0.000000e+00> : vector<2x128xf32>
    %101 = tpu.matmul %100, %98, %cst_53 {dimension_numbers = #tpu.dot_dimension_numbers<[1], [0], [0], [1], [0, 0, 1, 1], [], []>} : vector<2x512xbf16>, vector<512x128xbf16>, vector<2x128xf32> -> vector<2x128xf32>
    %102 = vector.broadcast %99 : vector<1x128xf32> to vector<2x128xf32>
    %103 = arith.addf %101, %102 : vector<2x128xf32>
    %c0_54 = arith.constant 0 : index
    %c0_55 = arith.constant 0 : index
    %104 = vector.load %arg18[%c0_54, %c0_55] : memref<2x128xf32, #tpu.memory_space<vmem>>, vector<2x128xf32>
    tpu.vector_store %arg18[%c0_54, %c0_55], %103 {strides = array<i32>} : memref<2x128xf32, #tpu.memory_space<vmem>>, vector<2x128xf32>,
    return
  }
  func.func @transform_0(%arg0: i32) -> (i32, i32) {
    %c0_i32 = arith.constant 0 : i32
    %c0_i32_0 = arith.constant 0 : i32
    %c0_i32_1 = arith.constant 0 : i32
    return %c0_i32, %c0_i32_0 : i32, i32
  }
  func.func @transform_1(%arg0: i32) -> (i32, i32) {
    %c0_i32 = arith.constant 0 : i32
    %c0_i32_0 = arith.constant 0 : i32
    %c0_i32_1 = arith.constant 0 : i32
    return %c0_i32, %c0_i32_0 : i32, i32
  }
  func.func @transform_2(%arg0: i32) -> (i32, i32) {
    %c0_i32 = arith.constant 0 : i32
    %c0_i32_0 = arith.constant 0 : i32
    %c0_i32_1 = arith.constant 0 : i32
    return %c0_i32, %c0_i32_0 : i32, i32
  }
  func.func @transform_3(%arg0: i32) -> (i32, i32) {
    %c0_i32 = arith.constant 0 : i32
    %c0_i32_0 = arith.constant 0 : i32
    %c0_i32_1 = arith.constant 0 : i32
    return %c0_i32, %c0_i32_0 : i32, i32
  }
  func.func @transform_4(%arg0: i32) -> (i32, i32) {
    %c0_i32 = arith.constant 0 : i32
    %c0_i32_0 = arith.constant 0 : i32
    %c0_i32_1 = arith.constant 0 : i32
    return %c0_i32, %c0_i32_0 : i32, i32
  }
  func.func @transform_5(%arg0: i32) -> (i32, i32) {
    %c0_i32 = arith.constant 0 : i32
    %c0_i32_0 = arith.constant 0 : i32
    %c0_i32_1 = arith.constant 0 : i32
    return %c0_i32, %c0_i32_0 : i32, i32
  }
  func.func @transform_6(%arg0: i32) -> (i32, i32) {
    %c0_i32 = arith.constant 0 : i32
    %c0_i32_0 = arith.constant 0 : i32
    %c0_i32_1 = arith.constant 0 : i32
    return %c0_i32, %c0_i32_0 : i32, i32
  }
  func.func @transform_7(%arg0: i32) -> (i32, i32) {
    %c0_i32 = arith.constant 0 : i32
    %c0_i32_0 = arith.constant 0 : i32
    %c0_i32_1 = arith.constant 0 : i32
    return %c0_i32, %c0_i32_0 : i32, i32
  }
  func.func @transform_8(%arg0: i32) -> (i32, i32) {
    %c0_i32 = arith.constant 0 : i32
    %c0_i32_0 = arith.constant 0 : i32
    %c0_i32_1 = arith.constant 0 : i32
    return %c0_i32, %c0_i32_0 : i32, i32
  }
  func.func @transform_9(%arg0: i32) -> (i32, i32) {
    %c0_i32 = arith.constant 0 : i32
    %c0_i32_0 = arith.constant 0 : i32
    %c0_i32_1 = arith.constant 0 : i32
    return %c0_i32, %c0_i32_0 : i32, i32
  }
  func.func @transform_10(%arg0: i32) -> (i32, i32) {
    %c0_i32 = arith.constant 0 : i32
    %c0_i32_0 = arith.constant 0 : i32
    %c0_i32_1 = arith.constant 0 : i32
    return %c0_i32, %c0_i32_0 : i32, i32
  }
  func.func @transform_17(%arg0: i32) -> (i32, i32) {
    %c0_i32 = arith.constant 0 : i32
    %c0_i32_0 = arith.constant 0 : i32
    %c0_i32_1 = arith.constant 0 : i32
    return %c0_i32, %c0_i32_0 : i32, i32
  }
}

</mosaic_0001>

<bundles_post_ra>
// kernel: nel_forward.1
= control target key start
LH: loop header
LB: loop body
LE: loop exit
PB: predicated region body
PF: predicated region fallthrough
CT: control target
= control target key end

     0   :  { %s6518_s0 = inlined_call_operand.vmem [shape: f32[2,363], index: 0, kind: input, shape index: {}]   ;;  %s6519_s1 = inlined_call_operand.vmem [shape: f32[2,4], index: 1, kind: input, shape index: {}]   ;;  %s6520_s2 = inlined_call_operand.vmem [shape: bf16[363,392], index: 2, kind: input, shape index: {}]   ;;  %s6521_s3 = inlined_call_operand.vmem [shape: f32[1,392], index: 3, kind: input, shape index: {}]   ;;  %s6522_s4 = inlined_call_operand.vmem [shape: f32[1,400], index: 4, kind: input, shape index: {}]   ;;  %s6523_s5 = inlined_call_operand.hbm [shape: f32[4,512], index: 5, kind: input, shape index: {}]   ;;  %s6524_s6 = inlined_call_operand.hbm [shape: f32[1,512], index: 6, kind: input, shape index: {}]   ;;  %s6525_s7 = inlined_call_operand.hbm [shape: f32[1,256], index: 7, kind: input, shape index: {}]   ;;  %s6526_s8 = inlined_call_operand.hbm [shape: f32[1,128], index: 8, kind: input, shape index: {}]   ;;  %s6527_s9 = inlined_call_operand.hbm [shape: f32[1,512], index: 9, kind: input, shape index: {}]   ;;  %s6528_s10 = inlined_call_operand.hbm [shape: f32[1,128], index: 10, kind: input, shape index: {}]   ;;  %s6529_s11 = inlined_call_operand.vmem [shape: bf16[392,400], index: 11, kind: input, shape index: {}]   ;;  %s6530_s12 = inlined_call_operand.vmem [shape: bf16[400,512], index: 12, kind: input, shape index: {}]   ;;  %s6531_s13 = inlined_call_operand.hbm [shape: bf16[512,256], index: 13, kind: input, shape index: {}]   ;;  %s6532_s14 = inlined_call_operand.hbm [shape: bf16[256,128], index: 14, kind: input, shape index: {}]   ;;  %s6533_s15 = inlined_call_operand.hbm [shape: bf16[128,512], index: 15, kind: input, shape index: {}]   ;;  %s6534_s16 = inlined_call_operand.hbm [shape: bf16[512,128], index: 16, kind: input, shape index: {}]   ;;  %s6535_s17 = inlined_call_operand.hbm [shape: f32[2,128], index: 17, kind: output, shape index: {}]  }
   0x1   :  { %6594 = sst [smem:[#allocation99_spill]] %s6518_s0 }
   0x2   :  { %6595 = sst [smem:[#allocation100_spill]] %s6519_s1 }
   0x3   :  { %22 = vsyncpa [#allocation10], 0 }
   0x4   :  { %23 = vsyncpa [#allocation13], 0 }
   0x5   :  { %24 = vsyncpa [#allocation16], 0 }
   0x6   :  { %25 = vsyncpa [#allocation19], 0 }
   0x7   :  { %26 = vsyncpa [#allocation11], 0  ;;  %s4612_s24 = smov [#allocation12]   ;;  %s4613_s26 = smov [#allocation15]  }
   0x8   :  { %s53_s25 = sshll.u32 %s4612_s24, 4  ;;  %s73_s27 = sshll.u32 %s4613_s26, 4  ;;  %s54_s25 = int_to_ptr.vmem [resolvable:$true] %s53_s25  ;;  %s74_s27 = int_to_ptr.vmem [resolvable:$true] %s73_s27 }
   0x9   :  { %s4392_s0 = scalar_lea.hbm %s6524_s6, 64 }
   0xa   :  { %p4393_p0 = scmp.ne.s32.totalorder %s6524_s6, %s4392_s0  ;;  %p4396_p1 = scmp.lt.u32.totalorder %s4392_s0, %s6524_s6 }
   0xc   :  { %p4398_p2 = pnand %p4396_p1, %p4393_p0 }
   0xe   :  { %4401 = shalt.err (!%p4398_p2)
}
   0xf   :  { %s4402_s20 = scalar_lea.vmem %s54_s25, 64  ;;  %p4407_p4 = scmp.lt.s32.totalorder %s54_s25, %s54_s25 }
  0x10   :  { %p4403_p3 = scmp.ne.s32.totalorder %s54_s25, %s4402_s20  ;;  %p4408_p5 = scmp.lt.s32.totalorder %s4402_s20, %s4402_s20 }
  0x12   :  { %p4409_p6 = por %p4408_p5, %p4407_p4 }
  0x14   :  { %p4410_p7 = pnand %p4409_p6, %p4403_p3 }
  0x16   :  { %4413 = shalt.err (!%p4410_p7)
}
  0x17   :  { %56 = dma.hbm_to_vmem [thread:$0]  %s6524_s6, 64, %s54_s25, [#allocation13]  }
  0x18   :  { %s4414_s26 = scalar_lea.hbm %s6526_s8, 16 }
  0x19   :  { %p4415_p8 = scmp.ne.s32.totalorder %s6526_s8, %s4414_s26  ;;  %p4418_p9 = scmp.lt.u32.totalorder %s4414_s26, %s6526_s8 }
  0x1b   :  { %p4420_p10 = pnand %p4418_p9, %p4415_p8 }
  0x1d   :  { %4423 = shalt.err (!%p4420_p10)
}
  0x1e   :  { %s4424_s18 = scalar_lea.vmem %s74_s27, 16  ;;  %s4428_s19 = scalar_lea.vmem %s74_s27, 32 }
  0x1f   :  { %p4425_p11 = scmp.ne.s32.totalorder %s74_s27, %s4424_s18  ;;  %p4429_p12 = scmp.lt.s32.totalorder %s74_s27, %s74_s27 }
  0x20   :  { %p4430_p13 = scmp.lt.s32.totalorder %s4428_s19, %s4424_s18 }
  0x22   :  { %p4431_p0 = por %p4430_p13, %p4429_p12 }
  0x24   :  { %p4432_p1 = pnand %p4431_p0, %p4425_p11 }
  0x26   :  { %4435 = shalt.err (!%p4432_p1)
}
  0x27   :  { %76 = dma.hbm_to_vmem [thread:$0]  %s6526_s8, 16, %s74_s27, [#allocation16]  }
  0x28   :  { %s4614_s1 = smov [#allocation9]   ;;  %s4615_s21 = smov [#allocation14]  }
  0x29   :  { %s43_s20 = sshll.u32 %s4614_s1, 4  ;;  %s63_s22 = sshll.u32 %s4615_s21, 4  ;;  %s44_s20 = int_to_ptr.vmem [resolvable:$true] %s43_s20  ;;  %s64_s22 = int_to_ptr.vmem [resolvable:$true] %s63_s22 }
  0x2a   :  { %s4436_s26 = scalar_lea.hbm %s6523_s5, 256 }
  0x2b   :  { %p4437_p2 = scmp.ne.s32.totalorder %s6523_s5, %s4436_s26  ;;  %p4440_p3 = scmp.lt.u32.totalorder %s4436_s26, %s6523_s5 }
  0x2d   :  { %p4442_p4 = pnand %p4440_p3, %p4437_p2 }
  0x2f   :  { %4445 = shalt.err (!%p4442_p4)
}
  0x30   :  { %s4446_s8 = scalar_lea.vmem %s44_s20, 256  ;;  %p4451_p6 = scmp.lt.s32.totalorder %s44_s20, %s44_s20 }
  0x31   :  { %p4447_p5 = scmp.ne.s32.totalorder %s44_s20, %s4446_s8  ;;  %p4452_p7 = scmp.lt.s32.totalorder %s4446_s8, %s4446_s8 }
  0x33   :  { %p4453_p8 = por %p4452_p7, %p4451_p6 }
  0x35   :  { %p4454_p9 = pnand %p4453_p8, %p4447_p5 }
  0x37   :  { %4457 = shalt.err (!%p4454_p9)
}
  0x38   :  { %46 = dma.hbm_to_vmem [thread:$0]  %s6523_s5, 256, %s44_s20, [#allocation10]  }
  0x39   :  { %s4458_s25 = scalar_lea.hbm %s6525_s7, 32 }
  0x3a   :  { %p4459_p10 = scmp.ne.s32.totalorder %s6525_s7, %s4458_s25  ;;  %p4462_p11 = scmp.lt.u32.totalorder %s4458_s25, %s6525_s7 }
  0x3c   :  { %p4464_p12 = pnand %p4462_p11, %p4459_p10 }
  0x3e   :  { %4467 = shalt.err (!%p4464_p12)
}
  0x3f   :  { %s4468_s26 = scalar_lea.vmem %s64_s22, 32  ;;  %p4473_p0 = scmp.lt.s32.totalorder %s64_s22, %s64_s22 }
  0x40   :  { %p4469_p13 = scmp.ne.s32.totalorder %s64_s22, %s4468_s26  ;;  %p4474_p1 = scmp.lt.s32.totalorder %s4468_s26, %s4468_s26 }
  0x42   :  { %p4475_p2 = por %p4474_p1, %p4473_p0 }
  0x44   :  { %p4476_p3 = pnand %p4475_p2, %p4469_p13 }
  0x46   :  { %4479 = shalt.err (!%p4476_p3)
}
  0x47   :  { %66 = dma.hbm_to_vmem [thread:$0]  %s6525_s7, 32, %s64_s22, [#allocation13]  }
  0x48   :  { %s4616_s28 = smov [#allocation17]   ;;  %s4617_s0 = smov [#allocation18]  }
  0x49   :  { %s83_s29 = sshll.u32 %s4616_s28, 4  ;;  %s93_s30 = sshll.u32 %s4617_s0, 4  ;;  %s84_s29 = int_to_ptr.vmem [resolvable:$true] %s83_s29  ;;  %s94_s30 = int_to_ptr.vmem [resolvable:$true] %s93_s30 }
  0x4a   :  { %s4480_s18 = scalar_lea.hbm %s6527_s9, 64 }
  0x4b   :  { %p4481_p4 = scmp.ne.s32.totalorder %s6527_s9, %s4480_s18  ;;  %p4484_p5 = scmp.lt.u32.totalorder %s4480_s18, %s6527_s9 }
  0x4d   :  { %p4486_p6 = pnand %p4484_p5, %p4481_p4 }
  0x4f   :  { %4489 = shalt.err (!%p4486_p6)
}
  0x50   :  { %s4490_s7 = scalar_lea.vmem %s84_s29, 64  ;;  %p4495_p8 = scmp.lt.s32.totalorder %s84_s29, %s84_s29 }
  0x51   :  { %p4491_p7 = scmp.ne.s32.totalorder %s84_s29, %s4490_s7  ;;  %p4496_p9 = scmp.lt.s32.totalorder %s4490_s7, %s4490_s7 }
  0x53   :  { %p4497_p10 = por %p4496_p9, %p4495_p8 }
  0x55   :  { %p4498_p11 = pnand %p4497_p10, %p4491_p7 }
  0x57   :  { %4501 = shalt.err (!%p4498_p11)
}
  0x58   :  { %86 = dma.hbm_to_vmem [thread:$0]  %s6527_s9, 64, %s84_s29, [#allocation16]  }
  0x59   :  { %s4502_s26 = scalar_lea.hbm %s6528_s10, 16 }
  0x5a   :  { %p4503_p12 = scmp.ne.s32.totalorder %s6528_s10, %s4502_s26  ;;  %p4506_p13 = scmp.lt.u32.totalorder %s4502_s26, %s6528_s10 }
  0x5c   :  { %p4508_p0 = pnand %p4506_p13, %p4503_p12 }
  0x5e   :  { %4511 = shalt.err (!%p4508_p0)
}
  0x5f   :  { %s4512_s8 = scalar_lea.vmem %s94_s30, 16  ;;  %s4516_s27 = scalar_lea.vmem %s94_s30, 32 }
  0x60   :  { %p4513_p1 = scmp.ne.s32.totalorder %s94_s30, %s4512_s8  ;;  %p4517_p2 = scmp.lt.s32.totalorder %s94_s30, %s94_s30 }
  0x61   :  { %p4518_p3 = scmp.lt.s32.totalorder %s4516_s27, %s4512_s8 }
  0x63   :  { %p4519_p4 = por %p4518_p3, %p4517_p2 }
  0x65   :  { %p4520_p5 = pnand %p4519_p4, %p4513_p1 }
  0x67   :  { %4523 = shalt.err (!%p4520_p5)
}
  0x68   :  { %96 = dma.hbm_to_vmem [thread:$0]  %s6528_s10, 16, %s94_s30, [#allocation19]  }
  0x69   :  { %4590 = dma.done.wait [#allocation10], 256  }
  0x6a   :  { %4591 = vsyncadd [#allocation10], 4294967040 }
  0x6b   :  { %4592 = dma.done.wait [#allocation13], 96  }
  0x6c   :  { %4593 = vsyncadd [#allocation13], 4294967200 }
  0x6d   :  { %4594 = dma.done.wait [#allocation16], 80  }
  0x6e   :  { %4595 = vsyncadd [#allocation16], 4294967216 }
  0x6f   :  { %4596 = dma.done.wait [#allocation19], 16  }
  0x70   :  { %4597 = vsyncadd [#allocation19], 4294967280  ;;  %v4804_v0 = vld [vmem:[%s6529_s11] sm:$0xff]  ;;  %v4809_v1 = vld [vmem:[%s6529_s11 + $0x8] sm:$0xff] }
  0x71   :  { %v4814_v2 = vld [vmem:[%s6529_s11 + $0x10] sm:$0xff]  ;;  %v4819_v3 = vld [vmem:[%s6529_s11 + $0x18] sm:$0xff]  ;;  %v4824_v4 = vld [vmem:[%s6529_s11 + $0x20] sm:$0xff] }
  0x72   :  { %v4829_v5 = vld [vmem:[%s6529_s11 + $0x28] sm:$0xff]  ;;  %v4834_v6 = vld [vmem:[%s6529_s11 + $0x30] sm:$0xff]  ;;  %v4839_v7 = vld [vmem:[%s6529_s11 + $0x38] sm:$0xff] }
  0x73   :  { %v4844_v8 = vld [vmem:[%s6529_s11 + $0x40] sm:$0xff]  ;;  %v4849_v9 = vld [vmem:[%s6529_s11 + $0x48] sm:$0xff]  ;;  %v4854_v10 = vld [vmem:[%s6529_s11 + $0x50] sm:$0xff] }
  0x74   :  { %v4859_v11 = vld [vmem:[%s6529_s11 + $0x58] sm:$0xff]  ;;  %v4864_v12 = vld [vmem:[%s6529_s11 + $0x60] sm:$0xff]  ;;  %v4869_v13 = vld [vmem:[%s6529_s11 + $0x68] sm:$0xff] }
  0x75   :  { %v4874_v14 = vld [vmem:[%s6529_s11 + $0x70] sm:$0xff]  ;;  %v4879_v15 = vld [vmem:[%s6529_s11 + $0x78] sm:$0xff]  ;;  %v4884_v16 = vld [vmem:[%s6529_s11 + $0x80] sm:$0xff] }
  0x76   :  { %v4889_v17 = vld [vmem:[%s6529_s11 + $0x88] sm:$0xff]  ;;  %v4894_v18 = vld [vmem:[%s6529_s11 + $0x90] sm:$0xff]  ;;  %v4899_v19 = vld [vmem:[%s6529_s11 + $0x98] sm:$0xff] }
  0x77   :  { %v4904_v20 = vld [vmem:[%s6529_s11 + $0xa0] sm:$0xff]  ;;  %v4909_v21 = vld [vmem:[%s6529_s11 + $0xa8] sm:$0xff]  ;;  %v4914_v22 = vld [vmem:[%s6529_s11 + $0xb0] sm:$0xff] }
  0x78   :  { %v4919_v23 = vld [vmem:[%s6529_s11 + $0xb8] sm:$0xff]  ;;  %v4924_v24 = vld [vmem:[%s6529_s11 + $0xc0] sm:$0xff]  ;;  %v4929_v25 = vld [vmem:[%s6529_s11 + $0xc8] sm:$0xff] }
  0x79   :  { %v4934_v26 = vld [vmem:[%s6529_s11 + $0xd0] sm:$0xff]  ;;  %v4939_v27 = vld [vmem:[%s6529_s11 + $0xd8] sm:$0xff]  ;;  %v4944_v28 = vld [vmem:[%s6529_s11 + $0xe0] sm:$0xff] }
  0x7a   :  { %v4949_v29 = vld [vmem:[%s6529_s11 + $0xe8] sm:$0xff]  ;;  %v4954_v30 = vld [vmem:[%s6529_s11 + $0xf0] sm:$0xff]  ;;  %v4959_v31 = vld [vmem:[%s6529_s11 + $0xf8] sm:$0xff] }
  0x7b   :  { %v4964_v32 = vld [vmem:[%s6529_s11 + $0x100] sm:$0xff]  ;;  %v4969_v33 = vld [vmem:[%s6529_s11 + $0x108] sm:$0xff]  ;;  %v4974_v34 = vld [vmem:[%s6529_s11 + $0x110] sm:$0xff] }
  0x7c   :  { %v4979_v35 = vld [vmem:[%s6529_s11 + $0x118] sm:$0xff]  ;;  %v4984_v36 = vld [vmem:[%s6529_s11 + $0x120] sm:$0xff]  ;;  %v4989_v37 = vld [vmem:[%s6529_s11 + $0x128] sm:$0xff] }
  0x7d   :  { %v4994_v38 = vld [vmem:[%s6529_s11 + $0x130] sm:$0xff]  ;;  %v4999_v39 = vld [vmem:[%s6529_s11 + $0x138] sm:$0xff]  ;;  %v5004_v40 = vld [vmem:[%s6529_s11 + $0x140] sm:$0xff] }
  0x7e   :  { %v5009_v41 = vld [vmem:[%s6529_s11 + $0x148] sm:$0xff]  ;;  %v5014_v42 = vld [vmem:[%s6529_s11 + $0x150] sm:$0xff]  ;;  %v5019_v43 = vld [vmem:[%s6529_s11 + $0x158] sm:$0xff] }
  0x7f   :  { %v5024_v44 = vld [vmem:[%s6529_s11 + $0x160] sm:$0xff]  ;;  %v5029_v45 = vld [vmem:[%s6529_s11 + $0x168] sm:$0xff]  ;;  %v5034_v46 = vld [vmem:[%s6529_s11 + $0x170] sm:$0xff] }
  0x80   :  { %6596 = vst [vmem:[#allocation44_spill] sm:$0xff] %v5024_v44  ;;  %6597 = vst [vmem:[#allocation45_spill] sm:$0xff] %v5029_v45  ;;  %v5039_v47 = vld [vmem:[%s6529_s11 + $0x178] sm:$0xff]  ;;  %v5044_v48 = vld [vmem:[%s6529_s11 + $0x180] sm:$0xff] }
  0x81   :  { %6598 = vst [vmem:[#allocation46_spill] sm:$0xff] %v5034_v46  ;;  %6599 = vst [vmem:[#allocation47_spill] sm:$0xff] %v5039_v47  ;;  %v5049_v49 = vld [vmem:[%s6529_s11 + $0x188] sm:$0xff]  ;;  %v5054_v50 = vld [vmem:[%s6529_s11 + $0x190] sm:$0xff] }
  0x82   :  { %6600 = vst [vmem:[#allocation48_spill] sm:$0xff] %v5044_v48  ;;  %6601 = vst [vmem:[#allocation49_spill] sm:$0xff] %v5049_v49  ;;  %v5059_v51 = vld [vmem:[%s6529_s11 + $0x198] sm:$0xff]  ;;  %v5064_v52 = vld [vmem:[%s6529_s11 + $0x1a0] sm:$0xff] }
  0x83   :  { %6602 = vst [vmem:[#allocation50_spill] sm:$0xff] %v5054_v50  ;;  %6603 = vst [vmem:[#allocation51_spill] sm:$0xff] %v5059_v51  ;;  %v5069_v53 = vld [vmem:[%s6529_s11 + $0x1a8] sm:$0xff]  ;;  %v5074_v54 = vld [vmem:[%s6529_s11 + $0x1b0] sm:$0xff] }
  0x84   :  { %6604 = vst [vmem:[#allocation52_spill] sm:$0xff] %v5064_v52  ;;  %6605 = vst [vmem:[#allocation53_spill] sm:$0xff] %v5069_v53  ;;  %v5079_v55 = vld [vmem:[%s6529_s11 + $0x1b8] sm:$0xff]  ;;  %v5084_v56 = vld [vmem:[%s6529_s11 + $0x1c0] sm:$0xff] }
  0x85   :  { %6606 = vst [vmem:[#allocation54_spill] sm:$0xff] %v5074_v54  ;;  %6607 = vst [vmem:[#allocation55_spill] sm:$0xff] %v5079_v55  ;;  %v5089_v57 = vld [vmem:[%s6529_s11 + $0x1c8] sm:$0xff]  ;;  %v5094_v58 = vld [vmem:[%s6529_s11 + $0x1d0] sm:$0xff] }
  0x86   :  { %6608 = vst [vmem:[#allocation56_spill] sm:$0xff] %v5084_v56  ;;  %6609 = vst [vmem:[#allocation57_spill] sm:$0xff] %v5089_v57  ;;  %v5099_v59 = vld [vmem:[%s6529_s11 + $0x1d8] sm:$0xff]  ;;  %v5104_v60 = vld [vmem:[%s6529_s11 + $0x1e0] sm:$0xff] }
  0x87   :  { %6610 = vst [vmem:[#allocation58_spill] sm:$0xff] %v5094_v58  ;;  %6611 = vst [vmem:[#allocation59_spill] sm:$0xff] %v5099_v59  ;;  %v5109_v61 = vld [vmem:[%s6529_s11 + $0x1e8] sm:$0xff]  ;;  %v5114_v62 = vld [vmem:[%s6529_s11 + $0x1f0] sm:$0xff] }
  0x88   :  { %6612 = vst [vmem:[#allocation60_spill] sm:$0xff] %v5104_v60  ;;  %6613 = vst [vmem:[#allocation61_spill] sm:$0xff] %v5109_v61  ;;  %v5119_v63 = vld [vmem:[%s6529_s11 + $0x1f8] sm:$0xff]  ;;  %v5124_v57 = vld [vmem:[%s6529_s11 + $0x200] sm:$0xff] }
  0x89   :  { %6614 = vst [vmem:[#allocation62_spill] sm:$0xff] %v5114_v62  ;;  %6615 = vst [vmem:[#allocation63_spill] sm:$0xff] %v5119_v63  ;;  %v5129_v60 = vld [vmem:[%s6529_s11 + $0x208] sm:$0xff]  ;;  %v5134_v61 = vld [vmem:[%s6529_s11 + $0x210] sm:$0xff] }
  0x8a   :  { %6616 = vst [vmem:[#allocation64_spill] sm:$0xff] %v5124_v57  ;;  %6617 = vst [vmem:[#allocation65_spill] sm:$0xff] %v5129_v60  ;;  %v5139_v62 = vld [vmem:[%s6529_s11 + $0x218] sm:$0xff]  ;;  %v5144_v63 = vld [vmem:[%s6529_s11 + $0x220] sm:$0xff] }
  0x8b   :  { %6618 = vst [vmem:[#allocation66_spill] sm:$0xff] %v5134_v61  ;;  %6619 = vst [vmem:[#allocation67_spill] sm:$0xff] %v5139_v62  ;;  %v5149_v57 = vld [vmem:[%s6529_s11 + $0x228] sm:$0xff]  ;;  %v5154_v60 = vld [vmem:[%s6529_s11 + $0x230] sm:$0xff] }
  0x8c   :  { %6620 = vst [vmem:[#allocation68_spill] sm:$0xff] %v5144_v63  ;;  %6621 = vst [vmem:[#allocation69_spill] sm:$0xff] %v5149_v57  ;;  %v5159_v61 = vld [vmem:[%s6529_s11 + $0x238] sm:$0xff]  ;;  %v5164_v62 = vld [vmem:[%s6529_s11 + $0x240] sm:$0xff] }
  0x8d   :  { %6622 = vst [vmem:[#allocation70_spill] sm:$0xff] %v5154_v60  ;;  %6623 = vst [vmem:[#allocation71_spill] sm:$0xff] %v5159_v61  ;;  %v5169_v63 = vld [vmem:[%s6529_s11 + $0x248] sm:$0xff]  ;;  %v5174_v57 = vld [vmem:[%s6529_s11 + $0x250] sm:$0xff] }
  0x8e   :  { %6624 = vst [vmem:[#allocation72_spill] sm:$0xff] %v5164_v62  ;;  %6625 = vst [vmem:[#allocation73_spill] sm:$0xff] %v5169_v63  ;;  %v5179_v60 = vld [vmem:[%s6529_s11 + $0x258] sm:$0xff]  ;;  %v5184_v61 = vld [vmem:[%s6529_s11 + $0x260] sm:$0xff] }
  0x8f   :  { %6626 = vst [vmem:[#allocation74_spill] sm:$0xff] %v5174_v57  ;;  %6627 = vst [vmem:[#allocation75_spill] sm:$0xff] %v5179_v60  ;;  %v5189_v62 = vld [vmem:[%s6529_s11 + $0x268] sm:$0xff]  ;;  %v5194_v63 = vld [vmem:[%s6529_s11 + $0x270] sm:$0xff] }
  0x90   :  { %6628 = vst [vmem:[#allocation76_spill] sm:$0xff] %v5184_v61  ;;  %6629 = vst [vmem:[#allocation77_spill] sm:$0xff] %v5189_v62  ;;  %v5199_v57 = vld [vmem:[%s6529_s11 + $0x278] sm:$0xff]  ;;  %v5204_v60 = vld [vmem:[%s6529_s11 + $0x280] sm:$0xff] }
  0x91   :  { %6630 = vst [vmem:[#allocation78_spill] sm:$0xff] %v5194_v63  ;;  %6631 = vst [vmem:[#allocation79_spill] sm:$0xff] %v5199_v57  ;;  %v5209_v61 = vld [vmem:[%s6529_s11 + $0x288] sm:$0xff]  ;;  %v5214_v62 = vld [vmem:[%s6529_s11 + $0x290] sm:$0xff] }
  0x92   :  { %6632 = vst [vmem:[#allocation80_spill] sm:$0xff] %v5204_v60  ;;  %6633 = vst [vmem:[#allocation81_spill] sm:$0xff] %v5209_v61  ;;  %v5219_v63 = vld [vmem:[%s6529_s11 + $0x298] sm:$0xff]  ;;  %v5224_v57 = vld [vmem:[%s6529_s11 + $0x2a0] sm:$0xff] }
  0x93   :  { %6634 = vst [vmem:[#allocation82_spill] sm:$0xff] %v5214_v62  ;;  %6635 = vst [vmem:[#allocation83_spill] sm:$0xff] %v5219_v63  ;;  %v5229_v60 = vld [vmem:[%s6529_s11 + $0x2a8] sm:$0xff]  ;;  %v5234_v61 = vld [vmem:[%s6529_s11 + $0x2b0] sm:$0xff] }
  0x94   :  { %6636 = vst [vmem:[#allocation84_spill] sm:$0xff] %v5224_v57  ;;  %6637 = vst [vmem:[#allocation85_spill] sm:$0xff] %v5229_v60  ;;  %v5239_v62 = vld [vmem:[%s6529_s11 + $0x2b8] sm:$0xff]  ;;  %v5244_v63 = vld [vmem:[%s6529_s11 + $0x2c0] sm:$0xff] }
  0x95   :  { %6638 = vst [vmem:[#allocation86_spill] sm:$0xff] %v5234_v61  ;;  %6639 = vst [vmem:[#allocation87_spill] sm:$0xff] %v5239_v62  ;;  %v5249_v57 = vld [vmem:[%s6529_s11 + $0x2c8] sm:$0xff]  ;;  %v5254_v60 = vld [vmem:[%s6529_s11 + $0x2d0] sm:$0xff] }
  0x96   :  { %6640 = vst [vmem:[#allocation88_spill] sm:$0xff] %v5244_v63  ;;  %6641 = vst [vmem:[#allocation89_spill] sm:$0xff] %v5249_v57  ;;  %v5259_v61 = vld [vmem:[%s6529_s11 + $0x2d8] sm:$0xff]  ;;  %v5264_v62 = vld [vmem:[%s6529_s11 + $0x2e0] sm:$0xff] }
  0x97   :  { %6642 = vst [vmem:[#allocation90_spill] sm:$0xff] %v5254_v60  ;;  %6643 = vst [vmem:[#allocation91_spill] sm:$0xff] %v5259_v61  ;;  %v5269_v63 = vld [vmem:[%s6529_s11 + $0x2e8] sm:$0xff]  ;;  %v5274_v57 = vld [vmem:[%s6529_s11 + $0x2f0] sm:$0xff] }
  0x98   :  { %6644 = vst [vmem:[#allocation92_spill] sm:$0xff] %v5264_v62  ;;  %6645 = vst [vmem:[#allocation93_spill] sm:$0xff] %v5269_v63  ;;  %v5279_v60 = vld [vmem:[%s6529_s11 + $0x2f8] sm:$0xff]  ;;  %v5284_v61 = vld [vmem:[%s6529_s11 + $0x300] sm:$0xff] }
  0x99   :  { %6646 = vst [vmem:[#allocation94_spill] sm:$0xff] %v5274_v57  ;;  %6647 = vst [vmem:[#allocation95_spill] sm:$0xff] %v5279_v60  ;;  %v5289_v62 = vld [vmem:[%s6529_s11 + $0x308] sm:$0xff] }
  0x9a   :  { %6648 = vst [vmem:[#allocation96_spill] sm:$0xff] %v5284_v61  ;;  %6649 = vst [vmem:[#allocation97_spill] sm:$0xff] %v5289_v62 }
  0x9b   :  { %351 = vsyncadd [#allocation8], 12544  ;;  %v370_v63 = vld [vmem:[%s6530_s12] sm:$0xf]  ;;  %v372_v57 = vld [vmem:[%s6530_s12 + $0x10] sm:$0xf] }
  0x9c   :  { %371 = vst [vmem:[#allocation3] sm:$0xf] %v370_v63  ;;  %373 = vst [vmem:[#allocation3 + $0x4] sm:$0xf] %v372_v57  ;;  %v374_v61 = vld [vmem:[%s6530_s12 + $0x4] sm:$0xf] }
  0x9d   :  { %v376_v60 = vld [vmem:[%s6530_s12 + $0x14] sm:$0xf]  ;;  %v378_v62 = vld [vmem:[%s6530_s12 + $0x8] sm:$0xf]  ;;  %375 = vst [vmem:[#allocation3 + $0x8] sm:$0xf] %v374_v61 }
  0x9e   :  { %377 = vst [vmem:[#allocation3 + $0xc] sm:$0xf] %v376_v60  ;;  %379 = vst [vmem:[#allocation3 + $0x10] sm:$0xf] %v378_v62  ;;  %v380_v63 = vld [vmem:[%s6530_s12 + $0x18] sm:$0xf] }
  0x9f   :  { %v382_v57 = vld [vmem:[%s6530_s12 + $0xc] sm:$0xf]  ;;  %v384_v59 = vld [vmem:[%s6530_s12 + $0x1c] sm:$0xff]   ;;  %381 = vst [vmem:[#allocation3 + $0x14] sm:$0xf] %v380_v63 }
  0xa0   :  { %383 = vst [vmem:[#allocation3 + $0x18] sm:$0xf] %v382_v57  ;;  %385 = vst [vmem:[#allocation3 + $0x1c] sm:$0xff] %v384_v59   ;;  %v388_v60 = vld [vmem:[%s6530_s12 + $0x30] sm:$0xf] }
  0xa1   :  { %v390_v61 = vld [vmem:[%s6530_s12 + $0x24] sm:$0xf]  ;;  %v392_v62 = vld [vmem:[%s6530_s12 + $0x34] sm:$0xf]  ;;  %389 = vst [vmem:[#allocation3 + $0x24] sm:$0xf] %v388_v60 }
  0xa2   :  { %391 = vst [vmem:[#allocation3 + $0x28] sm:$0xf] %v390_v61  ;;  %393 = vst [vmem:[#allocation3 + $0x2c] sm:$0xf] %v392_v62  ;;  %v394_v63 = vld [vmem:[%s6530_s12 + $0x28] sm:$0xf] }
  0xa3   :  { %v396_v59 = vld [vmem:[%s6530_s12 + $0x38] sm:$0xf]  ;;  %v398_v57 = vld [vmem:[%s6530_s12 + $0x2c] sm:$0xf]  ;;  %395 = vst [vmem:[#allocation3 + $0x30] sm:$0xf] %v394_v63 }
  0xa4   :  { %397 = vst [vmem:[#allocation3 + $0x34] sm:$0xf] %v396_v59  ;;  %399 = vst [vmem:[#allocation3 + $0x38] sm:$0xf] %v398_v57  ;;  %v400_v60 = vld [vmem:[%s6530_s12 + $0x3c] sm:$0xff]  }
  0xa5   :  { %v404_v61 = vld [vmem:[%s6530_s12 + $0x50] sm:$0xf]  ;;  %v406_v62 = vld [vmem:[%s6530_s12 + $0x44] sm:$0xf]  ;;  %401 = vst [vmem:[#allocation3 + $0x3c] sm:$0xff] %v400_v60  }
  0xa6   :  { %405 = vst [vmem:[#allocation3 + $0x44] sm:$0xf] %v404_v61  ;;  %407 = vst [vmem:[#allocation3 + $0x48] sm:$0xf] %v406_v62  ;;  %v408_v63 = vld [vmem:[%s6530_s12 + $0x54] sm:$0xf] }
  0xa7   :  { %v410_v59 = vld [vmem:[%s6530_s12 + $0x48] sm:$0xf]  ;;  %v412_v57 = vld [vmem:[%s6530_s12 + $0x58] sm:$0xf]  ;;  %409 = vst [vmem:[#allocation3 + $0x4c] sm:$0xf] %v408_v63 }
  0xa8   :  { %411 = vst [vmem:[#allocation3 + $0x50] sm:$0xf] %v410_v59  ;;  %413 = vst [vmem:[#allocation3 + $0x54] sm:$0xf] %v412_v57  ;;  %v414_v60 = vld [vmem:[%s6530_s12 + $0x4c] sm:$0xf] }
  0xa9   :  { %v416_v61 = vld [vmem:[%s6530_s12 + $0x5c] sm:$0xff]   ;;  %v420_v62 = vld [vmem:[%s6530_s12 + $0x70] sm:$0xf]  ;;  %415 = vst [vmem:[#allocation3 + $0x58] sm:$0xf] %v414_v60 }
  0xaa   :  { %417 = vst [vmem:[#allocation3 + $0x5c] sm:$0xff] %v416_v61   ;;  %421 = vst [vmem:[#allocation3 + $0x64] sm:$0xf] %v420_v62  ;;  %v422_v63 = vld [vmem:[%s6530_s12 + $0x64] sm:$0xf]  ;;  %v432_v62 = vld [vmem:[%s6530_s12 + $0x7c] sm:$0xff]  }
  0xab   :  { %v424_v59 = vld [vmem:[%s6530_s12 + $0x74] sm:$0xf]  ;;  %v426_v57 = vld [vmem:[%s6530_s12 + $0x68] sm:$0xf]  ;;  %423 = vst [vmem:[#allocation3 + $0x68] sm:$0xf] %v422_v63 }
  0xac   :  { %425 = vst [vmem:[#allocation3 + $0x6c] sm:$0xf] %v424_v59  ;;  %427 = vst [vmem:[#allocation3 + $0x70] sm:$0xf] %v426_v57  ;;  %v428_v60 = vld [vmem:[%s6530_s12 + $0x78] sm:$0xf] }
  0xad   :  { %v430_v61 = vld [vmem:[%s6530_s12 + $0x6c] sm:$0xf]  ;;  %429 = vst [vmem:[#allocation3 + $0x74] sm:$0xf] %v428_v60  ;;  %433 = vst [vmem:[#allocation3 + $0x7c] sm:$0xff] %v432_v62  }
  0xae   :  { %431 = vst [vmem:[#allocation3 + $0x78] sm:$0xf] %v430_v61  ;;  %v436_v63 = vld [vmem:[%s6530_s12 + $0x90] sm:$0xf]  ;;  %v438_v59 = vld [vmem:[%s6530_s12 + $0x84] sm:$0xf] }
  0xaf   :  { %v440_v57 = vld [vmem:[%s6530_s12 + $0x94] sm:$0xf]  ;;  %437 = vst [vmem:[#allocation3 + $0x84] sm:$0xf] %v436_v63  ;;  %439 = vst [vmem:[#allocation3 + $0x88] sm:$0xf] %v438_v59 }
  0xb0   :  { %441 = vst [vmem:[#allocation3 + $0x8c] sm:$0xf] %v440_v57  ;;  %v442_v60 = vld [vmem:[%s6530_s12 + $0x88] sm:$0xf]  ;;  %v444_v61 = vld [vmem:[%s6530_s12 + $0x98] sm:$0xf] }
  0xb1   :  { %v446_v62 = vld [vmem:[%s6530_s12 + $0x8c] sm:$0xf]  ;;  %443 = vst [vmem:[#allocation3 + $0x90] sm:$0xf] %v442_v60  ;;  %445 = vst [vmem:[#allocation3 + $0x94] sm:$0xf] %v444_v61 }
  0xb2   :  { %447 = vst [vmem:[#allocation3 + $0x98] sm:$0xf] %v446_v62  ;;  %v448_v63 = vld [vmem:[%s6530_s12 + $0x9c] sm:$0xff]   ;;  %v452_v59 = vld [vmem:[%s6530_s12 + $0xb0] sm:$0xf] }
  0xb3   :  { %v454_v57 = vld [vmem:[%s6530_s12 + $0xa4] sm:$0xf]  ;;  %449 = vst [vmem:[#allocation3 + $0x9c] sm:$0xff] %v448_v63   ;;  %453 = vst [vmem:[#allocation3 + $0xa4] sm:$0xf] %v452_v59  ;;  %v464_v59 = vld [vmem:[%s6530_s12 + $0xbc] sm:$0xff]  }
  0xb4   :  { %455 = vst [vmem:[#allocation3 + $0xa8] sm:$0xf] %v454_v57  ;;  %v456_v60 = vld [vmem:[%s6530_s12 + $0xb4] sm:$0xf]  ;;  %v458_v61 = vld [vmem:[%s6530_s12 + $0xa8] sm:$0xf] }
  0xb5   :  { %v460_v62 = vld [vmem:[%s6530_s12 + $0xb8] sm:$0xf]  ;;  %457 = vst [vmem:[#allocation3 + $0xac] sm:$0xf] %v456_v60  ;;  %459 = vst [vmem:[#allocation3 + $0xb0] sm:$0xf] %v458_v61 }
  0xb6   :  { %461 = vst [vmem:[#allocation3 + $0xb4] sm:$0xf] %v460_v62  ;;  %v462_v63 = vld [vmem:[%s6530_s12 + $0xac] sm:$0xf]  ;;  %v468_v57 = vld [vmem:[%s6530_s12 + $0xd0] sm:$0xf] }
  0xb7   :  { %463 = vst [vmem:[#allocation3 + $0xb8] sm:$0xf] %v462_v63  ;;  %465 = vst [vmem:[#allocation3 + $0xbc] sm:$0xff] %v464_v59   ;;  %v470_v60 = vld [vmem:[%s6530_s12 + $0xc4] sm:$0xf] }
  0xb8   :  { %469 = vst [vmem:[#allocation3 + $0xc4] sm:$0xf] %v468_v57  ;;  %v472_v61 = vld [vmem:[%s6530_s12 + $0xd4] sm:$0xf]  ;;  %v474_v62 = vld [vmem:[%s6530_s12 + $0xc8] sm:$0xf] }
  0xb9   :  { %471 = vst [vmem:[#allocation3 + $0xc8] sm:$0xf] %v470_v60  ;;  %473 = vst [vmem:[#allocation3 + $0xcc] sm:$0xf] %v472_v61  ;;  %v476_v63 = vld [vmem:[%s6530_s12 + $0xd8] sm:$0xf] }
  0xba   :  { %475 = vst [vmem:[#allocation3 + $0xd0] sm:$0xf] %v474_v62  ;;  %v478_v59 = vld [vmem:[%s6530_s12 + $0xcc] sm:$0xf]  ;;  %v480_v57 = vld [vmem:[%s6530_s12 + $0xdc] sm:$0xff]  }
  0xbb   :  { %477 = vst [vmem:[#allocation3 + $0xd4] sm:$0xf] %v476_v63  ;;  %479 = vst [vmem:[#allocation3 + $0xd8] sm:$0xf] %v478_v59  ;;  %v484_v60 = vld [vmem:[%s6530_s12 + $0xf0] sm:$0xf] }
  0xbc   :  { %481 = vst [vmem:[#allocation3 + $0xdc] sm:$0xff] %v480_v57   ;;  %v486_v61 = vld [vmem:[%s6530_s12 + $0xe4] sm:$0xf]  ;;  %v488_v62 = vld [vmem:[%s6530_s12 + $0xf4] sm:$0xf] }
  0xbd   :  { %485 = vst [vmem:[#allocation3 + $0xe4] sm:$0xf] %v484_v60  ;;  %487 = vst [vmem:[#allocation3 + $0xe8] sm:$0xf] %v486_v61  ;;  %v490_v63 = vld [vmem:[%s6530_s12 + $0xe8] sm:$0xf] }
  0xbe   :  { %489 = vst [vmem:[#allocation3 + $0xec] sm:$0xf] %v488_v62  ;;  %v492_v59 = vld [vmem:[%s6530_s12 + $0xf8] sm:$0xf]  ;;  %v494_v57 = vld [vmem:[%s6530_s12 + $0xec] sm:$0xf] }
  0xbf   :  { %491 = vst [vmem:[#allocation3 + $0xf0] sm:$0xf] %v490_v63  ;;  %493 = vst [vmem:[#allocation3 + $0xf4] sm:$0xf] %v492_v59  ;;  %v496_v60 = vld [vmem:[%s6530_s12 + $0xfc] sm:$0xff]  }
  0xc0   :  { %495 = vst [vmem:[#allocation3 + $0xf8] sm:$0xf] %v494_v57  ;;  %v500_v61 = vld [vmem:[%s6530_s12 + $0x110] sm:$0xf]  ;;  %v502_v62 = vld [vmem:[%s6530_s12 + $0x104] sm:$0xf] }
  0xc1   :  { %497 = vst [vmem:[#allocation3 + $0xfc] sm:$0xff] %v496_v60   ;;  %501 = vst [vmem:[#allocation3 + $0x104] sm:$0xf] %v500_v61  ;;  %v504_v63 = vld [vmem:[%s6530_s12 + $0x114] sm:$0xf]  ;;  %v512_v61 = vld [vmem:[%s6530_s12 + $0x11c] sm:$0xff]  }
  0xc2   :  { %503 = vst [vmem:[#allocation3 + $0x108] sm:$0xf] %v502_v62  ;;  %v506_v59 = vld [vmem:[%s6530_s12 + $0x108] sm:$0xf]  ;;  %v508_v57 = vld [vmem:[%s6530_s12 + $0x118] sm:$0xf] }
  0xc3   :  { %505 = vst [vmem:[#allocation3 + $0x10c] sm:$0xf] %v504_v63  ;;  %507 = vst [vmem:[#allocation3 + $0x110] sm:$0xf] %v506_v59  ;;  %v510_v60 = vld [vmem:[%s6530_s12 + $0x10c] sm:$0xf] }
  0xc4   :  { %509 = vst [vmem:[#allocation3 + $0x114] sm:$0xf] %v508_v57  ;;  %v516_v62 = vld [vmem:[%s6530_s12 + $0x130] sm:$0xf]  ;;  %511 = vst [vmem:[#allocation3 + $0x118] sm:$0xf] %v510_v60 }
  0xc5   :  { %513 = vst [vmem:[#allocation3 + $0x11c] sm:$0xff] %v512_v61   ;;  %517 = vst [vmem:[#allocation3 + $0x124] sm:$0xf] %v516_v62  ;;  %v518_v63 = vld [vmem:[%s6530_s12 + $0x124] sm:$0xf]  ;;  %v528_v62 = vld [vmem:[%s6530_s12 + $0x13c] sm:$0xff]  }
  0xc6   :  { %v520_v59 = vld [vmem:[%s6530_s12 + $0x134] sm:$0xf]  ;;  %v522_v57 = vld [vmem:[%s6530_s12 + $0x128] sm:$0xf]  ;;  %519 = vst [vmem:[#allocation3 + $0x128] sm:$0xf] %v518_v63 }
  0xc7   :  { %521 = vst [vmem:[#allocation3 + $0x12c] sm:$0xf] %v520_v59  ;;  %523 = vst [vmem:[#allocation3 + $0x130] sm:$0xf] %v522_v57  ;;  %v524_v60 = vld [vmem:[%s6530_s12 + $0x138] sm:$0xf] }
  0xc8   :  { %v526_v61 = vld [vmem:[%s6530_s12 + $0x12c] sm:$0xf]  ;;  %525 = vst [vmem:[#allocation3 + $0x134] sm:$0xf] %v524_v60  ;;  %529 = vst [vmem:[#allocation3 + $0x13c] sm:$0xff] %v528_v62  }
  0xc9   :  { %527 = vst [vmem:[#allocation3 + $0x138] sm:$0xf] %v526_v61  ;;  %v532_v63 = vld [vmem:[%s6530_s12 + $0x150] sm:$0xf]  ;;  %v534_v59 = vld [vmem:[%s6530_s12 + $0x144] sm:$0xf] }
  0xca   :  { %v536_v57 = vld [vmem:[%s6530_s12 + $0x154] sm:$0xf]  ;;  %533 = vst [vmem:[#allocation3 + $0x144] sm:$0xf] %v532_v63  ;;  %535 = vst [vmem:[#allocation3 + $0x148] sm:$0xf] %v534_v59 }
  0xcb   :  { %537 = vst [vmem:[#allocation3 + $0x14c] sm:$0xf] %v536_v57  ;;  %v538_v60 = vld [vmem:[%s6530_s12 + $0x148] sm:$0xf]  ;;  %v540_v61 = vld [vmem:[%s6530_s12 + $0x158] sm:$0xf] }
  0xcc   :  { %v542_v62 = vld [vmem:[%s6530_s12 + $0x14c] sm:$0xf]  ;;  %539 = vst [vmem:[#allocation3 + $0x150] sm:$0xf] %v538_v60  ;;  %541 = vst [vmem:[#allocation3 + $0x154] sm:$0xf] %v540_v61 }
  0xcd   :  { %543 = vst [vmem:[#allocation3 + $0x158] sm:$0xf] %v542_v62  ;;  %v544_v63 = vld [vmem:[%s6530_s12 + $0x15c] sm:$0xff]   ;;  %v548_v59 = vld [vmem:[%s6530_s12 + $0x170] sm:$0xf] }
  0xce   :  { %v550_v57 = vld [vmem:[%s6530_s12 + $0x164] sm:$0xf]  ;;  %545 = vst [vmem:[#allocation3 + $0x15c] sm:$0xff] %v544_v63   ;;  %549 = vst [vmem:[#allocation3 + $0x164] sm:$0xf] %v548_v59  ;;  %v560_v59 = vld [vmem:[%s6530_s12 + $0x17c] sm:$0xff]  }
  0xcf   :  { %551 = vst [vmem:[#allocation3 + $0x168] sm:$0xf] %v550_v57  ;;  %v552_v60 = vld [vmem:[%s6530_s12 + $0x174] sm:$0xf]  ;;  %v554_v61 = vld [vmem:[%s6530_s12 + $0x168] sm:$0xf] }
  0xd0   :  { %v556_v62 = vld [vmem:[%s6530_s12 + $0x178] sm:$0xf]  ;;  %553 = vst [vmem:[#allocation3 + $0x16c] sm:$0xf] %v552_v60  ;;  %555 = vst [vmem:[#allocation3 + $0x170] sm:$0xf] %v554_v61 }
  0xd1   :  { %557 = vst [vmem:[#allocation3 + $0x174] sm:$0xf] %v556_v62  ;;  %v558_v63 = vld [vmem:[%s6530_s12 + $0x16c] sm:$0xf]  ;;  %v564_v57 = vld [vmem:[%s6530_s12 + $0x190] sm:$0xf] }
  0xd2   :  { %559 = vst [vmem:[#allocation3 + $0x178] sm:$0xf] %v558_v63  ;;  %561 = vst [vmem:[#allocation3 + $0x17c] sm:$0xff] %v560_v59   ;;  %v566_v60 = vld [vmem:[%s6530_s12 + $0x184] sm:$0xf] }
  0xd3   :  { %565 = vst [vmem:[#allocation3 + $0x184] sm:$0xf] %v564_v57  ;;  %v568_v61 = vld [vmem:[%s6530_s12 + $0x194] sm:$0xf]  ;;  %v570_v62 = vld [vmem:[%s6530_s12 + $0x188] sm:$0xf] }
  0xd4   :  { %567 = vst [vmem:[#allocation3 + $0x188] sm:$0xf] %v566_v60  ;;  %569 = vst [vmem:[#allocation3 + $0x18c] sm:$0xf] %v568_v61  ;;  %v572_v63 = vld [vmem:[%s6530_s12 + $0x198] sm:$0xf] }
  0xd5   :  { %571 = vst [vmem:[#allocation3 + $0x190] sm:$0xf] %v570_v62  ;;  %v574_v59 = vld [vmem:[%s6530_s12 + $0x18c] sm:$0xf]  ;;  %v576_v57 = vld [vmem:[%s6530_s12 + $0x19c] sm:$0xff]  }
  0xd6   :  { %573 = vst [vmem:[#allocation3 + $0x194] sm:$0xf] %v572_v63  ;;  %575 = vst [vmem:[#allocation3 + $0x198] sm:$0xf] %v574_v59  ;;  %v580_v60 = vld [vmem:[%s6530_s12 + $0x1b0] sm:$0xf] }
  0xd7   :  { %577 = vst [vmem:[#allocation3 + $0x19c] sm:$0xff] %v576_v57   ;;  %v582_v61 = vld [vmem:[%s6530_s12 + $0x1a4] sm:$0xf]  ;;  %v584_v62 = vld [vmem:[%s6530_s12 + $0x1b4] sm:$0xf] }
  0xd8   :  { %581 = vst [vmem:[#allocation3 + $0x1a4] sm:$0xf] %v580_v60  ;;  %583 = vst [vmem:[#allocation3 + $0x1a8] sm:$0xf] %v582_v61  ;;  %v586_v63 = vld [vmem:[%s6530_s12 + $0x1a8] sm:$0xf] }
  0xd9   :  { %585 = vst [vmem:[#allocation3 + $0x1ac] sm:$0xf] %v584_v62  ;;  %v588_v59 = vld [vmem:[%s6530_s12 + $0x1b8] sm:$0xf]  ;;  %v590_v57 = vld [vmem:[%s6530_s12 + $0x1ac] sm:$0xf] }
  0xda   :  { %587 = vst [vmem:[#allocation3 + $0x1b0] sm:$0xf] %v586_v63  ;;  %589 = vst [vmem:[#allocation3 + $0x1b4] sm:$0xf] %v588_v59  ;;  %v592_v60 = vld [vmem:[%s6530_s12 + $0x1bc] sm:$0xff]  }
  0xdb   :  { %591 = vst [vmem:[#allocation3 + $0x1b8] sm:$0xf] %v590_v57  ;;  %v596_v61 = vld [vmem:[%s6530_s12 + $0x1d0] sm:$0xf]  ;;  %v598_v62 = vld [vmem:[%s6530_s12 + $0x1c4] sm:$0xf] }
  0xdc   :  { %593 = vst [vmem:[#allocation3 + $0x1bc] sm:$0xff] %v592_v60   ;;  %597 = vst [vmem:[#allocation3 + $0x1c4] sm:$0xf] %v596_v61  ;;  %v600_v63 = vld [vmem:[%s6530_s12 + $0x1d4] sm:$0xf]  ;;  %v608_v61 = vld [vmem:[%s6530_s12 + $0x1dc] sm:$0xff]  }
  0xdd   :  { %599 = vst [vmem:[#allocation3 + $0x1c8] sm:$0xf] %v598_v62  ;;  %v602_v59 = vld [vmem:[%s6530_s12 + $0x1c8] sm:$0xf]  ;;  %v604_v57 = vld [vmem:[%s6530_s12 + $0x1d8] sm:$0xf] }
  0xde   :  { %601 = vst [vmem:[#allocation3 + $0x1cc] sm:$0xf] %v600_v63  ;;  %603 = vst [vmem:[#allocation3 + $0x1d0] sm:$0xf] %v602_v59  ;;  %v606_v60 = vld [vmem:[%s6530_s12 + $0x1cc] sm:$0xf] }
  0xdf   :  { %605 = vst [vmem:[#allocation3 + $0x1d4] sm:$0xf] %v604_v57  ;;  %v612_v62 = vld [vmem:[%s6530_s12 + $0x1f0] sm:$0xf]  ;;  %607 = vst [vmem:[#allocation3 + $0x1d8] sm:$0xf] %v606_v60 }
  0xe0   :  { %609 = vst [vmem:[#allocation3 + $0x1dc] sm:$0xff] %v608_v61   ;;  %613 = vst [vmem:[#allocation3 + $0x1e4] sm:$0xf] %v612_v62  ;;  %v614_v63 = vld [vmem:[%s6530_s12 + $0x1e4] sm:$0xf]  ;;  %v624_v62 = vld [vmem:[%s6530_s12 + $0x1fc] sm:$0xff]  }
  0xe1   :  { %v616_v59 = vld [vmem:[%s6530_s12 + $0x1f4] sm:$0xf]  ;;  %v618_v57 = vld [vmem:[%s6530_s12 + $0x1e8] sm:$0xf]  ;;  %615 = vst [vmem:[#allocation3 + $0x1e8] sm:$0xf] %v614_v63 }
  0xe2   :  { %617 = vst [vmem:[#allocation3 + $0x1ec] sm:$0xf] %v616_v59  ;;  %619 = vst [vmem:[#allocation3 + $0x1f0] sm:$0xf] %v618_v57  ;;  %v620_v60 = vld [vmem:[%s6530_s12 + $0x1f8] sm:$0xf] }
  0xe3   :  { %v622_v61 = vld [vmem:[%s6530_s12 + $0x1ec] sm:$0xf]  ;;  %621 = vst [vmem:[#allocation3 + $0x1f4] sm:$0xf] %v620_v60  ;;  %625 = vst [vmem:[#allocation3 + $0x1fc] sm:$0xff] %v624_v62  }
  0xe4   :  { %623 = vst [vmem:[#allocation3 + $0x1f8] sm:$0xf] %v622_v61  ;;  %v628_v63 = vld [vmem:[%s6530_s12 + $0x210] sm:$0xf]  ;;  %v630_v59 = vld [vmem:[%s6530_s12 + $0x204] sm:$0xf] }
  0xe5   :  { %v632_v57 = vld [vmem:[%s6530_s12 + $0x214] sm:$0xf]  ;;  %629 = vst [vmem:[#allocation3 + $0x204] sm:$0xf] %v628_v63  ;;  %631 = vst [vmem:[#allocation3 + $0x208] sm:$0xf] %v630_v59 }
  0xe6   :  { %633 = vst [vmem:[#allocation3 + $0x20c] sm:$0xf] %v632_v57  ;;  %v634_v60 = vld [vmem:[%s6530_s12 + $0x208] sm:$0xf]  ;;  %v636_v61 = vld [vmem:[%s6530_s12 + $0x218] sm:$0xf] }
  0xe7   :  { %v638_v62 = vld [vmem:[%s6530_s12 + $0x20c] sm:$0xf]  ;;  %635 = vst [vmem:[#allocation3 + $0x210] sm:$0xf] %v634_v60  ;;  %637 = vst [vmem:[#allocation3 + $0x214] sm:$0xf] %v636_v61 }
  0xe8   :  { %639 = vst [vmem:[#allocation3 + $0x218] sm:$0xf] %v638_v62  ;;  %v640_v63 = vld [vmem:[%s6530_s12 + $0x21c] sm:$0xff]   ;;  %v644_v59 = vld [vmem:[%s6530_s12 + $0x230] sm:$0xf] }
  0xe9   :  { %v646_v57 = vld [vmem:[%s6530_s12 + $0x224] sm:$0xf]  ;;  %641 = vst [vmem:[#allocation3 + $0x21c] sm:$0xff] %v640_v63   ;;  %645 = vst [vmem:[#allocation3 + $0x224] sm:$0xf] %v644_v59  ;;  %v656_v59 = vld [vmem:[%s6530_s12 + $0x23c] sm:$0xff]  }
  0xea   :  { %647 = vst [vmem:[#allocation3 + $0x228] sm:$0xf] %v646_v57  ;;  %v648_v60 = vld [vmem:[%s6530_s12 + $0x234] sm:$0xf]  ;;  %v650_v61 = vld [vmem:[%s6530_s12 + $0x228] sm:$0xf] }
  0xeb   :  { %v652_v62 = vld [vmem:[%s6530_s12 + $0x238] sm:$0xf]  ;;  %649 = vst [vmem:[#allocation3 + $0x22c] sm:$0xf] %v648_v60  ;;  %651 = vst [vmem:[#allocation3 + $0x230] sm:$0xf] %v650_v61 }
  0xec   :  { %653 = vst [vmem:[#allocation3 + $0x234] sm:$0xf] %v652_v62  ;;  %v654_v63 = vld [vmem:[%s6530_s12 + $0x22c] sm:$0xf]  ;;  %v660_v57 = vld [vmem:[%s6530_s12 + $0x250] sm:$0xf] }
  0xed   :  { %655 = vst [vmem:[#allocation3 + $0x238] sm:$0xf] %v654_v63  ;;  %657 = vst [vmem:[#allocation3 + $0x23c] sm:$0xff] %v656_v59   ;;  %v662_v60 = vld [vmem:[%s6530_s12 + $0x244] sm:$0xf] }
  0xee   :  { %661 = vst [vmem:[#allocation3 + $0x244] sm:$0xf] %v660_v57  ;;  %v664_v61 = vld [vmem:[%s6530_s12 + $0x254] sm:$0xf]  ;;  %v666_v62 = vld [vmem:[%s6530_s12 + $0x248] sm:$0xf] }
  0xef   :  { %663 = vst [vmem:[#allocation3 + $0x248] sm:$0xf] %v662_v60  ;;  %665 = vst [vmem:[#allocation3 + $0x24c] sm:$0xf] %v664_v61  ;;  %v668_v63 = vld [vmem:[%s6530_s12 + $0x258] sm:$0xf] }
  0xf0   :  { %667 = vst [vmem:[#allocation3 + $0x250] sm:$0xf] %v666_v62  ;;  %v670_v59 = vld [vmem:[%s6530_s12 + $0x24c] sm:$0xf]  ;;  %v672_v57 = vld [vmem:[%s6530_s12 + $0x25c] sm:$0xff]  }
  0xf1   :  { %669 = vst [vmem:[#allocation3 + $0x254] sm:$0xf] %v668_v63  ;;  %671 = vst [vmem:[#allocation3 + $0x258] sm:$0xf] %v670_v59  ;;  %v676_v60 = vld [vmem:[%s6530_s12 + $0x270] sm:$0xf] }
  0xf2   :  { %673 = vst [vmem:[#allocation3 + $0x25c] sm:$0xff] %v672_v57   ;;  %v678_v61 = vld [vmem:[%s6530_s12 + $0x264] sm:$0xf]  ;;  %v680_v62 = vld [vmem:[%s6530_s12 + $0x274] sm:$0xf] }
  0xf3   :  { %677 = vst [vmem:[#allocation3 + $0x264] sm:$0xf] %v676_v60  ;;  %679 = vst [vmem:[#allocation3 + $0x268] sm:$0xf] %v678_v61  ;;  %v682_v63 = vld [vmem:[%s6530_s12 + $0x268] sm:$0xf] }
  0xf4   :  { %681 = vst [vmem:[#allocation3 + $0x26c] sm:$0xf] %v680_v62  ;;  %v684_v59 = vld [vmem:[%s6530_s12 + $0x278] sm:$0xf]  ;;  %v686_v57 = vld [vmem:[%s6530_s12 + $0x26c] sm:$0xf] }
  0xf5   :  { %683 = vst [vmem:[#allocation3 + $0x270] sm:$0xf] %v682_v63  ;;  %685 = vst [vmem:[#allocation3 + $0x274] sm:$0xf] %v684_v59  ;;  %v688_v60 = vld [vmem:[%s6530_s12 + $0x27c] sm:$0xff]  }
  0xf6   :  { %687 = vst [vmem:[#allocation3 + $0x278] sm:$0xf] %v686_v57  ;;  %v692_v61 = vld [vmem:[%s6530_s12 + $0x290] sm:$0xf]  ;;  %v694_v62 = vld [vmem:[%s6530_s12 + $0x284] sm:$0xf] }
  0xf7   :  { %689 = vst [vmem:[#allocation3 + $0x27c] sm:$0xff] %v688_v60   ;;  %693 = vst [vmem:[#allocation3 + $0x284] sm:$0xf] %v692_v61  ;;  %v696_v63 = vld [vmem:[%s6530_s12 + $0x294] sm:$0xf]  ;;  %v704_v61 = vld [vmem:[%s6530_s12 + $0x29c] sm:$0xff]  }
  0xf8   :  { %695 = vst [vmem:[#allocation3 + $0x288] sm:$0xf] %v694_v62  ;;  %v698_v59 = vld [vmem:[%s6530_s12 + $0x288] sm:$0xf]  ;;  %v700_v57 = vld [vmem:[%s6530_s12 + $0x298] sm:$0xf] }
  0xf9   :  { %697 = vst [vmem:[#allocation3 + $0x28c] sm:$0xf] %v696_v63  ;;  %699 = vst [vmem:[#allocation3 + $0x290] sm:$0xf] %v698_v59  ;;  %v702_v60 = vld [vmem:[%s6530_s12 + $0x28c] sm:$0xf] }
  0xfa   :  { %701 = vst [vmem:[#allocation3 + $0x294] sm:$0xf] %v700_v57  ;;  %v708_v62 = vld [vmem:[%s6530_s12 + $0x2b0] sm:$0xf]  ;;  %703 = vst [vmem:[#allocation3 + $0x298] sm:$0xf] %v702_v60 }
  0xfb   :  { %705 = vst [vmem:[#allocation3 + $0x29c] sm:$0xff] %v704_v61   ;;  %709 = vst [vmem:[#allocation3 + $0x2a4] sm:$0xf] %v708_v62  ;;  %v710_v63 = vld [vmem:[%s6530_s12 + $0x2a4] sm:$0xf]  ;;  %v720_v62 = vld [vmem:[%s6530_s12 + $0x2bc] sm:$0xff]  }
  0xfc   :  { %v712_v59 = vld [vmem:[%s6530_s12 + $0x2b4] sm:$0xf]  ;;  %v714_v57 = vld [vmem:[%s6530_s12 + $0x2a8] sm:$0xf]  ;;  %711 = vst [vmem:[#allocation3 + $0x2a8] sm:$0xf] %v710_v63 }
  0xfd   :  { %713 = vst [vmem:[#allocation3 + $0x2ac] sm:$0xf] %v712_v59  ;;  %715 = vst [vmem:[#allocation3 + $0x2b0] sm:$0xf] %v714_v57  ;;  %v716_v60 = vld [vmem:[%s6530_s12 + $0x2b8] sm:$0xf] }
  0xfe   :  { %v718_v61 = vld [vmem:[%s6530_s12 + $0x2ac] sm:$0xf]  ;;  %717 = vst [vmem:[#allocation3 + $0x2b4] sm:$0xf] %v716_v60  ;;  %721 = vst [vmem:[#allocation3 + $0x2bc] sm:$0xff] %v720_v62  }
  0xff   :  { %719 = vst [vmem:[#allocation3 + $0x2b8] sm:$0xf] %v718_v61  ;;  %v724_v63 = vld [vmem:[%s6530_s12 + $0x2d0] sm:$0xf]  ;;  %v726_v59 = vld [vmem:[%s6530_s12 + $0x2c4] sm:$0xf] }
 0x100   :  { %v728_v57 = vld [vmem:[%s6530_s12 + $0x2d4] sm:$0xf]  ;;  %725 = vst [vmem:[#allocation3 + $0x2c4] sm:$0xf] %v724_v63  ;;  %727 = vst [vmem:[#allocation3 + $0x2c8] sm:$0xf] %v726_v59 }
 0x101   :  { %729 = vst [vmem:[#allocation3 + $0x2cc] sm:$0xf] %v728_v57  ;;  %v730_v60 = vld [vmem:[%s6530_s12 + $0x2c8] sm:$0xf]  ;;  %v732_v61 = vld [vmem:[%s6530_s12 + $0x2d8] sm:$0xf] }
 0x102   :  { %v734_v62 = vld [vmem:[%s6530_s12 + $0x2cc] sm:$0xf]  ;;  %731 = vst [vmem:[#allocation3 + $0x2d0] sm:$0xf] %v730_v60  ;;  %733 = vst [vmem:[#allocation3 + $0x2d4] sm:$0xf] %v732_v61 }
 0x103   :  { %735 = vst [vmem:[#allocation3 + $0x2d8] sm:$0xf] %v734_v62  ;;  %v736_v63 = vld [vmem:[%s6530_s12 + $0x2dc] sm:$0xff]   ;;  %v740_v59 = vld [vmem:[%s6530_s12 + $0x2f0] sm:$0xf] }
 0x104   :  { %v742_v57 = vld [vmem:[%s6530_s12 + $0x2e4] sm:$0xf]  ;;  %737 = vst [vmem:[#allocation3 + $0x2dc] sm:$0xff] %v736_v63   ;;  %741 = vst [vmem:[#allocation3 + $0x2e4] sm:$0xf] %v740_v59  ;;  %v752_v59 = vld [vmem:[%s6530_s12 + $0x2fc] sm:$0xff]  }
 0x105   :  { %743 = vst [vmem:[#allocation3 + $0x2e8] sm:$0xf] %v742_v57  ;;  %v744_v60 = vld [vmem:[%s6530_s12 + $0x2f4] sm:$0xf]  ;;  %v746_v61 = vld [vmem:[%s6530_s12 + $0x2e8] sm:$0xf] }
 0x106   :  { %v748_v62 = vld [vmem:[%s6530_s12 + $0x2f8] sm:$0xf]  ;;  %745 = vst [vmem:[#allocation3 + $0x2ec] sm:$0xf] %v744_v60  ;;  %747 = vst [vmem:[#allocation3 + $0x2f0] sm:$0xf] %v746_v61 }
 0x107   :  { %749 = vst [vmem:[#allocation3 + $0x2f4] sm:$0xf] %v748_v62  ;;  %v750_v63 = vld [vmem:[%s6530_s12 + $0x2ec] sm:$0xf]  ;;  %v756_v57 = vld [vmem:[%s6530_s12 + $0x310] sm:$0xf] }
 0x108   :  { %751 = vst [vmem:[#allocation3 + $0x2f8] sm:$0xf] %v750_v63  ;;  %753 = vst [vmem:[#allocation3 + $0x2fc] sm:$0xff] %v752_v59   ;;  %v758_v60 = vld [vmem:[%s6530_s12 + $0x304] sm:$0xf] }
 0x109   :  { %757 = vst [vmem:[#allocation3 + $0x304] sm:$0xf] %v756_v57  ;;  %v760_v61 = vld [vmem:[%s6530_s12 + $0x314] sm:$0xf]  ;;  %v762_v62 = vld [vmem:[%s6530_s12 + $0x308] sm:$0xf] }
 0x10a   :  { %759 = vst [vmem:[#allocation3 + $0x308] sm:$0xf] %v758_v60  ;;  %761 = vst [vmem:[#allocation3 + $0x30c] sm:$0xf] %v760_v61  ;;  %v764_v63 = vld [vmem:[%s6530_s12 + $0x318] sm:$0xf] }
 0x10b   :  { %763 = vst [vmem:[#allocation3 + $0x310] sm:$0xf] %v762_v62  ;;  %v766_v59 = vld [vmem:[%s6530_s12 + $0x30c] sm:$0xf]  ;;  %v768_v57 = vld [vmem:[%s6530_s12 + $0x31c] sm:$0xf] }
 0x10c   :  { %765 = vst [vmem:[#allocation3 + $0x314] sm:$0xf] %v764_v63  ;;  %767 = vst [vmem:[#allocation3 + $0x318] sm:$0xf] %v766_v59 }
 0x10d   :  { %769 = vst [vmem:[#allocation3 + $0x31c] sm:$0xf] %v768_v57 }
 0x10e   :  { %1200 = vsyncadd [#allocation8 + $0x1], 12800  ;;  %s1206_s7 = sld [smem:[#allocation0]]   ;;  %s4618_s22 = smov [#allocation4]   ;;  %v6576_v60 = vmov 0  }
 0x10f   :  { %s1214_s21 = sshll.u32 %s4618_s22, 4  ;;  %s4619_s23 = smov 256   ;;  %1983 = vmatprep.mubr.bf16.mxu1 %v6576_v60  ;;  %s1215_s21 = int_to_ptr.vmem [resolvable:$true] %s1214_s21 }
 0x110   :  { %1218 = sst [smem:[#allocation24]] %s4619_s23  ;;  %s4621_s24 = smov 2  }
 0x111   :  { %1220 = sst [smem:[#allocation24 + $0x1]] %s4619_s23  ;;  %s4622_s26 = smov 64  }
 0x112   :  { %1222 = sst [smem:[#allocation24 + $0x2]] %s4621_s24  ;;  %s4623_s5 = smov 128  }
 0x113   :  { %1224 = sst [smem:[#allocation24 + $0x3]] %s4622_s26  ;;  %s4624_s11 = smov 4  }
 0x114   :  { %s3915_s12 = sshll.u32 %s1206_s7, 26  ;;  %1226 = sst [smem:[#allocation24 + $0x4]] %s4623_s5 }
 0x115   :  { %s5822_s20 = sadd.s32 134217728, %s3915_s12  ;;  %1228 = sst [smem:[#allocation24 + $0x5]] %s4621_s24 }
 0x116   :  { %1230 = sst [smem:[#allocation24 + $0x6]] %s4623_s5  ;;  %s4625_s28 = smov [#allocation8 + $0x2]  }
 0x117   :  { %1232 = sst [smem:[#allocation24 + $0x7]] %s4622_s26  ;;  %s4626_s0 = smov [#allocation23]  }
 0x118   :  { %1234 = sst [smem:[#allocation24 + $0x8]] %s4624_s11  ;;  %s4627_s9 = smov 512  }
 0x119   :  { %1236 = dma.general %s6531_s13, 8192, %s1215_s21, %s4625_s28, %s4626_s0, [#allocation24], %s5822_s20, 0  }
 0x11a   :  { %1269 = sst [smem:[#allocation30 + $0x2]] %s4624_s11  ;;  %s4628_s29 = smov [#allocation5]  }
 0x11b   :  { %1265 = sst [smem:[#allocation30]] %s4627_s9  ;;  %s1245_s18 = sshll.u32 %s4628_s29, 4  ;;  %s1246_s18 = int_to_ptr.vmem [resolvable:$true] %s1245_s18 }
 0x11c   :  { %1267 = sst [smem:[#allocation30 + $0x1]] %s4627_s9  ;;  %s4629_s19 = smov [#allocation6]  }
 0x11d   :  { %1271 = sst [smem:[#allocation30 + $0x3]] %s4622_s26  ;;  %s1261_s6 = sshll.u32 %s4629_s19, 4  ;;  %s1262_s6 = int_to_ptr.vmem [resolvable:$true] %s1261_s6 }
 0x11e   :  { %1273 = sst [smem:[#allocation30 + $0x4]] %s4623_s5  ;;  %s4524_s13 = scalar_lea.hbm %s6532_s14, 2048 }
 0x11f   :  { %1275 = sst [smem:[#allocation30 + $0x5]] %s4621_s24  ;;  %p4525_p6 = scmp.ne.s32.totalorder %s6532_s14, %s4524_s13 }
 0x120   :  { %1277 = sst [smem:[#allocation30 + $0x6]] %s4619_s23  ;;  %p4528_p7 = scmp.lt.u32.totalorder %s4524_s13, %s6532_s14 }
 0x121   :  { %1279 = sst [smem:[#allocation30 + $0x7]] %s4622_s26 }
 0x122   :  { %1281 = sst [smem:[#allocation30 + $0x8]] %s4624_s11  ;;  %p4530_p8 = pnand %p4528_p7, %p4525_p6 }
 0x124   :  { %4533 = shalt.err (!%p4530_p8)  }
 0x125   :  { %s4534_s21 = scalar_lea.vmem %s1246_s18, 2048  ;;  %p4539_p10 = scmp.lt.s32.totalorder %s1246_s18, %s1246_s18 }
 0x126   :  { %p4535_p9 = scmp.ne.s32.totalorder %s1246_s18, %s4534_s21  ;;  %p4540_p11 = scmp.lt.s32.totalorder %s4534_s21, %s4534_s21 }
 0x128   :  { %p4541_p12 = por %p4540_p11, %p4539_p10 }
 0x12a   :  { %p4542_p13 = pnand %p4541_p12, %p4535_p9 }
 0x12c   :  { %4545 = shalt.err (!%p4542_p13)  }
 0x12d   :  { %1248 = dma.hbm_to_vmem [thread:$0]  %s6532_s14, 2048, %s1246_s18, [#allocation8 + $0x3]  ;;  %v4632_v53 = vmov 1983009808   ;;  %v1395_v52 = vlaneseq  ;;  %vm1894_vm0 = vcmask 1044480   ;;  %vm1895_vm1 = vcmask 1045504  }
 0x12e   :  { %s4630_s26 = smov [#allocation8 + $0x4]   ;;  %s4631_s12 = smov [#allocation29]   ;;  %v1393_v55 = vunpack.c.l.s4 %v4632_v53  ;;  %vm1890_vm2 = vcmask 875520  }
 0x12f   :  { %1283 = dma.general %s6533_s15, 4096, %s1262_s6, %s4630_s26, %s4631_s12, [#allocation30], %s5822_s20, 0  }
 0x130   :  { %v4248_v61 = vld [vmem:[%s6520_s2 + $0x4] ss:$16 sps:$4 sm:$0xff]   ;;  %v4252_v63 = vld [vmem:[%s6520_s2] ss:$16 sps:$4 sm:$0xff]   ;;  %v1394_v49 = vunpack.c.0.s8 %v1393_v55  ;;  %s6650_s28 = sld [smem:[#allocation99_spill]]  ;;  %s4634_s29 = smov [#allocation7]  }
 0x131   :  { %v4250_v62 = vld [vmem:[%s6520_s2 + $0x204] ss:$16 sps:$4 sm:$0xff]   ;;  %1910 = vmatprep.subr.bf16.mxu0 %v4248_v61  ;;  %v4253_v59 = vld [vmem:[%s6520_s2 + $0x200] ss:$16 sps:$4 sm:$0xff]   ;;  %s1292_s14 = sshll.u32 %s4634_s29, 4  ;;  %s4546_s15 = scalar_lea.hbm %s6534_s16, 4096  ;;  %s1293_s14 = int_to_ptr.vmem [resolvable:$true] %s1292_s14 }
 0x132   :  { %1951 = vmatprep.subr.bf16.mxu1 %v4250_v62  ;;  %v4254_v57 = vld [vmem:[%s6520_s2 + $0x24] ss:$16 sps:$4 sm:$0xff]   ;;  %1911 = vmatpush1.bf16.msra.mxu0 %v4252_v63  ;;  %v4258_v61 = vld [vmem:[%s6520_s2 + $0x20] ss:$16 sps:$4 sm:$0xff]   ;;  %p4547_p0 = scmp.ne.s32.totalorder %s6534_s16, %s4546_s15  ;;  %p4550_p1 = scmp.lt.u32.totalorder %s4546_s15, %s6534_s16 }
 0x133   :  { %1952 = vmatpush1.bf16.msra.mxu1 %v4253_v59  ;;  %v4256_v60 = vld [vmem:[%s6520_s2 + $0x224] ss:$16 sps:$4 sm:$0xff]   ;;  %1912 = vmatprep.subr.bf16.mxu0 %v4254_v57  ;;  %v4259_v56 = vld [vmem:[%s6520_s2 + $0x220] ss:$16 sps:$4 sm:$0xff]  }
 0x134   :  { %1953 = vmatprep.subr.bf16.mxu1 %v4256_v60  ;;  %v4260_v62 = vld [vmem:[%s6520_s2 + $0x44] ss:$16 sps:$4 sm:$0xff]   ;;  %v4264_v59 = vld [vmem:[%s6520_s2 + $0x40] ss:$16 sps:$4 sm:$0xff]   ;;  %p4552_p2 = pnand %p4550_p1, %p4547_p0 }
 0x135   :  { %v4262_v63 = vld [vmem:[%s6520_s2 + $0x244] ss:$16 sps:$4 sm:$0xff]   ;;  %v4265_v57 = vld [vmem:[%s6520_s2 + $0x240] ss:$16 sps:$4 sm:$0xff]  }
 0x136   :  { %1913 = vmatpush1.bf16.msra.mxu0 %v4258_v61  ;;  %v4266_v60 = vld [vmem:[%s6520_s2 + $0x64] ss:$16 sps:$4 sm:$0xff]   ;;  %v4270_v54 = vld [vmem:[%s6520_s2 + $0x60] ss:$16 sps:$4 sm:$0xff]  }
 0x137   :  { %1954 = vmatpush1.bf16.msra.mxu1 %v4259_v56  ;;  %1914 = vmatprep.subr.bf16.mxu0 %v4260_v62  ;;  %v4268_v58 = vld [vmem:[%s6520_s2 + $0x264] ss:$16 sps:$4 sm:$0xff]   ;;  %v4271_v56 = vld [vmem:[%s6520_s2 + $0x260] ss:$16 sps:$4 sm:$0xff]   ;;  %v4633_v62 = vmov 65535  }
 0x138   :  { %1955 = vmatprep.subr.bf16.mxu1 %v4262_v63  ;;  %v4272_v61 = vld [vmem:[%s6520_s2 + $0x84] ss:$16 sps:$4 sm:$0xff]   ;;  %v1896_v63 = vsel %vm1894_vm0, 4294967295, %v4633_v62  ;;  %v4277_v51 = vld [vmem:[%s6520_s2 + $0x280] ss:$16 sps:$4 sm:$0xff]  }
 0x139   :  { %v4274_v53 = vld [vmem:[%s6520_s2 + $0x284] ss:$16 sps:$4 sm:$0xff]   ;;  %v5919_v62 = vsel %vm1895_vm1, %v1896_v63, 0 }
 0x13a   :  { %1915 = vmatpush1.bf16.msra.mxu0 %v4264_v59  ;;  %v5899_v59 = vshrl.u32 %v1395_v52, 7  ;;  %v4280_v55 = vld [vmem:[%s6520_s2 + $0x2a4] ss:$16 sps:$4 sm:$0xff]  }
 0x13b   :  { %1956 = vmatpush1.bf16.msra.mxu1 %v4265_v57  ;;  %1916 = vmatprep.subr.bf16.mxu0 %v4266_v60  ;;  %v4276_v57 = vld [vmem:[%s6520_s2 + $0x80] ss:$16 sps:$4 sm:$0xff]   ;;  %v4286_v52 = vld [vmem:[%s6520_s2 + $0x2c4] ss:$16 sps:$4 sm:$0x3f]  }
 0x13c   :  { %1957 = vmatprep.subr.bf16.mxu1 %v4268_v58  ;;  %v4278_v58 = vld [vmem:[%s6520_s2 + $0xa4] ss:$16 sps:$4 sm:$0xff]   ;;  %v4282_v60 = vld [vmem:[%s6520_s2 + $0xa0] ss:$16 sps:$4 sm:$0xff]   ;;  %v1397_v48 = vsub.s32 %v1394_v49, %v5899_v59  ;;  %v1902_v63 = vand.u32 %v4286_v52, %v5919_v62  ;;  %v4295_v52 = vld [vmem:[%s6520_s2 + $0xc] ss:$16 sps:$4 sm:$0xff]  }
 0x13d   :  { %v4284_v49 = vld [vmem:[%s6520_s2 + $0xc4] ss:$16 sps:$4 sm:$0xff]  }
 0x13e   :  { %1917 = vmatpush1.bf16.msra.mxu0 %v4270_v54  ;;  %v4283_v54 = vld [vmem:[%s6520_s2 + $0x2a0] ss:$16 sps:$4 sm:$0xff]  }
 0x13f   :  { %1958 = vmatpush1.bf16.msra.mxu1 %v4271_v56  ;;  %1918 = vmatprep.subr.bf16.mxu0 %v4272_v61  ;;  %v1296_v56 = vld [vmem:[%s6650_s28] sm:$0x3f] }
 0x140   :  { %1959 = vmatprep.subr.bf16.mxu1 %v4274_v53  ;;  %v4289_v61 = vld [vmem:[%s6520_s2 + $0x2c0] ss:$16 sps:$4 sm:$0x3f]   ;;  %v1391_v53 = vcombine.high %v1296_v56, %v1296_v56  ;;  %v5931_v50 = vrot.slane %v1296_v56, %v1397_v48 }
 0x141   :  { %v1899_v56 = vand.u32 %v4289_v61, %v5919_v62  ;;  %v4299_v61 = vld [vmem:[%s6520_s2 + $0x28] ss:$16 sps:$4 sm:$0xff]  }
 0x142   :  { %1919 = vmatpush1.bf16.msra.mxu0 %v4276_v57  ;;  %v1406_v45 = vcombine.high %v5931_v50, %v5931_v50  ;;  %v1405_v57 = vrot.slane %v1391_v53, %v1397_v48  ;;  %v4293_v48 = vld [vmem:[%s6520_s2 + $0x8] ss:$16 sps:$4 sm:$0xff]   ;;  %v4302_v53 = vld [vmem:[%s6520_s2 + $0x100] ss:$16 sps:$4 sm:$0xff]  }
 0x143   :  { %1960 = vmatpush1.bf16.msra.mxu1 %v4277_v51  ;;  %1920 = vmatprep.subr.bf16.mxu0 %v4278_v58  ;;  %v4288_v51 = vld [vmem:[%s6520_s2 + $0xc0] ss:$16 sps:$4 sm:$0xff]   ;;  %v4290_v58 = vld [vmem:[%s6520_s2 + $0xe4] ss:$16 sps:$4 sm:$0xff]  }
 0x144   :  { %1961 = vmatprep.subr.bf16.mxu1 %v4280_v55  ;;  %v1411_v55 = vpack.c.bf16 %v1406_v45, %v1406_v45  ;;  %v5949_v47 = vpack.c.bf16 %v1405_v57, %v1405_v57  ;;  %v4296_v45 = vld [vmem:[%s6520_s2 + $0xe0] ss:$16 sps:$4 sm:$0xff]  }
 0x145   :  { %v4308_v57 = vld [vmem:[%s6520_s2 + $0x120] ss:$16 sps:$4 sm:$0xff]  }
 0x146   :  { %1921 = vmatpush1.bf16.msra.mxu0 %v4282_v60  ;;  %1942 = vmatprep.mubr.bf16.mxu0 %v1411_v55  ;;  %v4297_v60 = vld [vmem:[%s6520_s2 + $0x104] ss:$16 sps:$4 sm:$0xff]  }
 0x147   :  { %1962 = vmatpush1.bf16.msra.mxu1 %v4283_v54  ;;  %1922 = vmatprep.subr.bf16.mxu0 %v4284_v49  ;;  %v4301_v54 = vld [vmem:[%s6520_s2 + $0x2c] ss:$16 sps:$4 sm:$0xff]   ;;  %v4303_v49 = vld [vmem:[%s6520_s2 + $0x124] ss:$16 sps:$4 sm:$0xff]  }
 0x148   :  { %1963 = vmatprep.subr.bf16.mxu1 %v1902_v63  ;;  %v4307_v63 = vld [vmem:[%s6520_s2 + $0x4c] ss:$16 sps:$4 sm:$0xff]  }
 0x14a   :  { %1923 = vmatpush1.bf16.msra.mxu0 %v4288_v51  ;;  %v4305_v51 = vld [vmem:[%s6520_s2 + $0x48] ss:$16 sps:$4 sm:$0xff]  }
 0x14b   :  { %1964 = vmatpush1.bf16.msra.mxu1 %v1899_v56  ;;  %1924 = vmatprep.subr.bf16.mxu0 %v4290_v58  ;;  %v4309_v56 = vld [vmem:[%s6520_s2 + $0x144] ss:$16 sps:$4 sm:$0xff]   ;;  %v4313_v58 = vld [vmem:[%s6520_s2 + $0x6c] ss:$16 sps:$4 sm:$0xff]  }
 0x14c   :  { %1992 = vmatprep.subr.bf16.mxu1 %v4295_v52  ;;  %v4314_v52 = vld [vmem:[%s6520_s2 + $0x140] ss:$16 sps:$4 sm:$0xff]  }
 0x14e   :  { %4011 = vmatmul.mubr.msk.bf16.vlgmr.msra.gmra.mrb[0].mxu1 %vm1890_vm2, %v5949_v47  ;;  %1925 = vmatpush1.bf16.msra.mxu0 %v4296_v45  ;;  %v4319_v45 = vld [vmem:[%s6520_s2 + $0x8c] ss:$16 sps:$4 sm:$0xff]  }
 0x14f   :  { %1993 = vmatpush1.bf16.msra.mxu1 %v4293_v48  ;;  %1926 = vmatprep.subr.bf16.mxu0 %v4297_v60  ;;  %v4315_v48 = vld [vmem:[%s6520_s2 + $0x164] ss:$16 sps:$4 sm:$0xff]   ;;  %v4317_v60 = vld [vmem:[%s6520_s2 + $0x88] ss:$16 sps:$4 sm:$0xff]  }
 0x150   :  { %1994 = vmatprep.subr.bf16.mxu1 %v4301_v54  ;;  %2024 = vmatprep.mubr.bf16.mxu1 %v1411_v55  ;;  %v4311_v55 = vld [vmem:[%s6520_s2 + $0x68] ss:$16 sps:$4 sm:$0xff]   ;;  %v4320_v54 = vld [vmem:[%s6520_s2 + $0x160] ss:$16 sps:$4 sm:$0xff]  }
 0x152   :  { %1927 = vmatpush1.bf16.msra.mxu0 %v4302_v53  ;;  %v4325_v53 = vld [vmem:[%s6520_s2 + $0xac] ss:$16 sps:$4 sm:$0xff]  }
 0x153   :  { %1995 = vmatpush1.bf16.msra.mxu1 %v4299_v61  ;;  %1928 = vmatprep.subr.bf16.mxu0 %v4303_v49  ;;  %v4321_v61 = vld [vmem:[%s6520_s2 + $0x184] ss:$16 sps:$4 sm:$0xff]   ;;  %v4323_v49 = vld [vmem:[%s6520_s2 + $0xa8] ss:$16 sps:$4 sm:$0xff]  }
 0x154   :  { %1996 = vmatprep.subr.bf16.mxu1 %v4307_v63  ;;  %v4326_v63 = vld [vmem:[%s6520_s2 + $0x180] ss:$16 sps:$4 sm:$0xff]  }
 0x156   :  { %1929 = vmatpush1.bf16.msra.mxu0 %v4308_v57  ;;  %v4331_v57 = vld [vmem:[%s6520_s2 + $0xcc] ss:$16 sps:$4 sm:$0xff]  }
 0x157   :  { %1997 = vmatpush1.bf16.msra.mxu1 %v4305_v51  ;;  %1930 = vmatprep.subr.bf16.mxu0 %v4309_v56  ;;  %v4327_v51 = vld [vmem:[%s6520_s2 + $0x1a4] ss:$16 sps:$4 sm:$0xff]   ;;  %v4329_v56 = vld [vmem:[%s6520_s2 + $0xc8] ss:$16 sps:$4 sm:$0xff]  }
 0x158   :  { %1998 = vmatprep.subr.bf16.mxu1 %v4313_v58  ;;  %v4332_v58 = vld [vmem:[%s6520_s2 + $0x1a0] ss:$16 sps:$4 sm:$0xff]  }
 0x15a   :  { %1931 = vmatpush1.bf16.msra.mxu0 %v4314_v52  ;;  %v4337_v52 = vld [vmem:[%s6520_s2 + $0xec] ss:$16 sps:$4 sm:$0xff]  }
 0x15b   :  { %1999 = vmatpush1.bf16.msra.mxu1 %v4311_v55  ;;  %1932 = vmatprep.subr.bf16.mxu0 %v4315_v48  ;;  %v4333_v55 = vld [vmem:[%s6520_s2 + $0x1c4] ss:$16 sps:$4 sm:$0xff]   ;;  %v4335_v48 = vld [vmem:[%s6520_s2 + $0xe8] ss:$16 sps:$4 sm:$0xff]  }
 0x15c   :  { %2000 = vmatprep.subr.bf16.mxu1 %v4319_v45  ;;  %v4338_v45 = vld [vmem:[%s6520_s2 + $0x1c0] ss:$16 sps:$4 sm:$0xff]  }
 0x15e   :  { %1933 = vmatpush1.bf16.msra.mxu0 %v4320_v54  ;;  %v4343_v54 = vld [vmem:[%s6520_s2 + $0x10c] ss:$16 sps:$4 sm:$0xff]  }
 0x15f   :  { %2001 = vmatpush1.bf16.msra.mxu1 %v4317_v60  ;;  %1934 = vmatprep.subr.bf16.mxu0 %v4321_v61  ;;  %v4339_v60 = vld [vmem:[%s6520_s2 + $0x1e4] ss:$16 sps:$4 sm:$0xff]   ;;  %v4341_v61 = vld [vmem:[%s6520_s2 + $0x108] ss:$16 sps:$4 sm:$0xff]  }
 0x160   :  { %2002 = vmatprep.subr.bf16.mxu1 %v4325_v53  ;;  %v4344_v53 = vld [vmem:[%s6520_s2 + $0x1e0] ss:$16 sps:$4 sm:$0xff]  }
 0x162   :  { %1935 = vmatpush1.bf16.msra.mxu0 %v4326_v63  ;;  %v1410_v63 = vpack.c.bf16 %v5931_v50, %v5931_v50  ;;  %v4353_v50 = vld [vmem:[%s6520_s2 + $0x16c] ss:$16 sps:$4 sm:$0xff]  }
 0x163   :  { %2003 = vmatpush1.bf16.msra.mxu1 %v4323_v49  ;;  %1936 = vmatprep.subr.bf16.mxu0 %v4327_v51  ;;  %v4347_v49 = vld [vmem:[%s6520_s2 + $0x12c] ss:$16 sps:$4 sm:$0xff]   ;;  %v4345_v51 = vld [vmem:[%s6520_s2 + $0x128] ss:$16 sps:$4 sm:$0xff]  }
 0x164   :  { %2004 = vmatprep.subr.bf16.mxu1 %v4331_v57  ;;  %v4350_v57 = vld [vmem:[%s6520_s2 + $0x14c] ss:$16 sps:$4 sm:$0xff]  }
 0x166   :  { %1937 = vmatpush1.bf16.msra.mxu0 %v4332_v58  ;;  %v4351_v58 = vld [vmem:[%s6520_s2 + $0x168] ss:$16 sps:$4 sm:$0xff]  }
 0x167   :  { %2005 = vmatpush1.bf16.msra.mxu1 %v4329_v56  ;;  %1938 = vmatprep.subr.bf16.mxu0 %v4333_v55  ;;  %v4348_v56 = vld [vmem:[%s6520_s2 + $0x148] ss:$16 sps:$4 sm:$0xff]   ;;  %v4356_v55 = vld [vmem:[%s6520_s2 + $0x18c] ss:$16 sps:$4 sm:$0xff]  }
 0x168   :  { %2006 = vmatprep.subr.bf16.mxu1 %v4337_v52  ;;  %v4354_v52 = vld [vmem:[%s6520_s2 + $0x188] ss:$16 sps:$4 sm:$0xff]  }
 0x16a   :  { %1939 = vmatpush1.bf16.msra.mxu0 %v4338_v45  ;;  %v4357_v45 = vld [vmem:[%s6520_s2 + $0x1a8] ss:$16 sps:$4 sm:$0xff]  }
 0x16b   :  { %2007 = vmatpush1.bf16.msra.mxu1 %v4335_v48  ;;  %1940 = vmatprep.subr.bf16.mxu0 %v4339_v60  ;;  %v4359_v48 = vld [vmem:[%s6520_s2 + $0x1ac] ss:$16 sps:$4 sm:$0xff]  }
 0x16c   :  { %2008 = vmatprep.subr.bf16.mxu1 %v4343_v54  ;;  %v4362_v60 = vld [vmem:[%s6520_s2 + $0x1cc] ss:$16 sps:$4 sm:$0xff]   ;;  %v4360_v54 = vld [vmem:[%s6520_s2 + $0x1c8] ss:$16 sps:$4 sm:$0xff]  }
 0x16e   :  { %1941 = vmatpush1.bf16.msra.mxu0 %v4344_v53  ;;  %v4363_v53 = vld [vmem:[%s6520_s2 + $0x1e8] ss:$16 sps:$4 sm:$0xff]  }
 0x16f   :  { %2009 = vmatpush1.bf16.msra.mxu1 %v4341_v61  ;;  %v4365_v61 = vld [vmem:[%s6520_s2 + $0x1ec] ss:$16 sps:$4 sm:$0xff]  }
 0x170   :  { %2010 = vmatprep.subr.bf16.mxu1 %v4347_v49  ;;  %v4368_v49 = vld [vmem:[%s6520_s2 + $0x20c] ss:$16 sps:$4 sm:$0xff]  }
 0x171   :  { %1943 = vmatmul.mubr.bf16.vlgmr.msra.gmra.mrb[0].mxu0 %v1410_v63 }
 0x173   :  { %2011 = vmatpush1.bf16.msra.mxu1 %v4345_v51  ;;  %v4366_v51 = vld [vmem:[%s6520_s2 + $0x208] ss:$16 sps:$4 sm:$0xff]  }
 0x174   :  { %2012 = vmatprep.subr.bf16.mxu1 %v4350_v57  ;;  %v4371_v57 = vld [vmem:[%s6520_s2 + $0x22c] ss:$16 sps:$4 sm:$0xff]  }
 0x177   :  { %2013 = vmatpush1.bf16.msra.mxu1 %v4348_v56  ;;  %v4369_v56 = vld [vmem:[%s6520_s2 + $0x228] ss:$16 sps:$4 sm:$0xff]  }
 0x178   :  { %2014 = vmatprep.subr.bf16.mxu1 %v4353_v50  ;;  %v6651_v50 = vmov 0  }
 0x17b   :  { %2015 = vmatpush1.bf16.msra.mxu1 %v4351_v58  ;;  %v4374_v58 = vld [vmem:[%s6520_s2 + $0x24c] ss:$16 sps:$4 sm:$0xff]  }
 0x17c   :  { %2016 = vmatprep.subr.bf16.mxu1 %v4356_v55  ;;  %v4372_v55 = vld [vmem:[%s6520_s2 + $0x248] ss:$16 sps:$4 sm:$0xff]  }
 0x17f   :  { %2017 = vmatpush1.bf16.msra.mxu1 %v4354_v52  ;;  %v4375_v52 = vld [vmem:[%s6520_s2 + $0x268] ss:$16 sps:$4 sm:$0xff]  }
 0x180   :  { %2018 = vmatprep.subr.bf16.mxu1 %v4359_v48  ;;  %v4380_v48 = vld [vmem:[%s6520_s2 + $0x28c] ss:$16 sps:$4 sm:$0xff]  }
 0x183   :  { %2019 = vmatpush1.bf16.msra.mxu1 %v4357_v45  ;;  %v4378_v45 = vld [vmem:[%s6520_s2 + $0x288] ss:$16 sps:$4 sm:$0xff]  }
 0x184   :  { %2020 = vmatprep.subr.bf16.mxu1 %v4362_v60  ;;  %v4383_v60 = vld [vmem:[%s6520_s2 + $0x2ac] ss:$16 sps:$4 sm:$0xff]  }
 0x187   :  { %2021 = vmatpush1.bf16.msra.mxu1 %v4360_v54  ;;  %v4386_v54 = vld [vmem:[%s6520_s2 + $0x2cc] ss:$16 sps:$4 sm:$0x3f]  }
 0x188   :  { %2022 = vmatprep.subr.bf16.mxu1 %v4365_v61  ;;  %v4381_v61 = vld [vmem:[%s6520_s2 + $0x2a8] ss:$16 sps:$4 sm:$0xff]  }
 0x18b   :  { %2023 = vmatpush1.bf16.msra.mxu1 %v4363_v53  ;;  %v4384_v53 = vld [vmem:[%s6520_s2 + $0x2c8] ss:$16 sps:$4 sm:$0x3f]  }
 0x18c   :  { %2033 = vmatprep.subr.bf16.mxu1 %v4368_v49  ;;  %v1908_v49 = vand.u32 %v4386_v54, %v5919_v62 }
 0x18e   :  { %2025 = vmatmul.mubr.bf16.vlgmr.msra.gmra.mrb[4].mxu1 %v1410_v63  ;;  %v4377_v63 = vld [vmem:[%s6520_s2 + $0x26c] ss:$16 sps:$4 sm:$0xff]  }
 0x18f   :  { %2034 = vmatpush1.bf16.msra.mxu1 %v4366_v51  ;;  %2065 = vmatprep.mubr.bf16.mxu1 %v6651_v50  ;;  %v1905_v51 = vand.u32 %v4384_v53, %v5919_v62 }
 0x190   :  { %2035 = vmatprep.subr.bf16.mxu1 %v4371_v57 }
 0x193   :  { %2036 = vmatpush1.bf16.msra.mxu1 %v4369_v56 }
 0x194   :  { %2037 = vmatprep.subr.bf16.mxu1 %v4374_v58 }
 0x197   :  { %2038 = vmatpush1.bf16.msra.mxu1 %v4372_v55 }
 0x198   :  { %2039 = vmatprep.subr.bf16.mxu1 %v4377_v63 }
 0x19b   :  { %2040 = vmatpush1.bf16.msra.mxu1 %v4375_v52 }
 0x19c   :  { %2041 = vmatprep.subr.bf16.mxu1 %v4380_v48 }
 0x19f   :  { %2042 = vmatpush1.bf16.msra.mxu1 %v4378_v45 }
 0x1a0   :  { %2043 = vmatprep.subr.bf16.mxu1 %v4383_v60 }
 0x1a3   :  { %2044 = vmatpush1.bf16.msra.mxu1 %v4381_v61 }
 0x1a4   :  { %2045 = vmatprep.subr.bf16.mxu1 %v1908_v49 }
 0x1a7   :  { %2046 = vmatpush1.bf16.msra.mxu1 %v1905_v51 }
 0x1aa   :  { %4012 = vmatmul.mubr.msk.bf16.vlgmr.msra.gmra.mrb[4].mxu1 %vm1890_vm2, %v5949_v47 }
 0x1ab   :  { %4555 = shalt.err (!%p4552_p2)  }
 0x1ac   :  { %s4556_s1 = scalar_lea.vmem %s1293_s14, 4096  ;;  %p4561_p4 = scmp.lt.s32.totalorder %s1293_s14, %s1293_s14 }
 0x1ad   :  { %p4557_p3 = scmp.ne.s32.totalorder %s1293_s14, %s4556_s1  ;;  %p4562_p5 = scmp.lt.s32.totalorder %s4556_s1, %s4556_s1 }
 0x1af   :  { %p4563_p6 = por %p4562_p5, %p4561_p4 }
 0x1b1   :  { %p4564_p7 = pnand %p4563_p6, %p4557_p3 }
 0x1b3   :  { %4567 = shalt.err (!%p4564_p7)  }
 0x1b4   :  { %1295 = dma.hbm_to_vmem [thread:$0]  %s6534_s16, 4096, %s1293_s14, [#allocation8 + $0x5]  ;;  %v6159_v58 = vsub.s32 0, %v5899_v59  ;;  %v1389_v55 = vld [vmem:[%s6521_s3] sm:$0xf]  ;;  %v6165_v63 = vsub.s32 1, %v5899_v59 }
 0x1b5   :  { %v6173_v44 = vsub.s32 2, %v5899_v59  ;;  %v6176_v46 = vsub.s32 3, %v5899_v59  ;;  %v4014_v59 = vcombine.high %v4804_v0, %v4814_v2 }
 0x1b6   :  { %6652 = vst [vmem:[#allocation98_spill] sm:$0xff] %v6165_v63  ;;  %v1417_v52 = vrot.slane %v1389_v55, %v6159_v58  ;;  %v1421_v48 = vrot.slane %v1389_v55, %v6165_v63 }
 0x1b7   :  { %v1425_v63 = vrot.slane %v1389_v55, %v6173_v44 }
 0x221   :  { %v1985_v47 = vpop.f32.mrb[0].mxu1 }
 0x222   :  { %v1987_v62 = vpop.f32.mrb[1].mxu1 }
 0x223   :  { %v1989_v57 = vpop.f32.mrb[2].mxu1 }
 0x224   :  { %v1990_v56 = vpop.f32.mrb[3].mxu1 }
 0x244   :  { %v1944_v45 = vpop.f32.mrb[0].mxu0 }
 0x245   :  { %v1945_v60 = vadd.f32 %v1944_v45, %v1417_v52  ;;  %v1946_v54 = vpop.f32.mrb[1].mxu0  ;;  %v1429_v52 = vrot.slane %v1389_v55, %v6176_v46  ;;  %v4013_v55 = vcombine.low %v4804_v0, %v4814_v2 }
 0x246   :  { %v1947_v61 = vadd.f32 %v1946_v54, %v1421_v48  ;;  %v1948_v53 = vpop.f32.mrb[2].mxu0 }
 0x247   :  { %v6169_v49 = vadd.f32 %v1985_v47, %v1945_v60  ;;  %v1949_v51 = vpop.f32.mrb[3].mxu0 }
 0x248   :  { %v1988_v57 = vadd.f32 %v1987_v62, %v1947_v61  ;;  %v4016_v51 = vcombine.high %v4809_v1, %v4819_v3 }
 0x249   :  { %v2074_v56 = vmax.f32 %v6169_v49, 0.0 }
 0x24a   :  { %v2075_v50 = vmax.f32 %v1988_v57, 0.0 }
 0x27d   :  { %v2067_v45 = vpop.f32.mrb[4].mxu1 }
 0x27e   :  { %v6180_v48 = vadd.f32 %v2067_v45, %v1425_v63  ;;  %v2069_v47 = vpop.f32.mrb[5].mxu1  ;;  %v4015_v63 = vcombine.low %v4809_v1, %v4819_v3 }
 0x27f   :  { %v6182_v60 = vadd.f32 %v2069_v47, %v1429_v52  ;;  %v2071_v62 = vpop.f32.mrb[6].mxu1 }
 0x280   :  { %v2076_v54 = vmax.f32 %v6180_v48, 0.0  ;;  %v2072_v61 = vpop.f32.mrb[7].mxu1 }
 0x281   :  { %v2077_v53 = vmax.f32 %v6182_v60, 0.0 }
 0x282   :  { %4598 = dma.done.wait [#allocation8], 12544 }
 0x283   :  { %4599 = vsyncadd [#allocation8], 4294954752  ;;  %v4018_v57 = vcombine.high %v4824_v4, %v4834_v6  ;;  %v4020_v52 = vcombine.high %v4829_v5, %v4839_v7  ;;  %2713 = vmatprep.subr.bf16.mxu0 %v4014_v59  ;;  %2795 = vmatprep.subr.bf16.mxu1 %v4016_v51  ;;  %v4017_v45 = vcombine.low %v4824_v4, %v4834_v6  ;;  %v6656_v62 = vld [vmem:[#allocation45_spill] sm:$0xff]  ;;  %vm2696_vm3 = vcmask 64512  }
 0x284   :  { %2714 = vmatpush1.bf16.msra.mxu0 %v4013_v55  ;;  %2796 = vmatpush1.bf16.msra.mxu1 %v4015_v63  ;;  %v4019_v0 = vcombine.low %v4829_v5, %v4839_v7  ;;  %v4022_v1 = vcombine.high %v4844_v8, %v4854_v10  ;;  %v4024_v2 = vcombine.high %v4849_v9, %v4859_v11  ;;  %v6660_v55 = vld [vmem:[#allocation49_spill] sm:$0xff]  ;;  %vm2700_vm4 = vcmask 1043456  }
 0x285   :  { %2715 = vmatprep.subr.bf16.mxu0 %v4018_v57  ;;  %2797 = vmatprep.subr.bf16.mxu1 %v4020_v52  ;;  %v4021_v3 = vcombine.low %v4844_v8, %v4854_v10  ;;  %v4023_v47 = vcombine.low %v4849_v9, %v4859_v11  ;;  %v4026_v4 = vcombine.high %v4864_v12, %v4874_v14  ;;  %v6684_v60 = vld [vmem:[#allocation73_spill] sm:$0xff] }
 0x286   :  { %v4028_v5 = vcombine.high %v4869_v13, %v4879_v15  ;;  %v4025_v6 = vcombine.low %v4864_v12, %v4874_v14  ;;  %v4027_v7 = vcombine.low %v4869_v13, %v4879_v15  ;;  %v4030_v8 = vcombine.high %v4884_v16, %v4894_v18 }
 0x287   :  { %v4032_v9 = vcombine.high %v4889_v17, %v4899_v19  ;;  %v4029_v10 = vcombine.low %v4884_v16, %v4894_v18  ;;  %v4031_v11 = vcombine.low %v4889_v17, %v4899_v19  ;;  %v4034_v12 = vcombine.high %v4904_v20, %v4914_v22 }
 0x288   :  { %2716 = vmatpush1.bf16.msra.mxu0 %v4017_v45  ;;  %2798 = vmatpush1.bf16.msra.mxu1 %v4019_v0  ;;  %v4036_v13 = vcombine.high %v4909_v21, %v4919_v23  ;;  %v2182_v14 = vpack.c.bf16 %v2075_v50, %v2075_v50  ;;  %v4033_v15 = vcombine.low %v4904_v20, %v4914_v22  ;;  %v6661_v45 = vld [vmem:[#allocation54_spill] sm:$0xff]  ;;  %v6662_v0 = vld [vmem:[#allocation52_spill] sm:$0xff] }
 0x289   :  { %2717 = vmatprep.subr.bf16.mxu0 %v4022_v1  ;;  %2799 = vmatprep.subr.bf16.mxu1 %v4024_v2  ;;  %v4035_v16 = vcombine.low %v4909_v21, %v4919_v23  ;;  %v4038_v17 = vcombine.high %v4924_v24, %v4934_v26  ;;  %v4040_v18 = vcombine.high %v4929_v25, %v4939_v27  ;;  %v6663_v2 = vld [vmem:[#allocation55_spill] sm:$0xff] }
 0x28a   :  { %2745 = vmatprep.mubr.bf16.mxu0 %v2182_v14  ;;  %2827 = vmatprep.mubr.bf16.mxu1 %v2182_v14  ;;  %v4037_v19 = vcombine.low %v4924_v24, %v4934_v26  ;;  %v4039_v20 = vcombine.low %v4929_v25, %v4939_v27  ;;  %v4042_v21 = vcombine.high %v4944_v28, %v4954_v30  ;;  %v6669_v14 = vld [vmem:[#allocation62_spill] sm:$0xff] }
 0x28b   :  { %v4044_v22 = vcombine.high %v4949_v29, %v4959_v31  ;;  %v4041_v23 = vcombine.low %v4944_v28, %v4954_v30  ;;  %v4043_v50 = vcombine.low %v4949_v29, %v4959_v31  ;;  %v4046_v24 = vcombine.high %v4964_v32, %v4974_v34 }
 0x28c   :  { %2718 = vmatpush1.bf16.msra.mxu0 %v4021_v3  ;;  %2800 = vmatpush1.bf16.msra.mxu1 %v4023_v47  ;;  %v4048_v25 = vcombine.high %v4969_v33, %v4979_v35  ;;  %v4045_v26 = vcombine.low %v4964_v32, %v4974_v34  ;;  %v4047_v27 = vcombine.low %v4969_v33, %v4979_v35  ;;  %v6664_v3 = vld [vmem:[#allocation53_spill] sm:$0xff] }
 0x28d   :  { %2719 = vmatprep.subr.bf16.mxu0 %v4026_v4  ;;  %2801 = vmatprep.subr.bf16.mxu1 %v4028_v5  ;;  %v4050_v28 = vcombine.high %v4984_v36, %v4994_v38  ;;  %v4052_v29 = vcombine.high %v4989_v37, %v4999_v39  ;;  %v4049_v30 = vcombine.low %v4984_v36, %v4994_v38  ;;  %v6653_v36 = vld [vmem:[#allocation46_spill] sm:$0xff] }
 0x28e   :  { %v4051_v31 = vcombine.low %v4989_v37, %v4999_v39  ;;  %v4054_v32 = vcombine.high %v5004_v40, %v5014_v42  ;;  %v4056_v33 = vcombine.high %v5009_v41, %v5019_v43  ;;  %v4053_v34 = vcombine.low %v5004_v40, %v5014_v42  ;;  %v6654_v37 = vld [vmem:[#allocation44_spill] sm:$0xff]  ;;  %v6655_v39 = vld [vmem:[#allocation47_spill] sm:$0xff]  ;;  %v6657_v40 = vld [vmem:[#allocation50_spill] sm:$0xff] }
 0x28f   :  { %v4055_v35 = vcombine.low %v5009_v41, %v5019_v43  ;;  %v4058_v38 = vcombine.high %v6654_v37, %v6653_v36  ;;  %v4060_v61 = vcombine.high %v6656_v62, %v6655_v39  ;;  %v4057_v59 = vcombine.low %v6654_v37, %v6653_v36  ;;  %v6658_v41 = vld [vmem:[#allocation48_spill] sm:$0xff]  ;;  %v6659_v43 = vld [vmem:[#allocation51_spill] sm:$0xff]  ;;  %v6681_v37 = vld [vmem:[#allocation74_spill] sm:$0xff] }
 0x290   :  { %2720 = vmatpush1.bf16.msra.mxu0 %v4025_v6  ;;  %2802 = vmatpush1.bf16.msra.mxu1 %v4027_v7  ;;  %v4059_v51 = vcombine.low %v6656_v62, %v6655_v39  ;;  %v4062_v42 = vcombine.high %v6658_v41, %v6657_v40  ;;  %v4064_v63 = vcombine.high %v6660_v55, %v6659_v43  ;;  %v6665_v6 = vld [vmem:[#allocation58_spill] sm:$0xff]  ;;  %v6666_v7 = vld [vmem:[#allocation56_spill] sm:$0xff]  ;;  %v6683_v62 = vld [vmem:[#allocation75_spill] sm:$0xff] }
 0x291   :  { %2721 = vmatprep.subr.bf16.mxu0 %v4030_v8  ;;  %2803 = vmatprep.subr.bf16.mxu1 %v4032_v9  ;;  %v4061_v57 = vcombine.low %v6658_v41, %v6657_v40  ;;  %v4063_v52 = vcombine.low %v6660_v55, %v6659_v43  ;;  %v4066_v1 = vcombine.high %v6662_v0, %v6661_v45  ;;  %v6667_v9 = vld [vmem:[#allocation59_spill] sm:$0xff]  ;;  %v6686_v40 = vld [vmem:[#allocation76_spill] sm:$0xff]  ;;  %v6688_v43 = vld [vmem:[#allocation77_spill] sm:$0xff] }
 0x292   :  { %v4068_v47 = vcombine.high %v6664_v3, %v6663_v2  ;;  %v4065_v4 = vcombine.low %v6662_v0, %v6661_v45  ;;  %v4067_v5 = vcombine.low %v6664_v3, %v6663_v2  ;;  %v4070_v8 = vcombine.high %v6666_v7, %v6665_v6  ;;  %v6690_v45 = vld [vmem:[#allocation80_spill] sm:$0xff]  ;;  %v6692_v2 = vld [vmem:[#allocation81_spill] sm:$0xff] }
 0x293   :  { %v2184_v49 = vpack.c.bf16 %v2077_v53, %v2077_v53 }
 0x294   :  { %2722 = vmatpush1.bf16.msra.mxu0 %v4029_v10  ;;  %2804 = vmatpush1.bf16.msra.mxu1 %v4031_v11  ;;  %v6668_v10 = vld [vmem:[#allocation57_spill] sm:$0xff] }
 0x295   :  { %2723 = vmatprep.subr.bf16.mxu0 %v4034_v12  ;;  %2805 = vmatprep.subr.bf16.mxu1 %v4036_v13  ;;  %v4072_v11 = vcombine.high %v6668_v10, %v6667_v9  ;;  %v4069_v12 = vcombine.low %v6666_v7, %v6665_v6  ;;  %v4071_v13 = vcombine.low %v6668_v10, %v6667_v9  ;;  %v6694_v6 = vld [vmem:[#allocation84_spill] sm:$0xff]  ;;  %v6696_v9 = vld [vmem:[#allocation85_spill] sm:$0xff] }
 0x298   :  { %2724 = vmatpush1.bf16.msra.mxu0 %v4033_v15  ;;  %2806 = vmatpush1.bf16.msra.mxu1 %v4035_v16  ;;  %v6670_v15 = vld [vmem:[#allocation60_spill] sm:$0xff] }
 0x299   :  { %2725 = vmatprep.subr.bf16.mxu0 %v4038_v17  ;;  %2807 = vmatprep.subr.bf16.mxu1 %v4040_v18  ;;  %v4074_v16 = vcombine.high %v6670_v15, %v6669_v14  ;;  %v6671_v17 = vld [vmem:[#allocation63_spill] sm:$0xff]  ;;  %v6672_v18 = vld [vmem:[#allocation61_spill] sm:$0xff] }
 0x29c   :  { %2726 = vmatpush1.bf16.msra.mxu0 %v4037_v19  ;;  %2808 = vmatpush1.bf16.msra.mxu1 %v4039_v20  ;;  %v4076_v19 = vcombine.high %v6672_v18, %v6671_v17  ;;  %v4073_v20 = vcombine.low %v6670_v15, %v6669_v14  ;;  %v6698_v14 = vld [vmem:[#allocation88_spill] sm:$0xff] }
 0x29d   :  { %2727 = vmatprep.subr.bf16.mxu0 %v4042_v21  ;;  %2809 = vmatprep.subr.bf16.mxu1 %v4044_v22  ;;  %v4075_v21 = vcombine.low %v6672_v18, %v6671_v17  ;;  %v6673_v22 = vld [vmem:[#allocation66_spill] sm:$0xff]  ;;  %v6700_v17 = vld [vmem:[#allocation89_spill] sm:$0xff] }
 0x2a0   :  { %2728 = vmatpush1.bf16.msra.mxu0 %v4041_v23  ;;  %2810 = vmatpush1.bf16.msra.mxu1 %v4043_v50  ;;  %v6674_v23 = vld [vmem:[#allocation64_spill] sm:$0xff] }
 0x2a1   :  { %2729 = vmatprep.subr.bf16.mxu0 %v4046_v24  ;;  %2811 = vmatprep.subr.bf16.mxu1 %v4048_v25  ;;  %v4078_v50 = vcombine.high %v6674_v23, %v6673_v22  ;;  %v6675_v24 = vld [vmem:[#allocation67_spill] sm:$0xff]  ;;  %v6676_v25 = vld [vmem:[#allocation65_spill] sm:$0xff] }
 0x2a4   :  { %2730 = vmatpush1.bf16.msra.mxu0 %v4045_v26  ;;  %2812 = vmatpush1.bf16.msra.mxu1 %v4047_v27  ;;  %v4080_v26 = vcombine.high %v6676_v25, %v6675_v24  ;;  %v2181_v27 = vpack.c.bf16 %v2074_v56, %v2074_v56 }
 0x2a5   :  { %2731 = vmatprep.subr.bf16.mxu0 %v4050_v28  ;;  %2813 = vmatprep.subr.bf16.mxu1 %v4052_v29  ;;  %v4077_v28 = vcombine.low %v6674_v23, %v6673_v22  ;;  %v4079_v29 = vcombine.low %v6676_v25, %v6675_v24  ;;  %v6702_v22 = vld [vmem:[#allocation92_spill] sm:$0xff]  ;;  %v6704_v24 = vld [vmem:[#allocation93_spill] sm:$0xff] }
 0x2a8   :  { %2732 = vmatpush1.bf16.msra.mxu0 %v4049_v30  ;;  %2814 = vmatpush1.bf16.msra.mxu1 %v4051_v31  ;;  %v6677_v30 = vld [vmem:[#allocation70_spill] sm:$0xff]  ;;  %v6678_v31 = vld [vmem:[#allocation68_spill] sm:$0xff] }
 0x2a9   :  { %2733 = vmatprep.subr.bf16.mxu0 %v4054_v32  ;;  %2815 = vmatprep.subr.bf16.mxu1 %v4056_v33  ;;  %v4082_v32 = vcombine.high %v6678_v31, %v6677_v30  ;;  %v6679_v33 = vld [vmem:[#allocation71_spill] sm:$0xff]  ;;  %v4081_v56 = vcombine.low %v6678_v31, %v6677_v30  ;;  %v6706_v30 = vld [vmem:[#allocation97_spill] sm:$0xff] }
 0x2aa   :  { %v4112_v31 = vcombine.high %v6706_v30, %v6706_v30 }
 0x2ac   :  { %2734 = vmatpush1.bf16.msra.mxu0 %v4053_v34  ;;  %2816 = vmatpush1.bf16.msra.mxu1 %v4055_v35  ;;  %v6680_v34 = vld [vmem:[#allocation69_spill] sm:$0xff] }
 0x2ad   :  { %2735 = vmatprep.subr.bf16.mxu0 %v4058_v38  ;;  %2817 = vmatprep.subr.bf16.mxu1 %v4060_v61  ;;  %v4084_v35 = vcombine.high %v6680_v34, %v6679_v33  ;;  %v4083_v36 = vcombine.low %v6680_v34, %v6679_v33  ;;  %v6682_v38 = vld [vmem:[#allocation72_spill] sm:$0xff]  ;;  %v4088_v61 = vcombine.high %v6684_v60, %v6683_v62 }
 0x2ae   :  { %v4086_v39 = vcombine.high %v6682_v38, %v6681_v37  ;;  %v4085_v53 = vcombine.low %v6682_v38, %v6681_v37  ;;  %v4111_v33 = vcombine.low %v6706_v30, %v6706_v30  ;;  %v6707_v38 = vld [vmem:[#allocation98_spill] sm:$0xff] }
 0x2b0   :  { %2736 = vmatpush1.bf16.msra.mxu0 %v4057_v59  ;;  %2818 = vmatpush1.bf16.msra.mxu1 %v4059_v51  ;;  %v4087_v59 = vcombine.low %v6684_v60, %v6683_v62  ;;  %v6685_v51 = vld [vmem:[#allocation78_spill] sm:$0xff] }
 0x2b1   :  { %2737 = vmatprep.subr.bf16.mxu0 %v4062_v42  ;;  %2819 = vmatprep.subr.bf16.mxu1 %v4064_v63  ;;  %v4090_v41 = vcombine.high %v6686_v40, %v6685_v51  ;;  %v6687_v42 = vld [vmem:[#allocation79_spill] sm:$0xff]  ;;  %v4089_v63 = vcombine.low %v6686_v40, %v6685_v51 }
 0x2b2   :  { %v4092_v55 = vcombine.high %v6688_v43, %v6687_v42 }
 0x2b4   :  { %2738 = vmatpush1.bf16.msra.mxu0 %v4061_v57  ;;  %2820 = vmatpush1.bf16.msra.mxu1 %v4063_v52  ;;  %v4091_v57 = vcombine.low %v6688_v43, %v6687_v42  ;;  %v6689_v52 = vld [vmem:[#allocation82_spill] sm:$0xff] }
 0x2b5   :  { %2739 = vmatprep.subr.bf16.mxu0 %v4066_v1  ;;  %2821 = vmatprep.subr.bf16.mxu1 %v4068_v47  ;;  %v4094_v0 = vcombine.high %v6690_v45, %v6689_v52  ;;  %v6691_v1 = vld [vmem:[#allocation83_spill] sm:$0xff]  ;;  %v4093_v47 = vcombine.low %v6690_v45, %v6689_v52 }
 0x2b6   :  { %v4096_v3 = vcombine.high %v6692_v2, %v6691_v1 }
 0x2b8   :  { %2740 = vmatpush1.bf16.msra.mxu0 %v4065_v4  ;;  %2822 = vmatpush1.bf16.msra.mxu1 %v4067_v5  ;;  %v4095_v4 = vcombine.low %v6692_v2, %v6691_v1  ;;  %v6693_v5 = vld [vmem:[#allocation86_spill] sm:$0xff] }
 0x2b9   :  { %2741 = vmatprep.subr.bf16.mxu0 %v4070_v8  ;;  %2823 = vmatprep.subr.bf16.mxu1 %v4072_v11  ;;  %v4098_v7 = vcombine.high %v6694_v6, %v6693_v5  ;;  %v6695_v8 = vld [vmem:[#allocation87_spill] sm:$0xff]  ;;  %v4097_v11 = vcombine.low %v6694_v6, %v6693_v5 }
 0x2ba   :  { %v4100_v10 = vcombine.high %v6696_v9, %v6695_v8 }
 0x2bc   :  { %2742 = vmatpush1.bf16.msra.mxu0 %v4069_v12  ;;  %2824 = vmatpush1.bf16.msra.mxu1 %v4071_v13  ;;  %v4099_v12 = vcombine.low %v6696_v9, %v6695_v8  ;;  %v6697_v13 = vld [vmem:[#allocation90_spill] sm:$0xff] }
 0x2bd   :  { %2743 = vmatprep.subr.bf16.mxu0 %v4074_v16  ;;  %2825 = vmatprep.subr.bf16.mxu1 %v4076_v19  ;;  %v4102_v15 = vcombine.high %v6698_v14, %v6697_v13  ;;  %v6699_v16 = vld [vmem:[#allocation91_spill] sm:$0xff]  ;;  %v4101_v19 = vcombine.low %v6698_v14, %v6697_v13 }
 0x2be   :  { %v4104_v18 = vcombine.high %v6700_v17, %v6699_v16 }
 0x2c0   :  { %2744 = vmatpush1.bf16.msra.mxu0 %v4073_v20  ;;  %2826 = vmatpush1.bf16.msra.mxu1 %v4075_v21  ;;  %v4103_v20 = vcombine.low %v6700_v17, %v6699_v16  ;;  %v6701_v21 = vld [vmem:[#allocation94_spill] sm:$0xff] }
 0x2c1   :  { %2754 = vmatprep.subr.bf16.mxu0 %v4078_v50  ;;  %2836 = vmatprep.subr.bf16.mxu1 %v4080_v26  ;;  %v4106_v23 = vcombine.high %v6702_v22, %v6701_v21  ;;  %v6703_v50 = vld [vmem:[#allocation95_spill] sm:$0xff]  ;;  %v4105_v26 = vcombine.low %v6702_v22, %v6701_v21 }
 0x2c2   :  { %v4108_v25 = vcombine.high %v6704_v24, %v6703_v50 }
 0x2c3   :  { %2746 = vmatmul.mubr.bf16.vlgmr.msra.gmra.mrb[4].mxu0 %v2181_v27  ;;  %2828 = vmatmul.mubr.bf16.vlgmr.msra.gmra.mrb[8].mxu1 %v2181_v27  ;;  %v4107_v27 = vcombine.low %v6704_v24, %v6703_v50 }
 0x2c4   :  { %2755 = vmatpush1.bf16.msra.mxu0 %v4077_v28  ;;  %2837 = vmatpush1.bf16.msra.mxu1 %v4079_v29  ;;  %v6705_v28 = vld [vmem:[#allocation96_spill] sm:$0xff] }
 0x2c5   :  { %2756 = vmatprep.subr.bf16.mxu0 %v4082_v32  ;;  %2838 = vmatprep.subr.bf16.mxu1 %v4084_v35  ;;  %v4110_v29 = vcombine.high %v6705_v28, %v6705_v28  ;;  %v4109_v32 = vcombine.low %v6705_v28, %v6705_v28  ;;  %v2708_v35 = vsel %vm2700_vm4, %v4111_v33, 0 }
 0x2c6   :  { %4114 = vmatprep.mubr.msk.bf16.mxu0 %vm2696_vm3, %v2184_v49  ;;  %4116 = vmatprep.mubr.msk.bf16.mxu1 %vm2696_vm3, %v2184_v49  ;;  %v2183_v49 = vpack.c.bf16 %v2076_v54, %v2076_v54 }
 0x2c7   :  { %v2702_v34 = vsel %vm2700_vm4, %v4109_v32, 0 }
 0x2c8   :  { %2757 = vmatpush1.bf16.msra.mxu0 %v4081_v56  ;;  %2839 = vmatpush1.bf16.msra.mxu1 %v4083_v36  ;;  %v2180_v56 = vld [vmem:[%s6522_s4] sm:$0xf] }
 0x2c9   :  { %2758 = vmatprep.subr.bf16.mxu0 %v4086_v39  ;;  %2840 = vmatprep.subr.bf16.mxu1 %v4088_v61  ;;  %v2189_v36 = vrot.slane %v2180_v56, %v6159_v58  ;;  %v2197_v37 = vrot.slane %v2180_v56, %v6173_v44  ;;  %v2193_v39 = vrot.slane %v2180_v56, %v6707_v38 }
 0x2ca   :  { %v2201_v62 = vrot.slane %v2180_v56, %v6176_v46 }
 0x2cc   :  { %2759 = vmatpush1.bf16.msra.mxu0 %v4085_v53  ;;  %2841 = vmatpush1.bf16.msra.mxu1 %v4087_v59 }
 0x2cd   :  { %2760 = vmatprep.subr.bf16.mxu0 %v4090_v41  ;;  %2842 = vmatprep.subr.bf16.mxu1 %v4092_v55 }
 0x2d0   :  { %2761 = vmatpush1.bf16.msra.mxu0 %v4089_v63  ;;  %2843 = vmatpush1.bf16.msra.mxu1 %v4091_v57 }
 0x2d1   :  { %2762 = vmatprep.subr.bf16.mxu0 %v4094_v0  ;;  %2844 = vmatprep.subr.bf16.mxu1 %v4096_v3 }
 0x2d4   :  { %2763 = vmatpush1.bf16.msra.mxu0 %v4093_v47  ;;  %2845 = vmatpush1.bf16.msra.mxu1 %v4095_v4 }
 0x2d5   :  { %2764 = vmatprep.subr.bf16.mxu0 %v4098_v7  ;;  %2846 = vmatprep.subr.bf16.mxu1 %v4100_v10 }
 0x2d8   :  { %2765 = vmatpush1.bf16.msra.mxu0 %v4097_v11  ;;  %2847 = vmatpush1.bf16.msra.mxu1 %v4099_v12 }
 0x2d9   :  { %2766 = vmatprep.subr.bf16.mxu0 %v4102_v15  ;;  %2848 = vmatprep.subr.bf16.mxu1 %v4104_v18 }
 0x2dc   :  { %2767 = vmatpush1.bf16.msra.mxu0 %v4101_v19  ;;  %2849 = vmatpush1.bf16.msra.mxu1 %v4103_v20 }
 0x2dd   :  { %2768 = vmatprep.subr.bf16.mxu0 %v4106_v23  ;;  %2850 = vmatprep.subr.bf16.mxu1 %v4108_v25 }
 0x2e0   :  { %2769 = vmatpush1.bf16.msra.mxu0 %v4105_v26  ;;  %2851 = vmatpush1.bf16.msra.mxu1 %v4107_v27 }
 0x2e1   :  { %4113 = vmatprep.subr.msk.bf16.mxu0 %vm2700_vm4, %v4110_v29  ;;  %4115 = vmatprep.subr.msk.bf16.mxu1 %vm2700_vm4, %v4112_v31 }
 0x2e4   :  { %2771 = vmatpush1.bf16.msra.mxu0 %v2702_v34  ;;  %2853 = vmatpush1.bf16.msra.mxu1 %v2708_v35 }
 0x2e7   :  { %2787 = vmatmul.mubr.bf16.vlgmr.msra.gmra.mrb[4].mxu0 %v2183_v49  ;;  %2869 = vmatmul.mubr.bf16.vlgmr.msra.gmra.mrb[8].mxu1 %v2183_v49 }
 0x3ba   :  { %v2788_v60 = vpop.f32.mrb[4].mxu0  ;;  %v2870_v48 = vpop.f32.mrb[8].mxu1 }
 0x3bb   :  { %v6402_v61 = vadd.f32 %v2788_v60, %v2189_v36  ;;  %v6404_v54 = vadd.f32 %v2870_v48, %v2197_v37  ;;  %v2790_v53 = vpop.f32.mrb[5].mxu0  ;;  %v2872_v59 = vpop.f32.mrb[9].mxu1 }
 0x3bc   :  { %v4200_v51 = vadd.f32 %v2790_v53, %v2193_v39  ;;  %v4202_v40 = vadd.f32 %v2872_v59, %v2201_v62  ;;  %v2792_v41 = vpop.f32.mrb[6].mxu0  ;;  %v2874_v42 = vpop.f32.mrb[10].mxu1 }
 0x3bd   :  { %v2877_v43 = vmax.f32 %v6402_v61, 0.0  ;;  %v2879_v55 = vmax.f32 %v6404_v54, 0.0  ;;  %v2793_v63 = vpop.f32.mrb[7].mxu0  ;;  %v2875_v57 = vpop.f32.mrb[11].mxu1 }
 0x3be   :  { %v2878_v52 = vmax.f32 %v4200_v51, 0.0  ;;  %v2880_v45 = vmax.f32 %v4202_v40, 0.0 }
 0x3bf   :  { %4600 = dma.done.wait [#allocation8 + $0x1], 12800 }
 0x3c0   :  { %4601 = vsyncadd [#allocation8 + $0x1], 4294954496  ;;  %v6408_v0 = vpack.c.bf16 %v2880_v45, %v2880_v45  ;;  %vm3021_vm5 = vcmask 130048   ;;  %v6410_v1 = vpack.c.bf16 %v2878_v52, %v2878_v52  ;;  %v6708_v2 = vmov 0   ;;  %v2891_v47 = vld [vmem:[#allocation3 + $0x8] sm:$0xff]  ;;  %v2890_v5 = vld [vmem:[#allocation3] sm:$0xff] }
 0x3c1   :  { %4387 = vset.pattern.permute.xlu0 %v6708_v2  ;;  %v4635_v3 = vmov 2   ;;  %v2955_v4 = vld [vmem:[#allocation3 + $0x208] sm:$0xff]  ;;  %3025 = vmatprep.subr.bf16.mxu0 %v2891_v47  ;;  %v2954_v6 = vld [vmem:[#allocation3 + $0x200] sm:$0xff]  ;;  %v2893_v37 = vld [vmem:[#allocation3 + $0x18] sm:$0xff]  ;;  %v6419_v39 = vpack.c.bf16 %v2879_v55, %v2879_v55  ;;  %s6709_s21 = sld [smem:[#allocation100_spill]]  ;;  %v4636_v42 = vmov 1  }
 0x3c2   :  { %4117 = vmatprep.mubr.msk.bf16.mxu1 %vm3021_vm5, %v6408_v0  ;;  %3057 = vmatprep.mubr.bf16.mxu0 %v6410_v1  ;;  %v2895_v7 = vld [vmem:[#allocation3 + $0x28] sm:$0xff]  ;;  %v2894_v9 = vld [vmem:[#allocation3 + $0x20] sm:$0xff]  ;;  %v2892_v48 = vld [vmem:[#allocation3 + $0x10] sm:$0xff]  ;;  %v4637_v55 = vmov 3  }
 0x3c3   :  { %4389 = vset.pattern.permute.xlu1 %v4635_v3  ;;  %3066 = vmatprep.subr.bf16.mxu1 %v2955_v4  ;;  %v2959_v8 = vld [vmem:[#allocation3 + $0x228] sm:$0xff]  ;;  %v2958_v10 = vld [vmem:[#allocation3 + $0x220] sm:$0xff]  ;;  %v2897_v59 = vld [vmem:[#allocation3 + $0x38] sm:$0xff] }
 0x3c4   :  { %3026 = vmatpush1.bf16.msra.mxu0 %v2890_v5  ;;  %3067 = vmatpush1.bf16.msra.mxu1 %v2954_v6  ;;  %v2899_v11 = vld [vmem:[#allocation3 + $0x48] sm:$0xff]  ;;  %v2898_v13 = vld [vmem:[#allocation3 + $0x40] sm:$0xff]  ;;  %v2896_v51 = vld [vmem:[#allocation3 + $0x30] sm:$0xff] }
 0x3c5   :  { %3027 = vmatprep.subr.bf16.mxu0 %v2895_v7  ;;  %3068 = vmatprep.subr.bf16.mxu1 %v2959_v8  ;;  %v2963_v12 = vld [vmem:[#allocation3 + $0x248] sm:$0xff]  ;;  %v2962_v14 = vld [vmem:[#allocation3 + $0x240] sm:$0xff]  ;;  %v2901_v41 = vld [vmem:[#allocation3 + $0x58] sm:$0xff] }
 0x3c6   :  { %v2903_v15 = vld [vmem:[#allocation3 + $0x68] sm:$0xff]  ;;  %v2902_v17 = vld [vmem:[#allocation3 + $0x60] sm:$0xff]  ;;  %v2900_v57 = vld [vmem:[#allocation3 + $0x50] sm:$0xff] }
 0x3c7   :  { %v2967_v16 = vld [vmem:[#allocation3 + $0x268] sm:$0xff]  ;;  %v2966_v18 = vld [vmem:[#allocation3 + $0x260] sm:$0xff]  ;;  %v2905_v45 = vld [vmem:[#allocation3 + $0x78] sm:$0xff] }
 0x3c8   :  { %3028 = vmatpush1.bf16.msra.mxu0 %v2894_v9  ;;  %3069 = vmatpush1.bf16.msra.mxu1 %v2958_v10  ;;  %v2907_v19 = vld [vmem:[#allocation3 + $0x88] sm:$0xff]  ;;  %v2906_v21 = vld [vmem:[#allocation3 + $0x80] sm:$0xff]  ;;  %v2904_v3 = vld [vmem:[#allocation3 + $0x70] sm:$0xff] }
 0x3c9   :  { %3029 = vmatprep.subr.bf16.mxu0 %v2899_v11  ;;  %3070 = vmatprep.subr.bf16.mxu1 %v2963_v12  ;;  %v2971_v20 = vld [vmem:[#allocation3 + $0x288] sm:$0xff]  ;;  %v2970_v22 = vld [vmem:[#allocation3 + $0x280] sm:$0xff]  ;;  %v2909_v4 = vld [vmem:[#allocation3 + $0x98] sm:$0xff] }
 0x3ca   :  { %v2911_v23 = vld [vmem:[#allocation3 + $0xa8] sm:$0xff]  ;;  %v2910_v24 = vld [vmem:[#allocation3 + $0xa0] sm:$0xff]  ;;  %v2908_v6 = vld [vmem:[#allocation3 + $0x90] sm:$0xff] }
 0x3cb   :  { %v2975_v50 = vld [vmem:[#allocation3 + $0x2a8] sm:$0xff]  ;;  %v2974_v25 = vld [vmem:[#allocation3 + $0x2a0] sm:$0xff]  ;;  %v2913_v8 = vld [vmem:[#allocation3 + $0xb8] sm:$0xff] }
 0x3cc   :  { %3030 = vmatpush1.bf16.msra.mxu0 %v2898_v13  ;;  %3071 = vmatpush1.bf16.msra.mxu1 %v2962_v14  ;;  %v2915_v26 = vld [vmem:[#allocation3 + $0xc8] sm:$0xff]  ;;  %v2914_v28 = vld [vmem:[#allocation3 + $0xc0] sm:$0xff]  ;;  %v2912_v10 = vld [vmem:[#allocation3 + $0xb0] sm:$0xff] }
 0x3cd   :  { %3031 = vmatprep.subr.bf16.mxu0 %v2903_v15  ;;  %3072 = vmatprep.subr.bf16.mxu1 %v2967_v16  ;;  %v2979_v27 = vld [vmem:[#allocation3 + $0x2c8] sm:$0xff]  ;;  %v2978_v29 = vld [vmem:[#allocation3 + $0x2c0] sm:$0xff]  ;;  %v2917_v12 = vld [vmem:[#allocation3 + $0xd8] sm:$0xff] }
 0x3ce   :  { %v2919_v30 = vld [vmem:[#allocation3 + $0xe8] sm:$0xff]  ;;  %v2918_v32 = vld [vmem:[#allocation3 + $0xe0] sm:$0xff]  ;;  %v2916_v14 = vld [vmem:[#allocation3 + $0xd0] sm:$0xff] }
 0x3cf   :  { %v2983_v31 = vld [vmem:[#allocation3 + $0x2e8] sm:$0xff]  ;;  %v2982_v33 = vld [vmem:[#allocation3 + $0x2e0] sm:$0xff]  ;;  %v2921_v15 = vld [vmem:[#allocation3 + $0xf8] sm:$0xff] }
 0x3d0   :  { %3032 = vmatpush1.bf16.msra.mxu0 %v2902_v17  ;;  %3073 = vmatpush1.bf16.msra.mxu1 %v2966_v18  ;;  %v2923_v34 = vld [vmem:[#allocation3 + $0x108] sm:$0xff]  ;;  %v2922_v49 = vld [vmem:[#allocation3 + $0x100] sm:$0xff]  ;;  %v2957_v16 = vld [vmem:[#allocation3 + $0x218] sm:$0xff]  ;;  %v6429_v17 = vpack.c.bf16 %v2877_v43, %v2877_v43 }
 0x3d1   :  { %3033 = vmatprep.subr.bf16.mxu0 %v2907_v19  ;;  %3074 = vmatprep.subr.bf16.mxu1 %v2971_v20  ;;  %v2987_v35 = vld [vmem:[#allocation3 + $0x308] sm:$0xff]  ;;  %v2986_v56 = vld [vmem:[#allocation3 + $0x300] sm:$0xff]  ;;  %v2920_v18 = vld [vmem:[#allocation3 + $0xf0] sm:$0xff] }
 0x3d2   :  { %v2927_v36 = vld [vmem:[#allocation3 + $0x128] sm:$0xff]  ;;  %v2885_v62 = vld [vmem:[%s6709_s21] sm:$0x3]  ;;  %v2956_v19 = vld [vmem:[#allocation3 + $0x210] sm:$0xff] }
 0x3d3   :  { %v2926_v60 = vld [vmem:[#allocation3 + $0x120] sm:$0xff]  ;;  %v2931_v53 = vld [vmem:[#allocation3 + $0x148] sm:$0xff]  ;;  %2993 = vperm.xlu0 %4387, %v2885_v62   ;;  %3227 = vperm.xlu1 %4389, %v2885_v62   ;;  %v2925_v20 = vld [vmem:[#allocation3 + $0x118] sm:$0xff] }
 0x3d4   :  { %3034 = vmatpush1.bf16.msra.mxu0 %v2906_v21  ;;  %3075 = vmatpush1.bf16.msra.mxu1 %v2970_v22  ;;  %v2930_v54 = vld [vmem:[#allocation3 + $0x140] sm:$0xff]  ;;  %v2935_v40 = vld [vmem:[#allocation3 + $0x168] sm:$0xff]  ;;  %v2961_v21 = vld [vmem:[#allocation3 + $0x238] sm:$0xff] }
 0x3d5   :  { %3035 = vmatprep.subr.bf16.mxu0 %v2911_v23  ;;  %3076 = vmatprep.subr.bf16.mxu1 %v2975_v50  ;;  %v2934_v63 = vld [vmem:[#allocation3 + $0x160] sm:$0xff]  ;;  %v2939_v52 = vld [vmem:[#allocation3 + $0x188] sm:$0xff]  ;;  %v2924_v22 = vld [vmem:[#allocation3 + $0x110] sm:$0xff] }
 0x3d6   :  { %v2943_v47 = vld [vmem:[#allocation3 + $0x1a8] sm:$0xff]  ;;  %v2942_v5 = vld [vmem:[#allocation3 + $0x1a0] sm:$0xff]  ;;  %v2960_v23 = vld [vmem:[#allocation3 + $0x230] sm:$0xff] }
 0x3d7   :  { %4388 = vset.pattern.permute.xlu0 %v4636_v42  ;;  %4390 = vset.pattern.permute.xlu1 %v4637_v55  ;;  %v2947_v7 = vld [vmem:[#allocation3 + $0x1c8] sm:$0xff]  ;;  %v2946_v9 = vld [vmem:[#allocation3 + $0x1c0] sm:$0xff]  ;;  %v2929_v61 = vld [vmem:[#allocation3 + $0x138] sm:$0xff] }
 0x3d8   :  { %3036 = vmatpush1.bf16.msra.mxu0 %v2910_v24  ;;  %3077 = vmatpush1.bf16.msra.mxu1 %v2974_v25  ;;  %v2951_v11 = vld [vmem:[#allocation3 + $0x1e8] sm:$0xff]  ;;  %v2950_v13 = vld [vmem:[#allocation3 + $0x1e0] sm:$0xff]  ;;  %v2965_v50 = vld [vmem:[#allocation3 + $0x258] sm:$0xff] }
 0x3d9   :  { %3037 = vmatprep.subr.bf16.mxu0 %v2915_v26  ;;  %3078 = vmatprep.subr.bf16.mxu1 %v2979_v27  ;;  %v2928_v43 = vld [vmem:[#allocation3 + $0x130] sm:$0xff]  ;;  %v2933_v25 = vld [vmem:[#allocation3 + $0x158] sm:$0xff] }
 0x3da   :  { %3192 = vperm.xlu0 %4388, %v2885_v62   ;;  %3262 = vperm.xlu1 %4390, %v2885_v62   ;;  %v2964_v24 = vld [vmem:[#allocation3 + $0x250] sm:$0xff]  ;;  %v2969_v26 = vld [vmem:[#allocation3 + $0x278] sm:$0xff] }
 0x3db   :  { %v2932_v27 = vld [vmem:[#allocation3 + $0x150] sm:$0xff]  ;;  %v2949_v62 = vld [vmem:[#allocation3 + $0x1d8] sm:$0xff] }
 0x3dc   :  { %3038 = vmatpush1.bf16.msra.mxu0 %v2914_v28  ;;  %3079 = vmatpush1.bf16.msra.mxu1 %v2978_v29  ;;  %v2968_v28 = vld [vmem:[#allocation3 + $0x270] sm:$0xff]  ;;  %v2937_v29 = vld [vmem:[#allocation3 + $0x178] sm:$0xff] }
 0x3dd   :  { %3039 = vmatprep.subr.bf16.mxu0 %v2919_v30  ;;  %3080 = vmatprep.subr.bf16.mxu1 %v2983_v31  ;;  %v2973_v30 = vld [vmem:[#allocation3 + $0x298] sm:$0xff]  ;;  %v2972_v31 = vld [vmem:[#allocation3 + $0x290] sm:$0xff] }
 0x3de   :  { %4391 = vset.pattern.permute.xlu0 %v4637_v55 }
 0x3e0   :  { %3040 = vmatpush1.bf16.msra.mxu0 %v2918_v32  ;;  %3081 = vmatpush1.bf16.msra.mxu1 %v2982_v33  ;;  %v2941_v32 = vld [vmem:[#allocation3 + $0x198] sm:$0xff] }
 0x3e1   :  { %3041 = vmatprep.subr.bf16.mxu0 %v2923_v34  ;;  %3082 = vmatprep.subr.bf16.mxu1 %v2987_v35  ;;  %v2977_v33 = vld [vmem:[#allocation3 + $0x2b8] sm:$0xff]  ;;  %v2940_v34 = vld [vmem:[#allocation3 + $0x190] sm:$0xff] }
 0x3e2   :  { %v2976_v35 = vld [vmem:[#allocation3 + $0x2b0] sm:$0xff] }
 0x3e4   :  { %3042 = vmatpush1.bf16.msra.mxu0 %v2922_v49  ;;  %3083 = vmatpush1.bf16.msra.mxu1 %v2986_v56  ;;  %v2945_v49 = vld [vmem:[#allocation3 + $0x1b8] sm:$0xff] }
 0x3e5   :  { %3043 = vmatprep.subr.bf16.mxu0 %v2927_v36  ;;  %3107 = vmatprep.subr.bf16.mxu1 %v2893_v37  ;;  %v2981_v56 = vld [vmem:[#allocation3 + $0x2d8] sm:$0xff]  ;;  %v2944_v36 = vld [vmem:[#allocation3 + $0x1b0] sm:$0xff] }
 0x3e6   :  { %v2980_v37 = vld [vmem:[#allocation3 + $0x2d0] sm:$0xff] }
 0x3e7   :  { %3099 = vmatmul.mubr.bf16.vlgmr.msra.gmra.mrb[12].mxu1 %v6419_v39 }
 0x3e8   :  { %3044 = vmatpush1.bf16.msra.mxu0 %v2926_v60  ;;  %3108 = vmatpush1.bf16.msra.mxu1 %v2892_v48  ;;  %v2985_v60 = vld [vmem:[#allocation3 + $0x2f8] sm:$0xff]  ;;  %v2948_v48 = vld [vmem:[#allocation3 + $0x1d0] sm:$0xff] }
 0x3e9   :  { %3045 = vmatprep.subr.bf16.mxu0 %v2931_v53  ;;  %3109 = vmatprep.subr.bf16.mxu1 %v2897_v59  ;;  %v2984_v53 = vld [vmem:[#allocation3 + $0x2f0] sm:$0xff]  ;;  %v2953_v59 = vld [vmem:[#allocation3 + $0x1f8] sm:$0xff] }
 0x3ea   :  { %3139 = vmatprep.mubr.bf16.mxu1 %v6410_v1  ;;  %v2938_v1 = vld [vmem:[#allocation3 + $0x180] sm:$0xff] }
 0x3ec   :  { %3046 = vmatpush1.bf16.msra.mxu0 %v2930_v54  ;;  %3110 = vmatpush1.bf16.msra.mxu1 %v2896_v51  ;;  %v2989_v54 = vld [vmem:[#allocation3 + $0x318] sm:$0xff]  ;;  %v2952_v51 = vld [vmem:[#allocation3 + $0x1f0] sm:$0xff] }
 0x3ed   :  { %3047 = vmatprep.subr.bf16.mxu0 %v2935_v40  ;;  %3111 = vmatprep.subr.bf16.mxu1 %v2901_v41  ;;  %v2988_v40 = vld [vmem:[#allocation3 + $0x310] sm:$0xff] }
 0x3f0   :  { %3048 = vmatpush1.bf16.msra.mxu0 %v2934_v63  ;;  %3112 = vmatpush1.bf16.msra.mxu1 %v2900_v57  ;;  %v2990_v57 = vld [vmem:[#allocation9] ss:$4 sm:$0xf] }
 0x3f1   :  { %3049 = vmatprep.subr.bf16.mxu0 %v2939_v52  ;;  %3113 = vmatprep.subr.bf16.mxu1 %v2905_v45  ;;  %v3000_v45 = vrot.slane %v2990_v57, %v6159_v58 }
 0x3f4   :  { %3050 = vmatpush1.bf16.msra.mxu0 %v2938_v1  ;;  %3114 = vmatpush1.bf16.msra.mxu1 %v2904_v3  ;;  %v3004_v1 = vrot.slane %v2990_v57, %v6707_v38  ;;  %v3190_v3 = vld [vmem:[#allocation9 + $0x1] ss:$4 sm:$0xf] }
 0x3f5   :  { %3051 = vmatprep.subr.bf16.mxu0 %v2943_v47  ;;  %3115 = vmatprep.subr.bf16.mxu1 %v2909_v4  ;;  %v6438_v47 = vld [vmem:[#allocation9 + $0x2] ss:$4 sm:$0xf] }
 0x3f8   :  { %3052 = vmatpush1.bf16.msra.mxu0 %v2942_v5  ;;  %3116 = vmatpush1.bf16.msra.mxu1 %v2908_v6  ;;  %v3199_v6 = vrot.slane %v3190_v3, %v6159_v58 }
 0x3f9   :  { %3053 = vmatprep.subr.bf16.mxu0 %v2947_v7  ;;  %3117 = vmatprep.subr.bf16.mxu1 %v2913_v8 }
 0x3fc   :  { %3054 = vmatpush1.bf16.msra.mxu0 %v2946_v9  ;;  %3118 = vmatpush1.bf16.msra.mxu1 %v2912_v10  ;;  %v3260_v9 = vld [vmem:[#allocation9 + $0x3] ss:$4 sm:$0xf]  ;;  %v3234_v10 = vrot.slane %v6438_v47, %v6159_v58 }
 0x3fd   :  { %3055 = vmatprep.subr.bf16.mxu0 %v2951_v11  ;;  %3119 = vmatprep.subr.bf16.mxu1 %v2917_v12  ;;  %v3238_v12 = vrot.slane %v6438_v47, %v6707_v38 }
 0x400   :  { %3056 = vmatpush1.bf16.msra.mxu0 %v2950_v13  ;;  %3120 = vmatpush1.bf16.msra.mxu1 %v2916_v14 }
 0x401   :  { %3121 = vmatprep.subr.bf16.mxu1 %v2921_v15  ;;  %3148 = vmatprep.subr.bf16.mxu0 %v2957_v16  ;;  %v3269_v16 = vrot.slane %v3260_v9, %v6159_v58 }
 0x403   :  { %3058 = vmatmul.mubr.bf16.vlgmr.msra.gmra.mrb[8].mxu0 %v6429_v17 }
 0x404   :  { %3122 = vmatpush1.bf16.msra.mxu1 %v2920_v18  ;;  %3149 = vmatpush1.bf16.msra.mxu0 %v2956_v19 }
 0x405   :  { %3123 = vmatprep.subr.bf16.mxu1 %v2925_v20  ;;  %3150 = vmatprep.subr.bf16.mxu0 %v2961_v21  ;;  %v3273_v20 = vrot.slane %v3260_v9, %v6707_v38 }
 0x406   :  { %4118 = vmatprep.mubr.msk.bf16.mxu0 %vm3021_vm5, %v6408_v0  ;;  %v2936_v0 = vld [vmem:[#allocation3 + $0x170] sm:$0xff] }
 0x408   :  { %3124 = vmatpush1.bf16.msra.mxu1 %v2924_v22  ;;  %3151 = vmatpush1.bf16.msra.mxu0 %v2960_v23 }
 0x409   :  { %3125 = vmatprep.subr.bf16.mxu1 %v2929_v61  ;;  %3152 = vmatprep.subr.bf16.mxu0 %v2965_v50 }
 0x40c   :  { %3126 = vmatpush1.bf16.msra.mxu1 %v2928_v43  ;;  %3153 = vmatpush1.bf16.msra.mxu0 %v2964_v24  ;;  %v3294_v24 = vld [vmem:[#allocation12] sm:$0xf] }
 0x40d   :  { %3127 = vmatprep.subr.bf16.mxu1 %v2933_v25  ;;  %3154 = vmatprep.subr.bf16.mxu0 %v2969_v26 }
 0x410   :  { %3128 = vmatpush1.bf16.msra.mxu1 %v2932_v27  ;;  %3155 = vmatpush1.bf16.msra.mxu0 %v2968_v28 }
 0x411   :  { %3129 = vmatprep.subr.bf16.mxu1 %v2937_v29  ;;  %3156 = vmatprep.subr.bf16.mxu0 %v2973_v30  ;;  %v3299_v29 = vrot.slane %v3294_v24, %v6159_v58 }
 0x414   :  { %3130 = vmatpush1.bf16.msra.mxu1 %v2936_v0  ;;  %3157 = vmatpush1.bf16.msra.mxu0 %v2972_v31  ;;  %v3303_v0 = vrot.slane %v3294_v24, %v6707_v38 }
 0x415   :  { %3131 = vmatprep.subr.bf16.mxu1 %v2941_v32  ;;  %3158 = vmatprep.subr.bf16.mxu0 %v2977_v33 }
 0x418   :  { %3132 = vmatpush1.bf16.msra.mxu1 %v2940_v34  ;;  %3159 = vmatpush1.bf16.msra.mxu0 %v2976_v35 }
 0x419   :  { %3133 = vmatprep.subr.bf16.mxu1 %v2945_v49  ;;  %3160 = vmatprep.subr.bf16.mxu0 %v2981_v56 }
 0x41c   :  { %3134 = vmatpush1.bf16.msra.mxu1 %v2944_v36  ;;  %3161 = vmatpush1.bf16.msra.mxu0 %v2980_v37  ;;  %v3008_v36 = vrot.slane %v2990_v57, %v6173_v44  ;;  %v3012_v37 = vrot.slane %v2990_v57, %v6176_v46  ;;  %v3246_v57 = vrot.slane %v6438_v47, %v6176_v46 }
 0x41d   :  { %3135 = vmatprep.subr.bf16.mxu1 %v2949_v62  ;;  %3162 = vmatprep.subr.bf16.mxu0 %v2985_v60  ;;  %v3207_v62 = vrot.slane %v3190_v3, %v6173_v44 }
 0x420   :  { %3136 = vmatpush1.bf16.msra.mxu1 %v2948_v48  ;;  %3163 = vmatpush1.bf16.msra.mxu0 %v2984_v53  ;;  %v3211_v48 = vrot.slane %v3190_v3, %v6176_v46 }
 0x421   :  { %3137 = vmatprep.subr.bf16.mxu1 %v2953_v59  ;;  %3164 = vmatprep.subr.bf16.mxu0 %v2989_v54 }
 0x424   :  { %3138 = vmatpush1.bf16.msra.mxu1 %v2952_v51  ;;  %3165 = vmatpush1.bf16.msra.mxu0 %v2988_v40  ;;  %v3242_v51 = vrot.slane %v6438_v47, %v6173_v44  ;;  %v3307_v47 = vrot.slane %v3294_v24, %v6173_v44 }
 0x427   :  { %3140 = vmatmul.mubr.bf16.vlgmr.msra.gmra.mrb[16].mxu1 %v6429_v17  ;;  %3181 = vmatmul.mubr.bf16.vlgmr.msra.gmra.mrb[12].mxu0 %v6419_v39  ;;  %v3203_v39 = vrot.slane %v3190_v3, %v6707_v38 }
 0x452   :  { %v2994_v52 = vpop.permute.xlu0 %2993  ;;  %v6440_v4 = vpop.permute.xlu1 %3227 }
 0x453   :  { %v3017_v5 = vmul.f32 %v3000_v45, %v2994_v52  ;;  %v3018_v7 = vmul.f32 %v3004_v1, %v2994_v52  ;;  %v3251_v23 = vmul.f32 %v3234_v10, %v6440_v4  ;;  %v3252_v43 = vmul.f32 %v3238_v12, %v6440_v4 }
 0x454   :  { %v3019_v60 = vmul.f32 %v3008_v36, %v2994_v52  ;;  %v3020_v53 = vmul.f32 %v3012_v37, %v2994_v52  ;;  %v3281_v1 = vrot.slane %v3260_v9, %v6176_v46 }
 0x459   :  { %v3193_v8 = vpop.permute.xlu0 %3192  ;;  %v3263_v21 = vpop.permute.xlu1 %3262 }
 0x45a   :  { %v3216_v15 = vmul.f32 %v3199_v6, %v3193_v8  ;;  %v3217_v19 = vmul.f32 %v3203_v39, %v3193_v8  ;;  %v3286_v26 = vmul.f32 %v3269_v16, %v3263_v21  ;;  %v3287_v28 = vmul.f32 %v3273_v20, %v3263_v21 }
 0x45b   :  { %v3218_v40 = vmul.f32 %v3207_v62, %v3193_v8  ;;  %v3219_v45 = vmul.f32 %v3211_v48, %v3193_v8 }
 0x4ba   :  { %v3100_v41 = vpop.f32.mrb[12].mxu1 }
 0x4bb   :  { %v3102_v42 = vpop.f32.mrb[13].mxu1 }
 0x4bc   :  { %v3104_v55 = vpop.f32.mrb[14].mxu1 }
 0x4bd   :  { %v3105_v63 = vpop.f32.mrb[15].mxu1 }
 0x4d6   :  { %v3059_v11 = vpop.f32.mrb[8].mxu0 }
 0x4d7   :  { %v3060_v13 = vadd.f32 %v3059_v11, %v3017_v5  ;;  %v3061_v14 = vpop.f32.mrb[9].mxu0  ;;  %v3253_v11 = vmul.f32 %v3242_v51, %v6440_v4 }
 0x4d8   :  { %v3062_v17 = vadd.f32 %v3061_v14, %v3018_v7  ;;  %v3063_v18 = vpop.f32.mrb[10].mxu0  ;;  %v3254_v14 = vmul.f32 %v3246_v57, %v6440_v4 }
 0x4d9   :  { %v3101_v22 = vadd.f32 %v3100_v41, %v3060_v13  ;;  %v3064_v61 = vpop.f32.mrb[11].mxu0  ;;  %v3277_v41 = vrot.slane %v3260_v9, %v6173_v44  ;;  %v3311_v9 = vrot.slane %v3294_v24, %v6176_v46 }
 0x4da   :  { %v3103_v50 = vadd.f32 %v3102_v42, %v3062_v17 }
 0x4db   :  { %v3220_v25 = vadd.f32 %v3216_v15, %v3101_v22  ;;  %v3288_v12 = vmul.f32 %v3277_v41, %v3263_v21  ;;  %v3289_v15 = vmul.f32 %v3281_v1, %v3263_v21 }
 0x4dc   :  { %v3221_v27 = vadd.f32 %v3217_v19, %v3103_v50 }
 0x4dd   :  { %v3255_v30 = vadd.f32 %v3251_v23, %v3220_v25 }
 0x4de   :  { %v3256_v31 = vadd.f32 %v3252_v43, %v3221_v27 }
 0x4df   :  { %v3290_v32 = vadd.f32 %v3286_v26, %v3255_v30 }
 0x4e0   :  { %v3291_v33 = vadd.f32 %v3287_v28, %v3256_v31 }
 0x4e1   :  { %v6454_v34 = vadd.f32 %v3299_v29, %v3290_v32 }
 0x4e2   :  { %v3317_v35 = vadd.f32 %v3303_v0, %v3291_v33 }
 0x4e3   :  { %v3320_v49 = vmax.f32 %v6454_v34, 0.0 }
 0x4e4   :  { %v3321_v56 = vmax.f32 %v3317_v35, 0.0 }
 0x4fa   :  { %v3141_v59 = vpop.f32.mrb[16].mxu1  ;;  %v3182_v54 = vpop.f32.mrb[12].mxu0 }
 0x4fb   :  { %v3142_v42 = vadd.f32 %v3141_v59, %v3019_v60  ;;  %v3143_v55 = vpop.f32.mrb[17].mxu1  ;;  %v3184_v63 = vpop.f32.mrb[13].mxu0 }
 0x4fc   :  { %v3144_v5 = vadd.f32 %v3143_v55, %v3020_v53  ;;  %v3145_v3 = vpop.f32.mrb[18].mxu1  ;;  %v3186_v52 = vpop.f32.mrb[14].mxu0 }
 0x4fd   :  { %v3183_v6 = vadd.f32 %v3182_v54, %v3142_v42  ;;  %v3146_v7 = vpop.f32.mrb[19].mxu1  ;;  %v3187_v39 = vpop.f32.mrb[15].mxu0 }
 0x4fe   :  { %v3185_v10 = vadd.f32 %v3184_v63, %v3144_v5 }
 0x4ff   :  { %v3222_v13 = vadd.f32 %v3218_v40, %v3183_v6 }
 0x500   :  { %v3223_v16 = vadd.f32 %v3219_v45, %v3185_v10 }
 0x501   :  { %v3257_v17 = vadd.f32 %v3253_v11, %v3222_v13 }
 0x502   :  { %v3258_v8 = vadd.f32 %v3254_v14, %v3223_v16 }
 0x503   :  { %v3292_v18 = vadd.f32 %v3288_v12, %v3257_v17 }
 0x504   :  { %v3293_v19 = vadd.f32 %v3289_v15, %v3258_v8 }
 0x505   :  { %v6471_v20 = vadd.f32 %v3307_v47, %v3292_v18 }
 0x506   :  { %v6473_v22 = vadd.f32 %v3311_v9, %v3293_v19 }
 0x507   :  { %v3322_v23 = vmax.f32 %v6471_v20, 0.0 }
 0x508   :  { %v3323_v61 = vmax.f32 %v6473_v22, 0.0 }
 0x509   :  { %4602 = dma.done.wait [#allocation8 + $0x2], 8192 }
 0x50a   :  { %4603 = vsyncadd [#allocation8 + $0x2], 4294959104  ;;  %v3394_v4 = vpack.c.bf16 %v3321_v56, %v3321_v56  ;;  %v3329_v21 = vld [vmem:[#allocation4 + $0x8] sm:$0xff]  ;;  %v3328_v50 = vld [vmem:[#allocation4] sm:$0xff]  ;;  %v3393_v5 = vpack.c.bf16 %v3320_v49, %v3320_v49  ;;  %v3396_v3 = vpack.c.bf16 %v3323_v61, %v3323_v61 }
 0x50b   :  { %v3331_v43 = vld [vmem:[#allocation4 + $0x18] sm:$0xff]  ;;  %3408 = vmatprep.subr.bf16.mxu0 %v3329_v21  ;;  %v3330_v24 = vld [vmem:[#allocation4 + $0x10] sm:$0xff]  ;;  %v3333_v25 = vld [vmem:[#allocation4 + $0x28] sm:$0xff] }
 0x50c   :  { %3440 = vmatprep.mubr.bf16.mxu0 %v3394_v4  ;;  %3409 = vmatpush1.bf16.msra.mxu0 %v3328_v50  ;;  %v3332_v26 = vld [vmem:[#allocation4 + $0x20] sm:$0xff]  ;;  %v3335_v27 = vld [vmem:[#allocation4 + $0x38] sm:$0xff]  ;;  %v3334_v28 = vld [vmem:[#allocation4 + $0x30] sm:$0xff] }
 0x50d   :  { %3410 = vmatprep.subr.bf16.mxu0 %v3331_v43  ;;  %v3337_v29 = vld [vmem:[#allocation4 + $0x48] sm:$0xff]  ;;  %v3336_v30 = vld [vmem:[#allocation4 + $0x40] sm:$0xff]  ;;  %v3339_v0 = vld [vmem:[#allocation4 + $0x58] sm:$0xff] }
 0x50e   :  { %v3338_v31 = vld [vmem:[#allocation4 + $0x50] sm:$0xff]  ;;  %v3341_v32 = vld [vmem:[#allocation4 + $0x68] sm:$0xff]  ;;  %v3340_v33 = vld [vmem:[#allocation4 + $0x60] sm:$0xff] }
 0x50f   :  { %v3343_v35 = vld [vmem:[#allocation4 + $0x78] sm:$0xff]  ;;  %v3342_v56 = vld [vmem:[#allocation4 + $0x70] sm:$0xff]  ;;  %v3345_v36 = vld [vmem:[#allocation4 + $0x88] sm:$0xff] }
 0x510   :  { %3411 = vmatpush1.bf16.msra.mxu0 %v3330_v24  ;;  %v3344_v37 = vld [vmem:[#allocation4 + $0x80] sm:$0xff]  ;;  %v3347_v62 = vld [vmem:[#allocation4 + $0x98] sm:$0xff]  ;;  %v3346_v60 = vld [vmem:[#allocation4 + $0x90] sm:$0xff] }
 0x511   :  { %3412 = vmatprep.subr.bf16.mxu0 %v3333_v25  ;;  %v3349_v48 = vld [vmem:[#allocation4 + $0xa8] sm:$0xff]  ;;  %v3348_v53 = vld [vmem:[#allocation4 + $0xa0] sm:$0xff]  ;;  %v3351_v59 = vld [vmem:[#allocation4 + $0xb8] sm:$0xff] }
 0x512   :  { %v3350_v54 = vld [vmem:[#allocation4 + $0xb0] sm:$0xff]  ;;  %v3353_v51 = vld [vmem:[#allocation4 + $0xc8] sm:$0xff]  ;;  %v3352_v40 = vld [vmem:[#allocation4 + $0xc0] sm:$0xff] }
 0x513   :  { %v3355_v41 = vld [vmem:[#allocation4 + $0xd8] sm:$0xff]  ;;  %v3354_v42 = vld [vmem:[#allocation4 + $0xd0] sm:$0xff]  ;;  %v3357_v55 = vld [vmem:[#allocation4 + $0xe8] sm:$0xff] }
 0x514   :  { %3413 = vmatpush1.bf16.msra.mxu0 %v3332_v26  ;;  %v3356_v63 = vld [vmem:[#allocation4 + $0xe0] sm:$0xff]  ;;  %v3359_v57 = vld [vmem:[#allocation4 + $0xf8] sm:$0xff]  ;;  %v3358_v45 = vld [vmem:[#allocation4 + $0xf0] sm:$0xff] }
 0x515   :  { %3414 = vmatprep.subr.bf16.mxu0 %v3335_v27  ;;  %v3361_v1 = vld [vmem:[#allocation4 + $0x108] sm:$0xff]  ;;  %v3360_v52 = vld [vmem:[#allocation4 + $0x100] sm:$0xff]  ;;  %v3363_v6 = vld [vmem:[#allocation4 + $0x118] sm:$0xff] }
 0x516   :  { %v3362_v7 = vld [vmem:[#allocation4 + $0x110] sm:$0xff]  ;;  %v3365_v39 = vld [vmem:[#allocation4 + $0x128] sm:$0xff]  ;;  %v3364_v10 = vld [vmem:[#allocation4 + $0x120] sm:$0xff] }
 0x517   :  { %v3367_v34 = vld [vmem:[#allocation4 + $0x138] sm:$0xff]  ;;  %v3366_v49 = vld [vmem:[#allocation4 + $0x130] sm:$0xff]  ;;  %v3369_v11 = vld [vmem:[#allocation4 + $0x148] sm:$0xff] }
 0x518   :  { %3415 = vmatpush1.bf16.msra.mxu0 %v3334_v28  ;;  %v3368_v12 = vld [vmem:[#allocation4 + $0x140] sm:$0xff]  ;;  %v3371_v13 = vld [vmem:[#allocation4 + $0x158] sm:$0xff]  ;;  %v3370_v14 = vld [vmem:[#allocation4 + $0x150] sm:$0xff] }
 0x519   :  { %3416 = vmatprep.subr.bf16.mxu0 %v3337_v29  ;;  %v3373_v15 = vld [vmem:[#allocation4 + $0x168] sm:$0xff]  ;;  %v3372_v16 = vld [vmem:[#allocation4 + $0x160] sm:$0xff]  ;;  %v3375_v17 = vld [vmem:[#allocation4 + $0x178] sm:$0xff] }
 0x51a   :  { %v3374_v47 = vld [vmem:[#allocation4 + $0x170] sm:$0xff]  ;;  %v3377_v8 = vld [vmem:[#allocation4 + $0x188] sm:$0xff]  ;;  %v3376_v9 = vld [vmem:[#allocation4 + $0x180] sm:$0xff] }
 0x51b   :  { %v3379_v18 = vld [vmem:[#allocation4 + $0x198] sm:$0xff]  ;;  %v3378_v19 = vld [vmem:[#allocation4 + $0x190] sm:$0xff]  ;;  %v3381_v22 = vld [vmem:[#allocation4 + $0x1a8] sm:$0xff] }
 0x51c   :  { %3417 = vmatpush1.bf16.msra.mxu0 %v3336_v30  ;;  %v3380_v61 = vld [vmem:[#allocation4 + $0x1a0] sm:$0xff]  ;;  %v3383_v4 = vld [vmem:[#allocation4 + $0x1b8] sm:$0xff]  ;;  %v3382_v21 = vld [vmem:[#allocation4 + $0x1b0] sm:$0xff]  ;;  %v3395_v30 = vpack.c.bf16 %v3322_v23, %v3322_v23 }
 0x51d   :  { %3418 = vmatprep.subr.bf16.mxu0 %v3339_v0  ;;  %v3385_v50 = vld [vmem:[#allocation4 + $0x1c8] sm:$0xff]  ;;  %v3384_v43 = vld [vmem:[#allocation4 + $0x1c0] sm:$0xff]  ;;  %v3387_v24 = vld [vmem:[#allocation4 + $0x1d8] sm:$0xff] }
 0x51e   :  { %v3386_v25 = vld [vmem:[#allocation4 + $0x1d0] sm:$0xff]  ;;  %v3389_v26 = vld [vmem:[#allocation4 + $0x1e8] sm:$0xff]  ;;  %v3388_v27 = vld [vmem:[#allocation4 + $0x1e0] sm:$0xff] }
 0x51f   :  { %v3391_v28 = vld [vmem:[#allocation4 + $0x1f8] sm:$0xff]  ;;  %v3390_v29 = vld [vmem:[#allocation4 + $0x1f0] sm:$0xff] }
 0x520   :  { %3419 = vmatpush1.bf16.msra.mxu0 %v3338_v31  ;;  %v3392_v0 = vld [vmem:[#allocation14] sm:$0x3] }
 0x521   :  { %3420 = vmatprep.subr.bf16.mxu0 %v3341_v32  ;;  %v3401_v31 = vrot.slane %v3392_v0, %v6159_v58  ;;  %v3405_v32 = vrot.slane %v3392_v0, %v6707_v38 }
 0x524   :  { %3421 = vmatpush1.bf16.msra.mxu0 %v3340_v33 }
 0x525   :  { %3422 = vmatprep.subr.bf16.mxu0 %v3343_v35 }
 0x528   :  { %3423 = vmatpush1.bf16.msra.mxu0 %v3342_v56 }
 0x529   :  { %3424 = vmatprep.subr.bf16.mxu0 %v3345_v36 }
 0x52c   :  { %3425 = vmatpush1.bf16.msra.mxu0 %v3344_v37 }
 0x52d   :  { %3426 = vmatprep.subr.bf16.mxu0 %v3347_v62 }
 0x530   :  { %3427 = vmatpush1.bf16.msra.mxu0 %v3346_v60 }
 0x531   :  { %3428 = vmatprep.subr.bf16.mxu0 %v3349_v48 }
 0x534   :  { %3429 = vmatpush1.bf16.msra.mxu0 %v3348_v53 }
 0x535   :  { %3430 = vmatprep.subr.bf16.mxu0 %v3351_v59 }
 0x538   :  { %3431 = vmatpush1.bf16.msra.mxu0 %v3350_v54 }
 0x539   :  { %3432 = vmatprep.subr.bf16.mxu0 %v3353_v51 }
 0x53c   :  { %3433 = vmatpush1.bf16.msra.mxu0 %v3352_v40 }
 0x53d   :  { %3434 = vmatprep.subr.bf16.mxu0 %v3355_v41 }
 0x540   :  { %3435 = vmatpush1.bf16.msra.mxu0 %v3354_v42 }
 0x541   :  { %3436 = vmatprep.subr.bf16.mxu0 %v3357_v55 }
 0x544   :  { %3437 = vmatpush1.bf16.msra.mxu0 %v3356_v63 }
 0x545   :  { %3438 = vmatprep.subr.bf16.mxu0 %v3359_v57 }
 0x548   :  { %3439 = vmatpush1.bf16.msra.mxu0 %v3358_v45 }
 0x549   :  { %3449 = vmatprep.subr.bf16.mxu0 %v3361_v1 }
 0x54b   :  { %3441 = vmatmul.mubr.bf16.vlgmr.msra.gmra.mrb[16].mxu0 %v3393_v5 }
 0x54c   :  { %3450 = vmatpush1.bf16.msra.mxu0 %v3360_v52  ;;  %3481 = vmatprep.mubr.bf16.mxu0 %v3396_v3 }
 0x54d   :  { %3451 = vmatprep.subr.bf16.mxu0 %v3363_v6 }
 0x550   :  { %3452 = vmatpush1.bf16.msra.mxu0 %v3362_v7 }
 0x551   :  { %3453 = vmatprep.subr.bf16.mxu0 %v3365_v39 }
 0x554   :  { %3454 = vmatpush1.bf16.msra.mxu0 %v3364_v10 }
 0x555   :  { %3455 = vmatprep.subr.bf16.mxu0 %v3367_v34 }
 0x558   :  { %3456 = vmatpush1.bf16.msra.mxu0 %v3366_v49 }
 0x559   :  { %3457 = vmatprep.subr.bf16.mxu0 %v3369_v11 }
 0x55c   :  { %3458 = vmatpush1.bf16.msra.mxu0 %v3368_v12 }
 0x55d   :  { %3459 = vmatprep.subr.bf16.mxu0 %v3371_v13 }
 0x560   :  { %3460 = vmatpush1.bf16.msra.mxu0 %v3370_v14 }
 0x561   :  { %3461 = vmatprep.subr.bf16.mxu0 %v3373_v15 }
 0x564   :  { %3462 = vmatpush1.bf16.msra.mxu0 %v3372_v16 }
 0x565   :  { %3463 = vmatprep.subr.bf16.mxu0 %v3375_v17 }
 0x568   :  { %3464 = vmatpush1.bf16.msra.mxu0 %v3374_v47 }
 0x569   :  { %3465 = vmatprep.subr.bf16.mxu0 %v3377_v8 }
 0x56c   :  { %3466 = vmatpush1.bf16.msra.mxu0 %v3376_v9 }
 0x56d   :  { %3467 = vmatprep.subr.bf16.mxu0 %v3379_v18 }
 0x570   :  { %3468 = vmatpush1.bf16.msra.mxu0 %v3378_v19 }
 0x571   :  { %3469 = vmatprep.subr.bf16.mxu0 %v3381_v22 }
 0x574   :  { %3470 = vmatpush1.bf16.msra.mxu0 %v3380_v61 }
 0x575   :  { %3471 = vmatprep.subr.bf16.mxu0 %v3383_v4 }
 0x578   :  { %3472 = vmatpush1.bf16.msra.mxu0 %v3382_v21 }
 0x579   :  { %3473 = vmatprep.subr.bf16.mxu0 %v3385_v50 }
 0x57c   :  { %3474 = vmatpush1.bf16.msra.mxu0 %v3384_v43 }
 0x57d   :  { %3475 = vmatprep.subr.bf16.mxu0 %v3387_v24 }
 0x580   :  { %3476 = vmatpush1.bf16.msra.mxu0 %v3386_v25 }
 0x581   :  { %3477 = vmatprep.subr.bf16.mxu0 %v3389_v26 }
 0x584   :  { %3478 = vmatpush1.bf16.msra.mxu0 %v3388_v27 }
 0x585   :  { %3479 = vmatprep.subr.bf16.mxu0 %v3391_v28 }
 0x588   :  { %3480 = vmatpush1.bf16.msra.mxu0 %v3390_v29 }
 0x58b   :  { %3482 = vmatmul.mubr.bf16.vlgmr.msra.gmra.mrb[16].mxu0 %v3395_v30 }
 0x65e   :  { %v3483_v33 = vpop.f32.mrb[16].mxu0 }
 0x65f   :  { %v4203_v35 = vadd.f32 %v3483_v33, %v3401_v31  ;;  %v3485_v56 = vpop.f32.mrb[17].mxu0 }
 0x660   :  { %v4204_v36 = vadd.f32 %v3485_v56, %v3405_v32  ;;  %v3487_v37 = vpop.f32.mrb[18].mxu0 }
 0x661   :  { %v3490_v62 = vmax.f32 %v4203_v35, 0.0  ;;  %v3488_v60 = vpop.f32.mrb[19].mxu0 }
 0x662   :  { %v3491_v48 = vmax.f32 %v4204_v36, 0.0 }
 0x663   :  { %4604 = dma.done.wait [#allocation8 + $0x3], 2048 }
 0x664   :  { %4605 = vsyncadd [#allocation8 + $0x3], 4294965248  ;;  %v3514_v20 = vpack.c.bf16 %v3491_v48, %v3491_v48  ;;  %v3504_v23 = vld [vmem:[#allocation5 + $0x40] sm:$0xff]  ;;  %v3505_v59 = vld [vmem:[#allocation5 + $0x48] sm:$0xff]  ;;  %v3513_v6 = vpack.c.bf16 %v3490_v62, %v3490_v62 }
 0x665   :  { %v3496_v53 = vld [vmem:[#allocation5] sm:$0xff]  ;;  %4127 = vmatprep.subr.bf16.mxu1 %v3504_v23  ;;  %v3497_v54 = vld [vmem:[#allocation5 + $0x8] sm:$0xff]  ;;  %v3506_v51 = vld [vmem:[#allocation5 + $0x50] sm:$0xff] }
 0x666   :  { %3553 = vmatprep.mubr.bf16.mxu1 %v3514_v20  ;;  %4128 = vmatpush3.bf16.msra.mxu1 %v3496_v53  ;;  %v3498_v40 = vld [vmem:[#allocation5 + $0x10] sm:$0xff]  ;;  %v3507_v41 = vld [vmem:[#allocation5 + $0x58] sm:$0xff]  ;;  %v3508_v55 = vld [vmem:[#allocation5 + $0x60] sm:$0xff] }
 0x667   :  { %4129 = vmatprep.subr.bf16.mxu1 %v3505_v59  ;;  %v3499_v42 = vld [vmem:[#allocation5 + $0x18] sm:$0xff]  ;;  %v3500_v63 = vld [vmem:[#allocation5 + $0x20] sm:$0xff]  ;;  %v3509_v57 = vld [vmem:[#allocation5 + $0x68] sm:$0xff] }
 0x668   :  { %v3501_v45 = vld [vmem:[#allocation5 + $0x28] sm:$0xff]  ;;  %v3510_v1 = vld [vmem:[#allocation5 + $0x70] sm:$0xff]  ;;  %v3511_v3 = vld [vmem:[#allocation5 + $0x78] sm:$0xff] }
 0x669   :  { %v3502_v5 = vld [vmem:[#allocation5 + $0x30] sm:$0xff]  ;;  %v3503_v52 = vld [vmem:[#allocation5 + $0x38] sm:$0xff] }
 0x66a   :  { %4130 = vmatpush3.bf16.msra.mxu1 %v3497_v54  ;;  %v4119_v39 = vld [vmem:[#allocation15] ss:$0 sm:$0xff] }
 0x66b   :  { %4131 = vmatprep.subr.bf16.mxu1 %v3506_v51 }
 0x66e   :  { %4132 = vmatpush3.bf16.msra.mxu1 %v3498_v40 }
 0x66f   :  { %4133 = vmatprep.subr.bf16.mxu1 %v3507_v41 }
 0x672   :  { %4134 = vmatpush3.bf16.msra.mxu1 %v3499_v42 }
 0x673   :  { %4135 = vmatprep.subr.bf16.mxu1 %v3508_v55 }
 0x676   :  { %4136 = vmatpush3.bf16.msra.mxu1 %v3500_v63 }
 0x677   :  { %4137 = vmatprep.subr.bf16.mxu1 %v3509_v57 }
 0x67a   :  { %4138 = vmatpush3.bf16.msra.mxu1 %v3501_v45 }
 0x67b   :  { %4139 = vmatprep.subr.bf16.mxu1 %v3510_v1 }
 0x67e   :  { %4140 = vmatpush3.bf16.msra.mxu1 %v3502_v5 }
 0x67f   :  { %4141 = vmatprep.subr.bf16.mxu1 %v3511_v3 }
 0x682   :  { %4142 = vmatpush3.bf16.msra.mxu1 %v3503_v52 }
 0x685   :  { %3554 = vmatmul.mubr.bf16.vlgmr.msra.gmra.mrb[20].mxu1 %v3513_v6 }
 0x758   :  { %v4143_v7 = vpop.f32.mrb[20].mxu1 }
 0x759   :  { %v4144_v10 = vpop.f32.mrb[21].mxu1 }
 0x75a   :  { %v4145_v34 = vadd.f32 %v4144_v10, %v4143_v7  ;;  %v4146_v49 = vpop.f32.mrb[22].mxu1 }
 0x75b   :  { %v4147_v11 = vpop.f32.mrb[23].mxu1 }
 0x75c   :  { %v3556_v12 = vadd.f32 %v4145_v34, %v4119_v39 }
 0x75e   :  { %v3561_v13 = vmax.f32 %v3556_v12, 0.0 }
 0x75f   :  { %4606 = dma.done.wait [#allocation8 + $0x4], 4096 }
 0x760   :  { %4607 = vsyncadd [#allocation8 + $0x4], 4294963200  ;;  %3653 = vmatprep.mubr.bf16.mxu1 %v6708_v2  ;;  %v3567_v14 = vld [vmem:[#allocation6 + $0x8] sm:$0xff]  ;;  %v3566_v15 = vld [vmem:[#allocation6] sm:$0xff]  ;;  %v3599_v26 = vpack.c.bf16 %v3561_v13, %v3561_v13 }
 0x761   :  { %v3571_v16 = vld [vmem:[#allocation6 + $0x28] sm:$0xff]  ;;  %3621 = vmatprep.subr.bf16.mxu1 %v3567_v14  ;;  %v3570_v17 = vld [vmem:[#allocation6 + $0x20] sm:$0xff]  ;;  %v3569_v25 = vld [vmem:[#allocation6 + $0x18] sm:$0xff] }
 0x762   :  { %3622 = vmatpush1.bf16.msra.mxu1 %v3566_v15  ;;  %v3575_v47 = vld [vmem:[#allocation6 + $0x48] sm:$0xff]  ;;  %v3574_v8 = vld [vmem:[#allocation6 + $0x40] sm:$0xff]  ;;  %v3568_v27 = vld [vmem:[#allocation6 + $0x10] sm:$0xff] }
 0x763   :  { %3623 = vmatprep.subr.bf16.mxu1 %v3571_v16  ;;  %v3579_v9 = vld [vmem:[#allocation6 + $0x68] sm:$0xff]  ;;  %v3578_v18 = vld [vmem:[#allocation6 + $0x60] sm:$0xff]  ;;  %v3573_v28 = vld [vmem:[#allocation6 + $0x38] sm:$0xff] }
 0x764   :  { %v3583_v19 = vld [vmem:[#allocation6 + $0x88] sm:$0xff]  ;;  %v3582_v22 = vld [vmem:[#allocation6 + $0x80] sm:$0xff]  ;;  %v3572_v29 = vld [vmem:[#allocation6 + $0x30] sm:$0xff] }
 0x765   :  { %v3587_v61 = vld [vmem:[#allocation6 + $0xa8] sm:$0xff]  ;;  %v3586_v4 = vld [vmem:[#allocation6 + $0xa0] sm:$0xff]  ;;  %v3577_v30 = vld [vmem:[#allocation6 + $0x58] sm:$0xff] }
 0x766   :  { %3624 = vmatpush1.bf16.msra.mxu1 %v3570_v17  ;;  %v3591_v21 = vld [vmem:[#allocation6 + $0xc8] sm:$0xff]  ;;  %v3590_v50 = vld [vmem:[#allocation6 + $0xc0] sm:$0xff]  ;;  %v3576_v0 = vld [vmem:[#allocation6 + $0x50] sm:$0xff] }
 0x767   :  { %3625 = vmatprep.subr.bf16.mxu1 %v3575_v47  ;;  %v3595_v43 = vld [vmem:[#allocation6 + $0xe8] sm:$0xff]  ;;  %v3594_v24 = vld [vmem:[#allocation6 + $0xe0] sm:$0xff]  ;;  %v3581_v31 = vld [vmem:[#allocation6 + $0x78] sm:$0xff] }
 0x768   :  { %v3580_v32 = vld [vmem:[#allocation6 + $0x70] sm:$0xff]  ;;  %v3585_v33 = vld [vmem:[#allocation6 + $0x98] sm:$0xff] }
 0x769   :  { %v3584_v35 = vld [vmem:[#allocation6 + $0x90] sm:$0xff]  ;;  %v3589_v56 = vld [vmem:[#allocation6 + $0xb8] sm:$0xff] }
 0x76a   :  { %3626 = vmatpush1.bf16.msra.mxu1 %v3574_v8  ;;  %v3588_v36 = vld [vmem:[#allocation6 + $0xb0] sm:$0xff]  ;;  %v3593_v37 = vld [vmem:[#allocation6 + $0xd8] sm:$0xff] }
 0x76b   :  { %3627 = vmatprep.subr.bf16.mxu1 %v3579_v9  ;;  %v3597_v62 = vld [vmem:[#allocation6 + $0xf8] sm:$0xff]  ;;  %v3596_v60 = vld [vmem:[#allocation6 + $0xf0] sm:$0xff] }
 0x76c   :  { %v3598_v48 = vld [vmem:[#allocation17] sm:$0xf] }
 0x76d   :  { %v3604_v20 = vrot.slane %v3598_v48, %v6159_v58  ;;  %v3608_v23 = vrot.slane %v3598_v48, %v6707_v38  ;;  %v3612_v63 = vrot.slane %v3598_v48, %v6173_v44  ;;  %v3616_v57 = vrot.slane %v3598_v48, %v6176_v46 }
 0x76e   :  { %3628 = vmatpush1.bf16.msra.mxu1 %v3578_v18 }
 0x76f   :  { %3629 = vmatprep.subr.bf16.mxu1 %v3583_v19 }
 0x772   :  { %3630 = vmatpush1.bf16.msra.mxu1 %v3582_v22 }
 0x773   :  { %3631 = vmatprep.subr.bf16.mxu1 %v3587_v61 }
 0x776   :  { %3632 = vmatpush1.bf16.msra.mxu1 %v3586_v4 }
 0x777   :  { %3633 = vmatprep.subr.bf16.mxu1 %v3591_v21 }
 0x77a   :  { %3634 = vmatpush1.bf16.msra.mxu1 %v3590_v50 }
 0x77b   :  { %3635 = vmatprep.subr.bf16.mxu1 %v3595_v43 }
 0x77e   :  { %3636 = vmatpush1.bf16.msra.mxu1 %v3594_v24 }
 0x77f   :  { %3662 = vmatprep.subr.bf16.mxu1 %v3569_v25 }
 0x781   :  { %3654 = vmatmul.mubr.bf16.vlgmr.msra.gmra.mrb[24].mxu1 %v3599_v26 }
 0x782   :  { %3663 = vmatpush1.bf16.msra.mxu1 %v3568_v27  ;;  %3694 = vmatprep.mubr.bf16.mxu1 %v6708_v2  ;;  %v3592_v2 = vld [vmem:[#allocation6 + $0xd0] sm:$0xff] }
 0x783   :  { %3664 = vmatprep.subr.bf16.mxu1 %v3573_v28 }
 0x786   :  { %3665 = vmatpush1.bf16.msra.mxu1 %v3572_v29 }
 0x787   :  { %3666 = vmatprep.subr.bf16.mxu1 %v3577_v30 }
 0x78a   :  { %3667 = vmatpush1.bf16.msra.mxu1 %v3576_v0 }
 0x78b   :  { %3668 = vmatprep.subr.bf16.mxu1 %v3581_v31 }
 0x78e   :  { %3669 = vmatpush1.bf16.msra.mxu1 %v3580_v32 }
 0x78f   :  { %3670 = vmatprep.subr.bf16.mxu1 %v3585_v33 }
 0x792   :  { %3671 = vmatpush1.bf16.msra.mxu1 %v3584_v35 }
 0x793   :  { %3672 = vmatprep.subr.bf16.mxu1 %v3589_v56 }
 0x796   :  { %3673 = vmatpush1.bf16.msra.mxu1 %v3588_v36 }
 0x797   :  { %3674 = vmatprep.subr.bf16.mxu1 %v3593_v37 }
 0x79a   :  { %3675 = vmatpush1.bf16.msra.mxu1 %v3592_v2 }
 0x79b   :  { %3676 = vmatprep.subr.bf16.mxu1 %v3597_v62 }
 0x79e   :  { %3677 = vmatpush1.bf16.msra.mxu1 %v3596_v60 }
 0x7a1   :  { %3695 = vmatmul.mubr.bf16.vlgmr.msra.gmra.mrb[28].mxu1 %v3599_v26 }
 0x854   :  { %v3655_v53 = vpop.f32.mrb[24].mxu1 }
 0x855   :  { %v6492_v59 = vadd.f32 %v3655_v53, %v3604_v20  ;;  %v3657_v54 = vpop.f32.mrb[25].mxu1 }
 0x856   :  { %v3658_v51 = vadd.f32 %v3657_v54, %v3608_v23  ;;  %v3659_v40 = vpop.f32.mrb[26].mxu1 }
 0x857   :  { %v3703_v41 = vmax.f32 %v6492_v59, 0.0  ;;  %v3660_v42 = vpop.f32.mrb[27].mxu1 }
 0x858   :  { %v3704_v55 = vmax.f32 %v3658_v51, 0.0 }
 0x874   :  { %v3696_v45 = vpop.f32.mrb[28].mxu1 }
 0x875   :  { %v6497_v1 = vadd.f32 %v3696_v45, %v3612_v63  ;;  %v3698_v58 = vpop.f32.mrb[29].mxu1 }
 0x876   :  { %v3699_v5 = vadd.f32 %v3698_v58, %v3616_v57  ;;  %v3700_v38 = vpop.f32.mrb[30].mxu1 }
 0x877   :  { %v3705_v3 = vmax.f32 %v6497_v1, 0.0  ;;  %v3701_v52 = vpop.f32.mrb[31].mxu1 }
 0x878   :  { %v3706_v6 = vmax.f32 %v3699_v5, 0.0 }
 0x879   :  { %4608 = dma.done.wait [#allocation8 + $0x5], 4096 }
 0x87a   :  { %4609 = vsyncadd [#allocation8 + $0x5], 4294963200  ;;  %v3744_v7 = vpack.c.bf16 %v3704_v55, %v3704_v55  ;;  %v3746_v39 = vpack.c.bf16 %v3706_v6, %v3706_v6  ;;  %v3718_v10 = vld [vmem:[#allocation7 + $0x40] sm:$0xff]  ;;  %v3719_v49 = vld [vmem:[#allocation7 + $0x48] sm:$0xff]  ;;  %v3743_v32 = vpack.c.bf16 %v3703_v41, %v3703_v41  ;;  %v3745_v33 = vpack.c.bf16 %v3705_v3, %v3705_v3  ;;  %s4638_s23 = smov [#allocation20]  }
 0x87b   :  { %v3734_v44 = vld [vmem:[#allocation7 + $0xc0] sm:$0xff]  ;;  %4149 = vmatprep.subr.bf16.mxu1 %v3718_v10  ;;  %v3735_v11 = vld [vmem:[#allocation7 + $0xc8] sm:$0xff]  ;;  %v3720_v14 = vld [vmem:[#allocation7 + $0x50] sm:$0xff]  ;;  %s3840_s24 = sshll.u32 %s4638_s23, 4  ;;  %s3841_s24 = int_to_ptr.vmem [resolvable:$true] %s3840_s24 }
 0x87c   :  { %3785 = vmatprep.mubr.bf16.mxu1 %v3744_v7  ;;  %3825 = vmatprep.mubr.bf16.mxu0 %v3746_v39  ;;  %v3710_v34 = vld [vmem:[#allocation7] sm:$0xff]  ;;  %v3711_v12 = vld [vmem:[#allocation7 + $0x8] sm:$0xff]  ;;  %v3736_v15 = vld [vmem:[#allocation7 + $0xd0] sm:$0xff]  ;;  %s4568_s26 = scalar_lea.vmem %s3841_s24, 32  ;;  %p4573_p9 = scmp.lt.s32.totalorder %s3841_s24, %s3841_s24 }
 0x87d   :  { %4171 = vmatprep.subr.bf16.mxu0 %v3734_v44  ;;  %v3726_v46 = vld [vmem:[#allocation7 + $0x80] sm:$0xff]  ;;  %4150 = vmatpush3.bf16.msra.mxu1 %v3710_v34  ;;  %v3727_v13 = vld [vmem:[#allocation7 + $0x88] sm:$0xff]  ;;  %v3712_v16 = vld [vmem:[#allocation7 + $0x10] sm:$0xff]  ;;  %p4569_p8 = scmp.ne.s32.totalorder %s3841_s24, %s4568_s26  ;;  %p4574_p10 = scmp.lt.s32.totalorder %s4568_s26, %s4568_s26 }
 0x87e   :  { %4172 = vmatpush3.bf16.msra.mxu0 %v3726_v46  ;;  %4151 = vmatprep.subr.bf16.mxu1 %v3719_v49  ;;  %v3728_v17 = vld [vmem:[#allocation7 + $0x90] sm:$0xff]  ;;  %v3721_v47 = vld [vmem:[#allocation7 + $0x58] sm:$0xff]  ;;  %v3722_v19 = vld [vmem:[#allocation7 + $0x60] sm:$0xff] }
 0x87f   :  { %4173 = vmatprep.subr.bf16.mxu0 %v3735_v11  ;;  %v3737_v8 = vld [vmem:[#allocation7 + $0xd8] sm:$0xff]  ;;  %v3738_v22 = vld [vmem:[#allocation7 + $0xe0] sm:$0xff]  ;;  %v3723_v21 = vld [vmem:[#allocation7 + $0x68] sm:$0xff]  ;;  %p4575_p11 = por %p4574_p10, %p4573_p9 }
 0x880   :  { %v3713_v9 = vld [vmem:[#allocation7 + $0x18] sm:$0xff]  ;;  %v3714_v61 = vld [vmem:[#allocation7 + $0x20] sm:$0xff]  ;;  %v3739_v50 = vld [vmem:[#allocation7 + $0xe8] sm:$0xff] }
 0x881   :  { %4152 = vmatpush3.bf16.msra.mxu1 %v3711_v12  ;;  %v3729_v18 = vld [vmem:[#allocation7 + $0x98] sm:$0xff]  ;;  %v3730_v4 = vld [vmem:[#allocation7 + $0xa0] sm:$0xff]  ;;  %v3715_v43 = vld [vmem:[#allocation7 + $0x28] sm:$0xff]  ;;  %p4576_p12 = pnand %p4575_p11, %p4569_p8 }
 0x882   :  { %4174 = vmatpush3.bf16.msra.mxu0 %v3727_v13  ;;  %4153 = vmatprep.subr.bf16.mxu1 %v3720_v14  ;;  %v3731_v24 = vld [vmem:[#allocation7 + $0xa8] sm:$0xff]  ;;  %v3724_v25 = vld [vmem:[#allocation7 + $0x70] sm:$0xff]  ;;  %v3725_v29 = vld [vmem:[#allocation7 + $0x78] sm:$0xff] }
 0x883   :  { %4175 = vmatprep.subr.bf16.mxu0 %v3736_v15  ;;  %v3740_v26 = vld [vmem:[#allocation7 + $0xf0] sm:$0xff]  ;;  %v3741_v30 = vld [vmem:[#allocation7 + $0xf8] sm:$0xff] }
 0x884   :  { %v3716_v27 = vld [vmem:[#allocation7 + $0x30] sm:$0xff]  ;;  %v3717_v0 = vld [vmem:[#allocation7 + $0x38] sm:$0xff] }
 0x885   :  { %4154 = vmatpush3.bf16.msra.mxu1 %v3712_v16  ;;  %v3732_v28 = vld [vmem:[#allocation7 + $0xb0] sm:$0xff]  ;;  %v3733_v31 = vld [vmem:[#allocation7 + $0xb8] sm:$0xff] }
 0x886   :  { %4176 = vmatpush3.bf16.msra.mxu0 %v3728_v17  ;;  %4155 = vmatprep.subr.bf16.mxu1 %v3721_v47  ;;  %v4120_v36 = vld [vmem:[#allocation18] ss:$0 sm:$0xff] }
 0x887   :  { %4177 = vmatprep.subr.bf16.mxu0 %v3737_v8 }
 0x889   :  { %4156 = vmatpush3.bf16.msra.mxu1 %v3713_v9 }
 0x88a   :  { %4178 = vmatpush3.bf16.msra.mxu0 %v3729_v18  ;;  %4157 = vmatprep.subr.bf16.mxu1 %v3722_v19 }
 0x88b   :  { %4179 = vmatprep.subr.bf16.mxu0 %v3738_v22 }
 0x88d   :  { %4158 = vmatpush3.bf16.msra.mxu1 %v3714_v61 }
 0x88e   :  { %4180 = vmatpush3.bf16.msra.mxu0 %v3730_v4  ;;  %4159 = vmatprep.subr.bf16.mxu1 %v3723_v21 }
 0x88f   :  { %4181 = vmatprep.subr.bf16.mxu0 %v3739_v50 }
 0x891   :  { %4160 = vmatpush3.bf16.msra.mxu1 %v3715_v43 }
 0x892   :  { %4182 = vmatpush3.bf16.msra.mxu0 %v3731_v24  ;;  %4161 = vmatprep.subr.bf16.mxu1 %v3724_v25 }
 0x893   :  { %4183 = vmatprep.subr.bf16.mxu0 %v3740_v26 }
 0x895   :  { %4162 = vmatpush3.bf16.msra.mxu1 %v3716_v27 }
 0x896   :  { %4184 = vmatpush3.bf16.msra.mxu0 %v3732_v28  ;;  %4163 = vmatprep.subr.bf16.mxu1 %v3725_v29 }
 0x897   :  { %4185 = vmatprep.subr.bf16.mxu0 %v3741_v30 }
 0x899   :  { %4164 = vmatpush3.bf16.msra.mxu1 %v3717_v0 }
 0x89a   :  { %4186 = vmatpush3.bf16.msra.mxu0 %v3733_v31 }
 0x89c   :  { %3786 = vmatmul.mubr.bf16.vlgmr.msra.gmra.mrb[32].mxu1 %v3743_v32 }
 0x89d   :  { %3826 = vmatmul.mubr.bf16.vlgmr.msra.gmra.mrb[20].mxu0 %v3745_v33 }
 0x96f   :  { %v4165_v35 = vpop.f32.mrb[32].mxu1 }
 0x970   :  { %v4187_v56 = vpop.f32.mrb[20].mxu0  ;;  %v4166_v37 = vpop.f32.mrb[33].mxu1 }
 0x971   :  { %v4188_v2 = vpop.f32.mrb[21].mxu0  ;;  %v4167_v62 = vadd.f32 %v4166_v37, %v4165_v35  ;;  %v4168_v48 = vpop.f32.mrb[34].mxu1 }
 0x972   :  { %v4189_v60 = vadd.f32 %v4188_v2, %v4187_v56  ;;  %v4190_v20 = vpop.f32.mrb[22].mxu0  ;;  %v4169_v23 = vpop.f32.mrb[35].mxu1 }
 0x973   :  { %v4191_v53 = vpop.f32.mrb[23].mxu0  ;;  %v3788_v59 = vadd.f32 %v4167_v62, %v4120_v36 }
 0x975   :  { %v3828_v54 = vadd.f32 %v4189_v60, %v3788_v59 }
 0x977   :  { %3833 = vst [vmem:[#allocation20] sm:$0x3] %v3828_v54 }
 0x978   :  { %4579 = shalt.err (!%p4576_p12)
}
 0x979   :  { %s4580_s11 = scalar_lea.hbm %s6535_s17, 32 }
 0x97a   :  { %p4581_p13 = scmp.ne.s32.totalorder %s6535_s17, %s4580_s11  ;;  %p4584_p0 = scmp.lt.u32.totalorder %s4580_s11, %s6535_s17 }
 0x97c   :  { %p4586_p1 = pnand %p4584_p0, %p4581_p13 }
 0x97e   :  { %4589 = shalt.err (!%p4586_p1)
}
 0x97f   :  { %3843 = dma.vmem_to_hbm [thread:$0]  %s3841_s24, 32, %s6535_s17, [#allocation11]  }
 0x980   :  { %4610 = dma.done.wait [#allocation11], 32  }
 0x981   :  { %4611 = vsyncadd [#allocation11], 4294967264 }
 0x982   :  { %3847 = vsyncpa [#allocation10], 1 }
 0x983   :  { %3848 = vsyncpa [#allocation13], 1 }
 0x984   :  { %3849 = vsyncpa [#allocation16], 1 }
 0x985   :  { %3850 = vsyncpa [#allocation19], 1 }
 0x986   :  { %3851 = vsyncpa [#allocation11], 1 }
 0x987   :  { %3852 = vsyncmov [#allocation8] }
 0x98a   :  { %s3853_s14 = vpop.sfrf %3852 }
 0x98b   :  { %p4121_p2 = scmp.ne.s32.totalorder %s3853_s14, 0 }
 0x98d   :  { %3857 = shalt.err (%p4121_p2)  }
 0x98e   :  { %3859 = vsyncmov [#allocation8 + $0x1] }
 0x991   :  { %s3860_s18 = vpop.sfrf %3859 }
 0x992   :  { %p4122_p3 = scmp.ne.s32.totalorder %s3860_s18, 0 }
 0x994   :  { %3864 = shalt.err (%p4122_p3)  }
 0x995   :  { %3866 = vsyncmov [#allocation8 + $0x2] }
 0x998   :  { %s3867_s19 = vpop.sfrf %3866 }
 0x999   :  { %p4123_p4 = scmp.ne.s32.totalorder %s3867_s19, 0 }
 0x99b   :  { %3871 = shalt.err (%p4123_p4)  }
 0x99c   :  { %3873 = vsyncmov [#allocation8 + $0x3] }
 0x99f   :  { %s3874_s17 = vpop.sfrf %3873 }
 0x9a0   :  { %p4124_p5 = scmp.ne.s32.totalorder %s3874_s17, 0 }
 0x9a2   :  { %3878 = shalt.err (%p4124_p5)  }
 0x9a3   :  { %3880 = vsyncmov [#allocation8 + $0x4] }
 0x9a6   :  { %s3881_s15 = vpop.sfrf %3880 }
 0x9a7   :  { %p4125_p6 = scmp.ne.s32.totalorder %s3881_s15, 0 }
 0x9a9   :  { %3885 = shalt.err (%p4125_p6)  }
 0x9aa   :  { %3887 = vsyncmov [#allocation8 + $0x5] }
 0x9ad   :  { %s3888_s20 = vpop.sfrf %3887 }
 0x9ae   :  { %p4126_p7 = scmp.ne.s32.totalorder %s3888_s20, 0 }
 0x9b0   :  { %3892 = shalt.err (%p4126_p7)  }

</bundles_post_ra>
